<compile_context>
chip_gen: v7x
topology: tpu7x:2x2x1
jax: 0.10.0
libtpu: 0.0.40
codegen_flags: <defaults>
</compile_context>

<pallas_src>
import functools

import jax
import jax.numpy as jnp
from jax.experimental import pallas as pl
from jax.experimental.pallas import tpu as pltpu

_EPS = 1e-5
_F_PAD = 512      # fc/BN feature width, padded up from 500
_OUT_PAD = 128    # lane-dense fc4 output width, padded up from 5


# ----------------------------------------------------------------------------
# Fused forward kernel
# ----------------------------------------------------------------------------
def _qrnn_fused_kernel(
    # ---- inputs -------------------------------------------------------------
    p1_ref,                       # [N*64, 8]  conv1 im2col patches (see _conv1_patches)
    w1_ref, b1_ref,               # [8, 20], [1, 20]          f32
    w2_ref, b2_ref,               # [80, 50], [1, 50]         f32 (rows = kh,kw,ic)
    wf1_ref, bf1_ref,             # [200, 512] bf16, [1, 512] f32 (flatten pre-folded)
    g1_ref, be1_ref,              # [1, 512] f32 x2
    wf2_ref, bf2_ref, g2_ref, be2_ref,
    wf3_ref, bf3_ref, g3_ref, be3_ref,
    wf4_ref, bf4_ref,             # [512, 128] f32, [1, 128] f32
    # ---- output -------------------------------------------------------------
    out_ref,                      # [N, 128]
    *, n_batch, eps):
    f32 = jnp.float32
    bf16 = jnp.bfloat16
    N = n_batch
    C1 = 20                       # conv1 output channels
    HB, WB = 8 * N, 4 * N         # hp-block / wp-sub-block row counts

    # -------- conv1 (single im2col matmul) + ReLU ----------------------------
    y1 = jnp.dot(p1_ref[...], w1_ref[...], preferred_element_type=f32)
    y1 = jnp.maximum(y1 + b1_ref[...], 0.0)                        # [64N, 20]

    # -------- maxpool1 (2x2/2): two contiguous half-array maxima -------------
    # p1 rows are ordered (h%2, w%2, hp, wp, i, j, n), so pooling is two
    # whole-array maxima; the surviving rows are ordered (hp, wp, i, j, n)
    # with pooled1 coords (2i+hp, 2j+wp).
    m = jnp.maximum(y1[:32 * N], y1[32 * N:])
    a = jnp.maximum(m[:16 * N], m[16 * N:])                        # [16N, 20]

    # -------- conv2 as ONE whole-batch matmul ---------------------------------
    # Build the four 2x2-kernel shifts of the (implicitly zero-padded) pooled1
    # tensor with whole-array slice/concat/mask ops -- no per-sample loops,
    # no scratch buffers, no masked sub-(8,128) stores.
    keep_j = (jax.lax.broadcasted_iota(jnp.int32, (WB, C1), 0) % (2 * N)) >= N
    keep_i = (jax.lax.broadcasted_iota(jnp.int32, (HB, C1), 0) % (4 * N)) >= 2 * N
    zrow_j = jnp.zeros((N, C1), f32)
    zrow_i = jnp.zeros((2 * N, C1), f32)

    def wshift(t):
        """Value at (oh, ow-1) given t holds values at (oh, ow); rows (hp,wp,i,j,n)."""
        blocks = []
        for hp in range(2):
            wp0 = t[hp * HB: hp * HB + WB]
            wp1 = t[hp * HB + WB: hp * HB + 2 * WB]
            sh = jnp.concatenate([zrow_j, wp1[:WB - N]], axis=0)
            blocks.append(jnp.where(keep_j, sh, 0.0))   # dest wp=0 rows (ow even)
            blocks.append(wp0)                          # dest wp=1 rows (ow odd)
        return jnp.concatenate(blocks, axis=0)

    def hshift(t):
        """Value at (oh-1, ow) given t holds values at (oh, ow)."""
        sh = jnp.concatenate([zrow_i, t[HB: 2 * HB - 2 * N]], axis=0)
        return jnp.concatenate([jnp.where(keep_i, sh, 0.0), t[:HB]], axis=0)

    s11 = a                      # (kh, kw) = (1, 1)
    s10 = wshift(a)              # (1, 0)
    s01 = hshift(a)              # (0, 1)
    s00 = wshift(s01)            # (0, 0)
    patches2 = jnp.concatenate([s00, s01, s10, s11], axis=1)       # [16N, 80]

    y2 = jnp.dot(patches2, w2_ref[...], preferred_element_type=f32)
    y2 = jnp.maximum(y2 + b2_ref[...], 0.0)                        # [16N, 50]

    # -------- maxpool2 (2x2/2): again two contiguous half-array maxima --------
    t2 = jnp.maximum(y2[:8 * N], y2[8 * N:])
    pooled2 = jnp.maximum(t2[:4 * N], t2[4 * N:])                  # [4N, 50], rows (i, j, n)

    # -------- flatten -> [N, 200]  (feature index = (h*2+w)*50 + c) -----------
    # fc1's weight is pre-permuted to this ordering (static re-layout of
    # PyTorch's fc1.weight[out, c*4 + h*2 + w]); the math is unchanged.
    x = jnp.concatenate([pooled2[k * N:(k + 1) * N] for k in range(4)], axis=1)

    # -------- fc1..fc3 + ReLU + BN, then fc4  (512-padded, bf16 weights) ------
    def bn(y, gamma, beta):
        inv_n = 1.0 / y.shape[0]
        mean = jnp.sum(y, axis=0, keepdims=True) * inv_n
        msq = jnp.sum(y * y, axis=0, keepdims=True) * inv_n
        var = msq - mean * mean                         # biased (training-mode) var
        return (y - mean) * jax.lax.rsqrt(var + eps) * gamma + beta

    y = jnp.dot(x.astype(bf16), wf1_ref[...], preferred_element_type=f32)
    y = jnp.maximum(y + bf1_ref[...], 0.0)
    y = bn(y, g1_ref[...], be1_ref[...])

    y = jnp.dot(y.astype(bf16), wf2_ref[...], preferred_element_type=f32)
    y = jnp.maximum(y + bf2_ref[...], 0.0)
    y = bn(y, g2_ref[...], be2_ref[...])

    y = jnp.dot(y.astype(bf16), wf3_ref[...], preferred_element_type=f32)
    y = jnp.maximum(y + bf3_ref[...], 0.0)
    y = bn(y, g3_ref[...], be3_ref[...])

    out = jnp.dot(y, wf4_ref[...], preferred_element_type=f32) + bf4_ref[...]
    out_ref[...] = out.astype(out_ref.dtype)


# ----------------------------------------------------------------------------
# Wrapper: conv1 patch prep (tiny, XLA-fused) + the single pallas_call
# ----------------------------------------------------------------------------
def _conv1_patches(x_nchw):
    """im2col patches for conv1 (k=2, pad=1).

    Rows ordered (h%2, w%2, (h//2)%2, (w//2)%2, h//4, w//4, n); cols (kh,kw,ic).
    With this ordering pool1 is two contiguous half-array maxima and the
    pooled rows come out ordered (hp, wp, i, j, n) -- exactly what the
    in-kernel vectorised conv2 + pool2 expects.
    """
    n = x_nchw.shape[0]
    x = jnp.transpose(x_nchw, (0, 2, 3, 1))                     # NCHW -> NHWC [N,7,7,2]
    xp = jnp.pad(x, ((0, 0), (1, 1), (1, 1), (0, 0)))           # [N,9,9,2]
    cols = [xp[:, kh:kh + 8, kw:kw + 8, :] for kh in (0, 1) for kw in (0, 1)]
    p = jnp.stack(cols, axis=3).reshape(n, 8, 8, 8)             # cols = (kh, kw, ic)
    # h = 4*i + 2*hp + a ;  w = 4*j + 2*wp + b
    p = p.reshape(n, 2, 2, 2, 2, 2, 2, 8)                       # (n, i, hp, a, j, wp, b, col)
    p = jnp.transpose(p, (3, 6, 2, 5, 1, 4, 0, 7))              # (a, b, hp, wp, i, j, n, col)
    return p.reshape(n * 64, 8)


def _full_spec(shape):
    nd = len(shape)
    return pl.BlockSpec(shape, lambda *_: (0,) * nd)


def qrnn_forward(params, x_nchw):
    n = x_nchw.shape[0]
    p1 = _conv1_patches(x_nchw)
    args = (
        p1,
        params["conv1_w"], params["conv1_b"],
        params["conv2_w"], params["conv2_b"],
        params["fc1_w"], params["fc1_b"], params["bn1_g"], params["bn1_b"],
        params["fc2_w"], params["fc2_b"], params["bn2_g"], params["bn2_b"],
        params["fc3_w"], params["fc3_b"], params["bn3_g"], params["bn3_b"],
        params["fc4_w"], params["fc4_b"],
    )
    kern = functools.partial(_qrnn_fused_kernel, n_batch=n, eps=_EPS)
    # TODO(synk): for large batches (N >~ 1-2k, esp. v7x's 64 MiB VMEM), split
    # into a batch-gridded ("parallel") conv trunk emitting [N, 200] features
    # plus a whole-batch fc+BN call; this single fused call targets small/medium N.
    out = pl.pallas_call(
        kern,
        out_shape=jax.ShapeDtypeStruct((n, _OUT_PAD), jnp.float32),
        grid=(1,),
        in_specs=[_full_spec(a.shape) for a in args],
        out_specs=_full_spec((n, _OUT_PAD)),
        compiler_params=pltpu.CompilerParams(
            dimension_semantics=("arbitrary",),
            vmem_limit_bytes=32 * 1024 * 1024),
    )(*args)
    return out[:, :5]        # lane-dense kernel output; real logits are cols 0..4


# ----------------------------------------------------------------------------
# Parameter init (deterministic; matches the PyTorch module's shapes, stored in
# matmul-ready / pre-permuted / zero-padded layouts)
# ----------------------------------------------------------------------------
def init_params(key):
    ks = jax.random.split(key, 12)
    f32, bf16 = jnp.float32, jnp.bfloat16
    u = lambda k, shape, s: jax.random.uniform(k, shape, f32, -s, s)

    def pad(a, rows, cols):
        return jnp.pad(a, ((0, rows - a.shape[0]), (0, cols - a.shape[1])))

    # bf16 weights for the big fc matmuls (f32 accumulation in-kernel).
    fc1_w = pad(u(ks[4], (200, 500), 0.0707), 200, _F_PAD).astype(bf16)
    fc2_w = pad(u(ks[6], (500, 500), 0.0447), _F_PAD, _F_PAD).astype(bf16)
    fc3_w = pad(u(ks[8], (500, 500), 0.0447), _F_PAD, _F_PAD).astype(bf16)
    fc4_w = pad(u(ks[10], (500, 5), 0.0447), _F_PAD, _OUT_PAD)     # f32

    return {
        # conv1: rows = (kh, kw, ic), cols = oc.
        "conv1_w": u(ks[0], (8, 20), 0.3536),
        "conv1_b": u(ks[1], (1, 20), 0.3536),
        # conv2: rows = (kh, kw, ic) stacked to 80 (order (0,0),(0,1),(1,0),(1,1)
        # matching the in-kernel patch concat), cols = oc.
        "conv2_w": u(ks[2], (80, 50), 0.1118),
        "conv2_b": u(ks[3], (1, 50), 0.1118),
        # fc1 pre-permuted: row (h*2+w)*50 + c  ==  PyTorch fc1.weight[out, c*4+h*2+w];
        # outputs zero-padded 500 -> 512.
        "fc1_w": fc1_w, "fc1_b": pad(u(ks[5], (1, 500), 0.0707), 1, _F_PAD),
        "fc2_w": fc2_w, "fc2_b": pad(u(ks[7], (1, 500), 0.0447), 1, _F_PAD),
        "fc3_w": fc3_w, "fc3_b": pad(u(ks[9], (1, 500), 0.0447), 1, _F_PAD),
        "fc4_w": fc4_w, "fc4_b": pad(u(ks[11], (1, 5), 0.0447), 1, _OUT_PAD),
        # BatchNorm1d affine init: gamma=1, beta=0, eps=1e-5.  Padding lanes are
        # harmless: their activations are exactly 0 before and after BN.
        "bn1_g": jnp.ones((1, _F_PAD), f32), "bn1_b": jnp.zeros((1, _F_PAD), f32),
        "bn2_g": jnp.ones((1, _F_PAD), f32), "bn2_b": jnp.zeros((1, _F_PAD), f32),
        "bn3_g": jnp.ones((1, _F_PAD), f32), "bn3_b": jnp.zeros((1, _F_PAD), f32),
    }


if __name__ == "__main__":
    key = jax.random.PRNGKey(0)
    kp, kx = jax.random.split(key)
    params = init_params(kp)

    # 2-channel 7x7 input so that conv(pad1,k2) -> pool -> conv(pad1,k2) -> pool
    # yields the 2*2*50 flatten of the reference module.
    x = jax.random.normal(kx, (2, 2, 7, 7), jnp.float32)

    out = jax.block_until_ready(jax.jit(qrnn_forward)(params, x))
    assert out.shape == (2, 5), out.shape
    print("KERNEL_OK")
</pallas_src>

<mosaic_0001>
module attributes {stable_mosaic.version = 11 : i64} {
  func.func @_qrnn_fused_kernel(%arg0: i32, %arg1: memref<128x8xf32, #tpu.memory_space<vmem>>, %arg2: memref<8x20xf32, #tpu.memory_space<vmem>>, %arg3: memref<1x20xf32, #tpu.memory_space<vmem>>, %arg4: memref<80x50xf32, #tpu.memory_space<vmem>>, %arg5: memref<1x50xf32, #tpu.memory_space<vmem>>, %arg6: memref<200x512xbf16, #tpu.memory_space<vmem>>, %arg7: memref<1x512xf32, #tpu.memory_space<vmem>>, %arg8: memref<1x512xf32, #tpu.memory_space<vmem>>, %arg9: memref<1x512xf32, #tpu.memory_space<vmem>>, %arg10: memref<512x512xbf16, #tpu.memory_space<vmem>>, %arg11: memref<1x512xf32, #tpu.memory_space<vmem>>, %arg12: memref<1x512xf32, #tpu.memory_space<vmem>>, %arg13: memref<1x512xf32, #tpu.memory_space<vmem>>, %arg14: memref<512x512xbf16, #tpu.memory_space<vmem>>, %arg15: memref<1x512xf32, #tpu.memory_space<vmem>>, %arg16: memref<1x512xf32, #tpu.memory_space<vmem>>, %arg17: memref<1x512xf32, #tpu.memory_space<vmem>>, %arg18: memref<512x128xf32, #tpu.memory_space<vmem>>, %arg19: memref<1x128xf32, #tpu.memory_space<vmem>>, %arg20: memref<2x128xf32, #tpu.memory_space<vmem>>) attributes {dimension_semantics = [#tpu.dimension_semantics<arbitrary>], iteration_bounds = array<i64: 1>, scalar_prefetch = 0 : i64, scratch_operands = 0 : i64, tpu.core_type = #tpu.core_type<tc>, window_params = [{pipeline_mode = #tpu.pipeline_mode<synchronous>, transform_indices = @transform_0, window_bounds = array<i64: 128, 8>}, {pipeline_mode = #tpu.pipeline_mode<synchronous>, transform_indices = @transform_1, window_bounds = array<i64: 8, 20>}, {pipeline_mode = #tpu.pipeline_mode<synchronous>, transform_indices = @transform_2, window_bounds = array<i64: 1, 20>}, {pipeline_mode = #tpu.pipeline_mode<synchronous>, transform_indices = @transform_3, window_bounds = array<i64: 80, 50>}, {pipeline_mode = #tpu.pipeline_mode<synchronous>, transform_indices = @transform_4, window_bounds = array<i64: 1, 50>}, {pipeline_mode = #tpu.pipeline_mode<synchronous>, transform_indices = @transform_5, window_bounds = array<i64: 200, 512>}, {pipeline_mode = #tpu.pipeline_mode<synchronous>, transform_indices = @transform_6, window_bounds = array<i64: 1, 512>}, {pipeline_mode = #tpu.pipeline_mode<synchronous>, transform_indices = @transform_7, window_bounds = array<i64: 1, 512>}, {pipeline_mode = #tpu.pipeline_mode<synchronous>, transform_indices = @transform_8, window_bounds = array<i64: 1, 512>}, {pipeline_mode = #tpu.pipeline_mode<synchronous>, transform_indices = @transform_9, window_bounds = array<i64: 512, 512>}, {pipeline_mode = #tpu.pipeline_mode<synchronous>, transform_indices = @transform_10, window_bounds = array<i64: 1, 512>}, {pipeline_mode = #tpu.pipeline_mode<synchronous>, transform_indices = @transform_11, window_bounds = array<i64: 1, 512>}, {pipeline_mode = #tpu.pipeline_mode<synchronous>, transform_indices = @transform_12, window_bounds = array<i64: 1, 512>}, {pipeline_mode = #tpu.pipeline_mode<synchronous>, transform_indices = @transform_13, window_bounds = array<i64: 512, 512>}, {pipeline_mode = #tpu.pipeline_mode<synchronous>, transform_indices = @transform_14, window_bounds = array<i64: 1, 512>}, {pipeline_mode = #tpu.pipeline_mode<synchronous>, transform_indices = @transform_15, window_bounds = array<i64: 1, 512>}, {pipeline_mode = #tpu.pipeline_mode<synchronous>, transform_indices = @transform_16, window_bounds = array<i64: 1, 512>}, {pipeline_mode = #tpu.pipeline_mode<synchronous>, transform_indices = @transform_17, window_bounds = array<i64: 512, 128>}, {pipeline_mode = #tpu.pipeline_mode<synchronous>, transform_indices = @transform_18, window_bounds = array<i64: 1, 128>}, {pipeline_mode = #tpu.pipeline_mode<synchronous>, transform_indices = @transform_19, window_bounds = array<i64: 2, 128>}]} {
    %c0 = arith.constant 0 : index
    %c0_0 = arith.constant 0 : index
    %0 = vector.load %arg1[%c0, %c0_0] : memref<128x8xf32, #tpu.memory_space<vmem>>, vector<128x8xf32>
    %c0_1 = arith.constant 0 : index
    %c0_2 = arith.constant 0 : index
    %1 = vector.load %arg2[%c0_1, %c0_2] : memref<8x20xf32, #tpu.memory_space<vmem>>, vector<8x20xf32>
    %cst = arith.constant dense<0.000000e+00> : vector<128x20xf32>
    %2 = tpu.matmul %0, %1, %cst {dimension_numbers = #tpu.dot_dimension_numbers<[1], [0], [0], [1], [0, 0, 1, 1], [], []>} : vector<128x8xf32>, vector<8x20xf32>, vector<128x20xf32> -> vector<128x20xf32>
    %c0_3 = arith.constant 0 : index
    %c0_4 = arith.constant 0 : index
    %3 = vector.load %arg3[%c0_3, %c0_4] : memref<1x20xf32, #tpu.memory_space<vmem>>, vector<1x20xf32>
    %4 = vector.broadcast %3 : vector<1x20xf32> to vector<128x20xf32>
    %5 = arith.addf %2, %4 : vector<128x20xf32>
    %cst_5 = arith.constant 0.000000e+00 : f32
    %6 = vector.broadcast %cst_5 : f32 to vector<128x20xf32>
    %7 = arith.maximumf %5, %6 : vector<128x20xf32>
    %8 = vector.extract_strided_slice %7 {offsets = [0, 0], sizes = [64, 20], strides = [1, 1]} : vector<128x20xf32> to vector<64x20xf32>
    %9 = vector.extract_strided_slice %7 {offsets = [64, 0], sizes = [64, 20], strides = [1, 1]} : vector<128x20xf32> to vector<64x20xf32>
    %10 = arith.maximumf %8, %9 : vector<64x20xf32>
    %11 = vector.extract_strided_slice %10 {offsets = [0, 0], sizes = [32, 20], strides = [1, 1]} : vector<64x20xf32> to vector<32x20xf32>
    %12 = vector.extract_strided_slice %10 {offsets = [32, 0], sizes = [32, 20], strides = [1, 1]} : vector<64x20xf32> to vector<32x20xf32>
    %13 = arith.maximumf %11, %12 : vector<32x20xf32>
    %14 = tpu.iota {dimensions = array<i32: 0>} : vector<8x20xi32>
    %c4_i32 = arith.constant 4 : i32
    %c0_i32 = arith.constant 0 : i32
    %15 = arith.cmpi eq, %c4_i32, %c0_i32 : i32
    %c1_i32 = arith.constant 1 : i32
    %16 = arith.select %15, %c1_i32, %c4_i32 : i32
    %17 = vector.broadcast %16 : i32 to vector<8x20xi32>
    %18 = arith.remsi %14, %17 : vector<8x20xi32>
    %c0_i32_6 = arith.constant 0 : i32
    %19 = vector.broadcast %c0_i32_6 : i32 to vector<8x20xi32>
    %20 = arith.cmpi ne, %18, %19 : vector<8x20xi32>
    %c0_i32_7 = arith.constant 0 : i32
    %21 = vector.broadcast %c0_i32_7 : i32 to vector<8x20xi32>
    %22 = arith.cmpi slt, %18, %21 : vector<8x20xi32>
    %c0_i32_8 = arith.constant 0 : i32
    %23 = arith.cmpi slt, %16, %c0_i32_8 : i32
    %24 = vector.broadcast %23 : i1 to vector<8x20xi1>
    %25 = vector.broadcast %24 : vector<8x20xi1> to vector<8x20xi1>
    %26 = arith.xori %22, %25 : vector<8x20xi1>
    %27 = arith.andi %26, %20 : vector<8x20xi1>
    %28 = vector.broadcast %16 : i32 to vector<8x20xi32>
    %29 = arith.addi %18, %28 : vector<8x20xi32>
    %30 = arith.select %27, %29, %18 : vector<8x20xi1>, vector<8x20xi32>
    %c2_i32 = arith.constant 2 : i32
    %31 = vector.broadcast %c2_i32 : i32 to vector<8x20xi32>
    %32 = arith.cmpi sge, %30, %31 : vector<8x20xi32>
    %33 = tpu.iota {dimensions = array<i32: 0>} : vector<16x20xi32>
    %c8_i32 = arith.constant 8 : i32
    %c0_i32_9 = arith.constant 0 : i32
    %34 = arith.cmpi eq, %c8_i32, %c0_i32_9 : i32
    %c1_i32_10 = arith.constant 1 : i32
    %35 = arith.select %34, %c1_i32_10, %c8_i32 : i32
    %36 = vector.broadcast %35 : i32 to vector<16x20xi32>
    %37 = arith.remsi %33, %36 : vector<16x20xi32>
    %c0_i32_11 = arith.constant 0 : i32
    %38 = vector.broadcast %c0_i32_11 : i32 to vector<16x20xi32>
    %39 = arith.cmpi ne, %37, %38 : vector<16x20xi32>
    %c0_i32_12 = arith.constant 0 : i32
    %40 = vector.broadcast %c0_i32_12 : i32 to vector<16x20xi32>
    %41 = arith.cmpi slt, %37, %40 : vector<16x20xi32>
    %c0_i32_13 = arith.constant 0 : i32
    %42 = arith.cmpi slt, %35, %c0_i32_13 : i32
    %43 = vector.broadcast %42 : i1 to vector<16x20xi1>
    %44 = vector.broadcast %43 : vector<16x20xi1> to vector<16x20xi1>
    %45 = arith.xori %41, %44 : vector<16x20xi1>
    %46 = arith.andi %45, %39 : vector<16x20xi1>
    %47 = vector.broadcast %35 : i32 to vector<16x20xi32>
    %48 = arith.addi %37, %47 : vector<16x20xi32>
    %49 = arith.select %46, %48, %37 : vector<16x20xi1>, vector<16x20xi32>
    %c4_i32_14 = arith.constant 4 : i32
    %50 = vector.broadcast %c4_i32_14 : i32 to vector<16x20xi32>
    %51 = arith.cmpi sge, %49, %50 : vector<16x20xi32>
    %cst_15 = arith.constant 0.000000e+00 : f32
    %52 = vector.broadcast %cst_15 : f32 to vector<2x20xf32>
    %cst_16 = arith.constant 0.000000e+00 : f32
    %53 = vector.broadcast %cst_16 : f32 to vector<4x20xf32>
    %54 = vector.extract_strided_slice %13 {offsets = [0, 0], sizes = [8, 20], strides = [1, 1]} : vector<32x20xf32> to vector<8x20xf32>
    %55 = vector.extract_strided_slice %13 {offsets = [8, 0], sizes = [8, 20], strides = [1, 1]} : vector<32x20xf32> to vector<8x20xf32>
    %56 = vector.extract_strided_slice %55 {offsets = [0, 0], sizes = [6, 20], strides = [1, 1]} : vector<8x20xf32> to vector<6x20xf32>
    %57 = tpu.concatenate %52, %56 in 0 : vector<2x20xf32>, vector<6x20xf32> -> vector<8x20xf32>
    %cst_17 = arith.constant 0.000000e+00 : f32
    %58 = vector.broadcast %cst_17 : f32 to vector<8x20xf32>
    %59 = arith.select %32, %57, %58 : vector<8x20xi1>, vector<8x20xf32>
    %60 = vector.extract_strided_slice %13 {offsets = [16, 0], sizes = [8, 20], strides = [1, 1]} : vector<32x20xf32> to vector<8x20xf32>
    %61 = vector.extract_strided_slice %13 {offsets = [24, 0], sizes = [8, 20], strides = [1, 1]} : vector<32x20xf32> to vector<8x20xf32>
    %62 = vector.extract_strided_slice %61 {offsets = [0, 0], sizes = [6, 20], strides = [1, 1]} : vector<8x20xf32> to vector<6x20xf32>
    %63 = tpu.concatenate %52, %62 in 0 : vector<2x20xf32>, vector<6x20xf32> -> vector<8x20xf32>
    %cst_18 = arith.constant 0.000000e+00 : f32
    %64 = vector.broadcast %cst_18 : f32 to vector<8x20xf32>
    %65 = arith.select %32, %63, %64 : vector<8x20xi1>, vector<8x20xf32>
    %66 = tpu.concatenate %59, %54, %65, %60 in 0 : vector<8x20xf32>, vector<8x20xf32>, vector<8x20xf32>, vector<8x20xf32> -> vector<32x20xf32>
    %67 = vector.extract_strided_slice %13 {offsets = [16, 0], sizes = [12, 20], strides = [1, 1]} : vector<32x20xf32> to vector<12x20xf32>
    %68 = tpu.concatenate %53, %67 in 0 : vector<4x20xf32>, vector<12x20xf32> -> vector<16x20xf32>
    %cst_19 = arith.constant 0.000000e+00 : f32
    %69 = vector.broadcast %cst_19 : f32 to vector<16x20xf32>
    %70 = arith.select %51, %68, %69 : vector<16x20xi1>, vector<16x20xf32>
    %71 = vector.extract_strided_slice %13 {offsets = [0, 0], sizes = [16, 20], strides = [1, 1]} : vector<32x20xf32> to vector<16x20xf32>
    %72 = tpu.concatenate %70, %71 in 0 : vector<16x20xf32>, vector<16x20xf32> -> vector<32x20xf32>
    %73 = vector.extract_strided_slice %72 {offsets = [0, 0], sizes = [8, 20], strides = [1, 1]} : vector<32x20xf32> to vector<8x20xf32>
    %74 = vector.extract_strided_slice %72 {offsets = [8, 0], sizes = [8, 20], strides = [1, 1]} : vector<32x20xf32> to vector<8x20xf32>
    %75 = vector.extract_strided_slice %74 {offsets = [0, 0], sizes = [6, 20], strides = [1, 1]} : vector<8x20xf32> to vector<6x20xf32>
    %76 = tpu.concatenate %52, %75 in 0 : vector<2x20xf32>, vector<6x20xf32> -> vector<8x20xf32>
    %cst_20 = arith.constant 0.000000e+00 : f32
    %77 = vector.broadcast %cst_20 : f32 to vector<8x20xf32>
    %78 = arith.select %32, %76, %77 : vector<8x20xi1>, vector<8x20xf32>
    %79 = vector.extract_strided_slice %72 {offsets = [16, 0], sizes = [8, 20], strides = [1, 1]} : vector<32x20xf32> to vector<8x20xf32>
    %80 = vector.extract_strided_slice %72 {offsets = [24, 0], sizes = [8, 20], strides = [1, 1]} : vector<32x20xf32> to vector<8x20xf32>
    %81 = vector.extract_strided_slice %80 {offsets = [0, 0], sizes = [6, 20], strides = [1, 1]} : vector<8x20xf32> to vector<6x20xf32>
    %82 = tpu.concatenate %52, %81 in 0 : vector<2x20xf32>, vector<6x20xf32> -> vector<8x20xf32>
    %cst_21 = arith.constant 0.000000e+00 : f32
    %83 = vector.broadcast %cst_21 : f32 to vector<8x20xf32>
    %84 = arith.select %32, %82, %83 : vector<8x20xi1>, vector<8x20xf32>
    %85 = tpu.concatenate %78, %73, %84, %79 in 0 : vector<8x20xf32>, vector<8x20xf32>, vector<8x20xf32>, vector<8x20xf32> -> vector<32x20xf32>
    %86 = tpu.concatenate %85, %72, %66, %13 in 1 : vector<32x20xf32>, vector<32x20xf32>, vector<32x20xf32>, vector<32x20xf32> -> vector<32x80xf32>
    %c0_22 = arith.constant 0 : index
    %c0_23 = arith.constant 0 : index
    %87 = vector.load %arg4[%c0_22, %c0_23] : memref<80x50xf32, #tpu.memory_space<vmem>>, vector<80x50xf32>
    %cst_24 = arith.constant dense<0.000000e+00> : vector<32x50xf32>
    %88 = tpu.matmul %86, %87, %cst_24 {dimension_numbers = #tpu.dot_dimension_numbers<[1], [0], [0], [1], [0, 0, 1, 1], [], []>} : vector<32x80xf32>, vector<80x50xf32>, vector<32x50xf32> -> vector<32x50xf32>
    %c0_25 = arith.constant 0 : index
    %c0_26 = arith.constant 0 : index
    %89 = vector.load %arg5[%c0_25, %c0_26] : memref<1x50xf32, #tpu.memory_space<vmem>>, vector<1x50xf32>
    %90 = vector.broadcast %89 : vector<1x50xf32> to vector<32x50xf32>
    %91 = arith.addf %88, %90 : vector<32x50xf32>
    %cst_27 = arith.constant 0.000000e+00 : f32
    %92 = vector.broadcast %cst_27 : f32 to vector<32x50xf32>
    %93 = arith.maximumf %91, %92 : vector<32x50xf32>
    %94 = vector.extract_strided_slice %93 {offsets = [0, 0], sizes = [16, 50], strides = [1, 1]} : vector<32x50xf32> to vector<16x50xf32>
    %95 = vector.extract_strided_slice %93 {offsets = [16, 0], sizes = [16, 50], strides = [1, 1]} : vector<32x50xf32> to vector<16x50xf32>
    %96 = arith.maximumf %94, %95 : vector<16x50xf32>
    %97 = vector.extract_strided_slice %96 {offsets = [0, 0], sizes = [8, 50], strides = [1, 1]} : vector<16x50xf32> to vector<8x50xf32>
    %98 = vector.extract_strided_slice %96 {offsets = [8, 0], sizes = [8, 50], strides = [1, 1]} : vector<16x50xf32> to vector<8x50xf32>
    %99 = arith.maximumf %97, %98 : vector<8x50xf32>
    %100 = vector.extract_strided_slice %99 {offsets = [0, 0], sizes = [2, 50], strides = [1, 1]} : vector<8x50xf32> to vector<2x50xf32>
    %101 = vector.extract_strided_slice %99 {offsets = [2, 0], sizes = [2, 50], strides = [1, 1]} : vector<8x50xf32> to vector<2x50xf32>
    %102 = vector.extract_strided_slice %99 {offsets = [4, 0], sizes = [2, 50], strides = [1, 1]} : vector<8x50xf32> to vector<2x50xf32>
    %103 = vector.extract_strided_slice %99 {offsets = [6, 0], sizes = [2, 50], strides = [1, 1]} : vector<8x50xf32> to vector<2x50xf32>
    %104 = tpu.concatenate %100, %101, %102, %103 in 1 : vector<2x50xf32>, vector<2x50xf32>, vector<2x50xf32>, vector<2x50xf32> -> vector<2x200xf32>
    %105 = arith.truncf %104 : vector<2x200xf32> to vector<2x200xbf16>
    %c0_28 = arith.constant 0 : index
    %c0_29 = arith.constant 0 : index
    %106 = vector.load %arg6[%c0_28, %c0_29] : memref<200x512xbf16, #tpu.memory_space<vmem>>, vector<200x512xbf16>
    %cst_30 = arith.constant dense<0.000000e+00> : vector<2x512xf32>
    %107 = tpu.matmul %105, %106, %cst_30 {dimension_numbers = #tpu.dot_dimension_numbers<[1], [0], [0], [1], [0, 0, 1, 1], [], []>} : vector<2x200xbf16>, vector<200x512xbf16>, vector<2x512xf32> -> vector<2x512xf32>
    %c0_31 = arith.constant 0 : index
    %c0_32 = arith.constant 0 : index
    %108 = vector.load %arg7[%c0_31, %c0_32] : memref<1x512xf32, #tpu.memory_space<vmem>>, vector<1x512xf32>
    %109 = vector.broadcast %108 : vector<1x512xf32> to vector<2x512xf32>
    %110 = arith.addf %107, %109 : vector<2x512xf32>
    %cst_33 = arith.constant 0.000000e+00 : f32
    %111 = vector.broadcast %cst_33 : f32 to vector<2x512xf32>
    %112 = arith.maximumf %110, %111 : vector<2x512xf32>
    %c0_34 = arith.constant 0 : index
    %c0_35 = arith.constant 0 : index
    %113 = vector.load %arg8[%c0_34, %c0_35] : memref<1x512xf32, #tpu.memory_space<vmem>>, vector<1x512xf32>
    %c0_36 = arith.constant 0 : index
    %c0_37 = arith.constant 0 : index
    %114 = vector.load %arg9[%c0_36, %c0_37] : memref<1x512xf32, #tpu.memory_space<vmem>>, vector<1x512xf32>
    %cst_38 = arith.constant dense<0.000000e+00> : vector<512xf32>
    %115 = vector.multi_reduction <add>, %112, %cst_38 [0] : vector<2x512xf32> to vector<512xf32>
    %116 = vector.shape_cast %115 : vector<512xf32> to vector<1x512xf32>
    %cst_39 = arith.constant 5.000000e-01 : f32
    %117 = vector.broadcast %cst_39 : f32 to vector<1x512xf32>
    %118 = arith.mulf %116, %117 : vector<1x512xf32>
    %119 = arith.mulf %112, %112 : vector<2x512xf32>
    %cst_40 = arith.constant dense<0.000000e+00> : vector<512xf32>
    %120 = vector.multi_reduction <add>, %119, %cst_40 [0] : vector<2x512xf32> to vector<512xf32>
    %121 = vector.shape_cast %120 : vector<512xf32> to vector<1x512xf32>
    %cst_41 = arith.constant 5.000000e-01 : f32
    %122 = vector.broadcast %cst_41 : f32 to vector<1x512xf32>
    %123 = arith.mulf %121, %122 : vector<1x512xf32>
    %124 = arith.mulf %118, %118 : vector<1x512xf32>
    %125 = arith.subf %123, %124 : vector<1x512xf32>
    %126 = vector.broadcast %118 : vector<1x512xf32> to vector<2x512xf32>
    %127 = arith.subf %112, %126 : vector<2x512xf32>
    %cst_42 = arith.constant 9.99999974E-6 : f32
    %128 = vector.broadcast %cst_42 : f32 to vector<1x512xf32>
    %129 = arith.addf %125, %128 : vector<1x512xf32>
    %130 = math.rsqrt %129 : vector<1x512xf32>
    %131 = vector.broadcast %130 : vector<1x512xf32> to vector<2x512xf32>
    %132 = arith.mulf %127, %131 : vector<2x512xf32>
    %133 = vector.broadcast %113 : vector<1x512xf32> to vector<2x512xf32>
    %134 = arith.mulf %132, %133 : vector<2x512xf32>
    %135 = vector.broadcast %114 : vector<1x512xf32> to vector<2x512xf32>
    %136 = arith.addf %134, %135 : vector<2x512xf32>
    %137 = arith.truncf %136 : vector<2x512xf32> to vector<2x512xbf16>
    %c0_43 = arith.constant 0 : index
    %c0_44 = arith.constant 0 : index
    %138 = vector.load %arg10[%c0_43, %c0_44] : memref<512x512xbf16, #tpu.memory_space<vmem>>, vector<512x512xbf16>
    %cst_45 = arith.constant dense<0.000000e+00> : vector<2x512xf32>
    %139 = tpu.matmul %137, %138, %cst_45 {dimension_numbers = #tpu.dot_dimension_numbers<[1], [0], [0], [1], [0, 0, 1, 1], [], []>} : vector<2x512xbf16>, vector<512x512xbf16>, vector<2x512xf32> -> vector<2x512xf32>
    %c0_46 = arith.constant 0 : index
    %c0_47 = arith.constant 0 : index
    %140 = vector.load %arg11[%c0_46, %c0_47] : memref<1x512xf32, #tpu.memory_space<vmem>>, vector<1x512xf32>
    %141 = vector.broadcast %140 : vector<1x512xf32> to vector<2x512xf32>
    %142 = arith.addf %139, %141 : vector<2x512xf32>
    %cst_48 = arith.constant 0.000000e+00 : f32
    %143 = vector.broadcast %cst_48 : f32 to vector<2x512xf32>
    %144 = arith.maximumf %142, %143 : vector<2x512xf32>
    %c0_49 = arith.constant 0 : index
    %c0_50 = arith.constant 0 : index
    %145 = vector.load %arg12[%c0_49, %c0_50] : memref<1x512xf32, #tpu.memory_space<vmem>>, vector<1x512xf32>
    %c0_51 = arith.constant 0 : index
    %c0_52 = arith.constant 0 : index
    %146 = vector.load %arg13[%c0_51, %c0_52] : memref<1x512xf32, #tpu.memory_space<vmem>>, vector<1x512xf32>
    %cst_53 = arith.constant dense<0.000000e+00> : vector<512xf32>
    %147 = vector.multi_reduction <add>, %144, %cst_53 [0] : vector<2x512xf32> to vector<512xf32>
    %148 = vector.shape_cast %147 : vector<512xf32> to vector<1x512xf32>
    %cst_54 = arith.constant 5.000000e-01 : f32
    %149 = vector.broadcast %cst_54 : f32 to vector<1x512xf32>
    %150 = arith.mulf %148, %149 : vector<1x512xf32>
    %151 = arith.mulf %144, %144 : vector<2x512xf32>
    %cst_55 = arith.constant dense<0.000000e+00> : vector<512xf32>
    %152 = vector.multi_reduction <add>, %151, %cst_55 [0] : vector<2x512xf32> to vector<512xf32>
    %153 = vector.shape_cast %152 : vector<512xf32> to vector<1x512xf32>
    %cst_56 = arith.constant 5.000000e-01 : f32
    %154 = vector.broadcast %cst_56 : f32 to vector<1x512xf32>
    %155 = arith.mulf %153, %154 : vector<1x512xf32>
    %156 = arith.mulf %150, %150 : vector<1x512xf32>
    %157 = arith.subf %155, %156 : vector<1x512xf32>
    %158 = vector.broadcast %150 : vector<1x512xf32> to vector<2x512xf32>
    %159 = arith.subf %144, %158 : vector<2x512xf32>
    %cst_57 = arith.constant 9.99999974E-6 : f32
    %160 = vector.broadcast %cst_57 : f32 to vector<1x512xf32>
    %161 = arith.addf %157, %160 : vector<1x512xf32>
    %162 = math.rsqrt %161 : vector<1x512xf32>
    %163 = vector.broadcast %162 : vector<1x512xf32> to vector<2x512xf32>
    %164 = arith.mulf %159, %163 : vector<2x512xf32>
    %165 = vector.broadcast %145 : vector<1x512xf32> to vector<2x512xf32>
    %166 = arith.mulf %164, %165 : vector<2x512xf32>
    %167 = vector.broadcast %146 : vector<1x512xf32> to vector<2x512xf32>
    %168 = arith.addf %166, %167 : vector<2x512xf32>
    %169 = arith.truncf %168 : vector<2x512xf32> to vector<2x512xbf16>
    %c0_58 = arith.constant 0 : index
    %c0_59 = arith.constant 0 : index
    %170 = vector.load %arg14[%c0_58, %c0_59] : memref<512x512xbf16, #tpu.memory_space<vmem>>, vector<512x512xbf16>
    %cst_60 = arith.constant dense<0.000000e+00> : vector<2x512xf32>
    %171 = tpu.matmul %169, %170, %cst_60 {dimension_numbers = #tpu.dot_dimension_numbers<[1], [0], [0], [1], [0, 0, 1, 1], [], []>} : vector<2x512xbf16>, vector<512x512xbf16>, vector<2x512xf32> -> vector<2x512xf32>
    %c0_61 = arith.constant 0 : index
    %c0_62 = arith.constant 0 : index
    %172 = vector.load %arg15[%c0_61, %c0_62] : memref<1x512xf32, #tpu.memory_space<vmem>>, vector<1x512xf32>
    %173 = vector.broadcast %172 : vector<1x512xf32> to vector<2x512xf32>
    %174 = arith.addf %171, %173 : vector<2x512xf32>
    %cst_63 = arith.constant 0.000000e+00 : f32
    %175 = vector.broadcast %cst_63 : f32 to vector<2x512xf32>
    %176 = arith.maximumf %174, %175 : vector<2x512xf32>
    %c0_64 = arith.constant 0 : index
    %c0_65 = arith.constant 0 : index
    %177 = vector.load %arg16[%c0_64, %c0_65] : memref<1x512xf32, #tpu.memory_space<vmem>>, vector<1x512xf32>
    %c0_66 = arith.constant 0 : index
    %c0_67 = arith.constant 0 : index
    %178 = vector.load %arg17[%c0_66, %c0_67] : memref<1x512xf32, #tpu.memory_space<vmem>>, vector<1x512xf32>
    %cst_68 = arith.constant dense<0.000000e+00> : vector<512xf32>
    %179 = vector.multi_reduction <add>, %176, %cst_68 [0] : vector<2x512xf32> to vector<512xf32>
    %180 = vector.shape_cast %179 : vector<512xf32> to vector<1x512xf32>
    %cst_69 = arith.constant 5.000000e-01 : f32
    %181 = vector.broadcast %cst_69 : f32 to vector<1x512xf32>
    %182 = arith.mulf %180, %181 : vector<1x512xf32>
    %183 = arith.mulf %176, %176 : vector<2x512xf32>
    %cst_70 = arith.constant dense<0.000000e+00> : vector<512xf32>
    %184 = vector.multi_reduction <add>, %183, %cst_70 [0] : vector<2x512xf32> to vector<512xf32>
    %185 = vector.shape_cast %184 : vector<512xf32> to vector<1x512xf32>
    %cst_71 = arith.constant 5.000000e-01 : f32
    %186 = vector.broadcast %cst_71 : f32 to vector<1x512xf32>
    %187 = arith.mulf %185, %186 : vector<1x512xf32>
    %188 = arith.mulf %182, %182 : vector<1x512xf32>
    %189 = arith.subf %187, %188 : vector<1x512xf32>
    %190 = vector.broadcast %182 : vector<1x512xf32> to vector<2x512xf32>
    %191 = arith.subf %176, %190 : vector<2x512xf32>
    %cst_72 = arith.constant 9.99999974E-6 : f32
    %192 = vector.broadcast %cst_72 : f32 to vector<1x512xf32>
    %193 = arith.addf %189, %192 : vector<1x512xf32>
    %194 = math.rsqrt %193 : vector<1x512xf32>
    %195 = vector.broadcast %194 : vector<1x512xf32> to vector<2x512xf32>
    %196 = arith.mulf %191, %195 : vector<2x512xf32>
    %197 = vector.broadcast %177 : vector<1x512xf32> to vector<2x512xf32>
    %198 = arith.mulf %196, %197 : vector<2x512xf32>
    %199 = vector.broadcast %178 : vector<1x512xf32> to vector<2x512xf32>
    %200 = arith.addf %198, %199 : vector<2x512xf32>
    %c0_73 = arith.constant 0 : index
    %c0_74 = arith.constant 0 : index
    %201 = vector.load %arg18[%c0_73, %c0_74] : memref<512x128xf32, #tpu.memory_space<vmem>>, vector<512x128xf32>
    %cst_75 = arith.constant dense<0.000000e+00> : vector<2x128xf32>
    %202 = tpu.matmul %200, %201, %cst_75 {dimension_numbers = #tpu.dot_dimension_numbers<[1], [0], [0], [1], [0, 0, 1, 1], [], []>} : vector<2x512xf32>, vector<512x128xf32>, vector<2x128xf32> -> vector<2x128xf32>
    %c0_76 = arith.constant 0 : index
    %c0_77 = arith.constant 0 : index
    %203 = vector.load %arg19[%c0_76, %c0_77] : memref<1x128xf32, #tpu.memory_space<vmem>>, vector<1x128xf32>
    %204 = vector.broadcast %203 : vector<1x128xf32> to vector<2x128xf32>
    %205 = arith.addf %202, %204 : vector<2x128xf32>
    %c0_78 = arith.constant 0 : index
    %c0_79 = arith.constant 0 : index
    %206 = vector.load %arg20[%c0_78, %c0_79] : memref<2x128xf32, #tpu.memory_space<vmem>>, vector<2x128xf32>
    tpu.vector_store %arg20[%c0_78, %c0_79], %205 {strides = array<i32>} : memref<2x128xf32, #tpu.memory_space<vmem>>, vector<2x128xf32>,
    return
  }
  func.func @transform_0(%arg0: i32) -> (i32, i32) {
    %c0_i32 = arith.constant 0 : i32
    %c0_i32_0 = arith.constant 0 : i32
    %c0_i32_1 = arith.constant 0 : i32
    return %c0_i32, %c0_i32_0 : i32, i32
  }
  func.func @transform_1(%arg0: i32) -> (i32, i32) {
    %c0_i32 = arith.constant 0 : i32
    %c0_i32_0 = arith.constant 0 : i32
    %c0_i32_1 = arith.constant 0 : i32
    return %c0_i32, %c0_i32_0 : i32, i32
  }
  func.func @transform_2(%arg0: i32) -> (i32, i32) {
    %c0_i32 = arith.constant 0 : i32
    %c0_i32_0 = arith.constant 0 : i32
    %c0_i32_1 = arith.constant 0 : i32
    return %c0_i32, %c0_i32_0 : i32, i32
  }
  func.func @transform_3(%arg0: i32) -> (i32, i32) {
    %c0_i32 = arith.constant 0 : i32
    %c0_i32_0 = arith.constant 0 : i32
    %c0_i32_1 = arith.constant 0 : i32
    return %c0_i32, %c0_i32_0 : i32, i32
  }
  func.func @transform_4(%arg0: i32) -> (i32, i32) {
    %c0_i32 = arith.constant 0 : i32
    %c0_i32_0 = arith.constant 0 : i32
    %c0_i32_1 = arith.constant 0 : i32
    return %c0_i32, %c0_i32_0 : i32, i32
  }
  func.func @transform_5(%arg0: i32) -> (i32, i32) {
    %c0_i32 = arith.constant 0 : i32
    %c0_i32_0 = arith.constant 0 : i32
    %c0_i32_1 = arith.constant 0 : i32
    return %c0_i32, %c0_i32_0 : i32, i32
  }
  func.func @transform_6(%arg0: i32) -> (i32, i32) {
    %c0_i32 = arith.constant 0 : i32
    %c0_i32_0 = arith.constant 0 : i32
    %c0_i32_1 = arith.constant 0 : i32
    return %c0_i32, %c0_i32_0 : i32, i32
  }
  func.func @transform_7(%arg0: i32) -> (i32, i32) {
    %c0_i32 = arith.constant 0 : i32
    %c0_i32_0 = arith.constant 0 : i32
    %c0_i32_1 = arith.constant 0 : i32
    return %c0_i32, %c0_i32_0 : i32, i32
  }
  func.func @transform_8(%arg0: i32) -> (i32, i32) {
    %c0_i32 = arith.constant 0 : i32
    %c0_i32_0 = arith.constant 0 : i32
    %c0_i32_1 = arith.constant 0 : i32
    return %c0_i32, %c0_i32_0 : i32, i32
  }
  func.func @transform_9(%arg0: i32) -> (i32, i32) {
    %c0_i32 = arith.constant 0 : i32
    %c0_i32_0 = arith.constant 0 : i32
    %c0_i32_1 = arith.constant 0 : i32
    return %c0_i32, %c0_i32_0 : i32, i32
  }
  func.func @transform_10(%arg0: i32) -> (i32, i32) {
    %c0_i32 = arith.constant 0 : i32
    %c0_i32_0 = arith.constant 0 : i32
    %c0_i32_1 = arith.constant 0 : i32
    return %c0_i32, %c0_i32_0 : i32, i32
  }
  func.func @transform_11(%arg0: i32) -> (i32, i32) {
    %c0_i32 = arith.constant 0 : i32
    %c0_i32_0 = arith.constant 0 : i32
    %c0_i32_1 = arith.constant 0 : i32
    return %c0_i32, %c0_i32_0 : i32, i32
  }
  func.func @transform_12(%arg0: i32) -> (i32, i32) {
    %c0_i32 = arith.constant 0 : i32
    %c0_i32_0 = arith.constant 0 : i32
    %c0_i32_1 = arith.constant 0 : i32
    return %c0_i32, %c0_i32_0 : i32, i32
  }
  func.func @transform_13(%arg0: i32) -> (i32, i32) {
    %c0_i32 = arith.constant 0 : i32
    %c0_i32_0 = arith.constant 0 : i32
    %c0_i32_1 = arith.constant 0 : i32
    return %c0_i32, %c0_i32_0 : i32, i32
  }
  func.func @transform_14(%arg0: i32) -> (i32, i32) {
    %c0_i32 = arith.constant 0 : i32
    %c0_i32_0 = arith.constant 0 : i32
    %c0_i32_1 = arith.constant 0 : i32
    return %c0_i32, %c0_i32_0 : i32, i32
  }
  func.func @transform_15(%arg0: i32) -> (i32, i32) {
    %c0_i32 = arith.constant 0 : i32
    %c0_i32_0 = arith.constant 0 : i32
    %c0_i32_1 = arith.constant 0 : i32
    return %c0_i32, %c0_i32_0 : i32, i32
  }
  func.func @transform_16(%arg0: i32) -> (i32, i32) {
    %c0_i32 = arith.constant 0 : i32
    %c0_i32_0 = arith.constant 0 : i32
    %c0_i32_1 = arith.constant 0 : i32
    return %c0_i32, %c0_i32_0 : i32, i32
  }
  func.func @transform_17(%arg0: i32) -> (i32, i32) {
    %c0_i32 = arith.constant 0 : i32
    %c0_i32_0 = arith.constant 0 : i32
    %c0_i32_1 = arith.constant 0 : i32
    return %c0_i32, %c0_i32_0 : i32, i32
  }
  func.func @transform_18(%arg0: i32) -> (i32, i32) {
    %c0_i32 = arith.constant 0 : i32
    %c0_i32_0 = arith.constant 0 : i32
    %c0_i32_1 = arith.constant 0 : i32
    return %c0_i32, %c0_i32_0 : i32, i32
  }
  func.func @transform_19(%arg0: i32) -> (i32, i32) {
    %c0_i32 = arith.constant 0 : i32
    %c0_i32_0 = arith.constant 0 : i32
    %c0_i32_1 = arith.constant 0 : i32
    return %c0_i32, %c0_i32_0 : i32, i32
  }
}

</mosaic_0001>

<bundles_post_ra>
// kernel: qrnn_forward.1
= control target key start
LH: loop header
LB: loop body
LE: loop exit
PB: predicated region body
PF: predicated region fallthrough
CT: control target
= control target key end

     0   :  { %s6323_s0 = inlined_call_operand.vmem [shape: f32[128,8], index: 0, kind: input, shape index: {}]   ;;  %s6324_s1 = inlined_call_operand.vmem [shape: f32[8,20], index: 1, kind: input, shape index: {}]   ;;  %s6325_s2 = inlined_call_operand.vmem [shape: f32[1,20], index: 2, kind: input, shape index: {}]   ;;  %s6326_s3 = inlined_call_operand.vmem [shape: f32[80,50], index: 3, kind: input, shape index: {}]   ;;  %s6327_s4 = inlined_call_operand.hbm [shape: f32[1,50], index: 4, kind: input, shape index: {}]   ;;  %s6328_s5 = inlined_call_operand.hbm [shape: bf16[200,512], index: 5, kind: input, shape index: {}]   ;;  %s6329_s6 = inlined_call_operand.vmem [shape: f32[1,512], index: 6, kind: input, shape index: {}]   ;;  %s6330_s7 = inlined_call_operand.vmem [shape: f32[1,512], index: 7, kind: input, shape index: {}]   ;;  %s6331_s8 = inlined_call_operand.vmem [shape: f32[1,512], index: 8, kind: input, shape index: {}]   ;;  %s6332_s9 = inlined_call_operand.vmem [shape: bf16[512,512], index: 9, kind: input, shape index: {}]   ;;  %s6333_s10 = inlined_call_operand.vmem [shape: f32[1,512], index: 10, kind: input, shape index: {}]   ;;  %s6334_s11 = inlined_call_operand.vmem [shape: f32[1,512], index: 11, kind: input, shape index: {}]   ;;  %s6335_s12 = inlined_call_operand.hbm [shape: f32[1,512], index: 12, kind: input, shape index: {}]   ;;  %s6336_s13 = inlined_call_operand.vmem [shape: bf16[512,512], index: 13, kind: input, shape index: {}]   ;;  %s6337_s14 = inlined_call_operand.hbm [shape: f32[1,512], index: 14, kind: input, shape index: {}]   ;;  %s6338_s15 = inlined_call_operand.hbm [shape: f32[1,512], index: 15, kind: input, shape index: {}]   ;;  %s6339_s16 = inlined_call_operand.hbm [shape: f32[1,512], index: 16, kind: input, shape index: {}]   ;;  %s6340_s17 = inlined_call_operand.hbm [shape: f32[512,128], index: 17, kind: input, shape index: {}]   ;;  %s6341_s18 = inlined_call_operand.hbm [shape: f32[1,128], index: 18, kind: input, shape index: {}]   ;;  %s6342_s19 = inlined_call_operand.hbm [shape: f32[2,128], index: 19, kind: output, shape index: {}]  }
   0x1   :  { %6346 = sst [smem:[#allocation23_spill]] %s6323_s0 }
   0x2   :  { %6347 = sst [smem:[#allocation24_spill]] %s6324_s1 }
   0x3   :  { %6348 = sst [smem:[#allocation25_spill]] %s6325_s2 }
   0x4   :  { %6349 = sst [smem:[#allocation26_spill]] %s6326_s3 }
   0x5   :  { %6350 = sst [smem:[#allocation27_spill]] %s6342_s19 }
   0x6   :  { %24 = vsyncpa [#allocation3], 0 }
   0x7   :  { %25 = vsyncpa [#allocation6], 0 }
   0x8   :  { %26 = vsyncpa [#allocation9], 0 }
   0x9   :  { %27 = vsyncpa [#allocation12], 0 }
   0xa   :  { %28 = vsyncpa [#allocation15], 0 }
   0xb   :  { %29 = vsyncpa [#allocation4], 0  ;;  %s4993_s0 = smov [#allocation5]   ;;  %s4783_s1 = scalar_lea.hbm %s6328_s5, 6400 }
   0xc   :  { %s53_s30 = sshll.u32 %s4993_s0, 4  ;;  %p4784_p0 = scmp.ne.s32.totalorder %s6328_s5, %s4783_s1  ;;  %s54_s30 = int_to_ptr.vmem [resolvable:$true] %s53_s30 }
   0xd   :  { %p4787_p1 = scmp.lt.u32.totalorder %s4783_s1, %s6328_s5 }
   0xf   :  { %p4789_p2 = pnand %p4787_p1, %p4784_p0 }
  0x11   :  { %4792 = shalt.err (!%p4789_p2)
}
  0x12   :  { %s4793_s25 = scalar_lea.vmem %s54_s30, 6400  ;;  %p4798_p4 = scmp.lt.s32.totalorder %s54_s30, %s54_s30 }
  0x13   :  { %p4794_p3 = scmp.ne.s32.totalorder %s54_s30, %s4793_s25  ;;  %p4799_p5 = scmp.lt.s32.totalorder %s4793_s25, %s4793_s25 }
  0x15   :  { %p4800_p6 = por %p4799_p5, %p4798_p4 }
  0x17   :  { %p4801_p7 = pnand %p4800_p6, %p4794_p3 }
  0x19   :  { %4804 = shalt.err (!%p4801_p7)
}
  0x1a   :  { %s4994_s3 = smov 256   ;;  %s4995_s26 = smov 16  }
  0x1b   :  { %59 = dma.hbm_to_vmem [thread:$0]  %s6328_s5, 6400, %s54_s30, [#allocation6], %s4994_s3, %s4994_s3, %s4995_s26  }
  0x1c   :  { %s4996_s29 = smov [#allocation8]   ;;  %s4997_s20 = smov [#allocation11]  }
  0x1d   :  { %s90_s0 = sshll.u32 %s4996_s29, 4  ;;  %s110_s21 = sshll.u32 %s4997_s20, 4  ;;  %s91_s0 = int_to_ptr.vmem [resolvable:$true] %s90_s0  ;;  %s111_s21 = int_to_ptr.vmem [resolvable:$true] %s110_s21 }
  0x1e   :  { %s4805_s2 = scalar_lea.hbm %s6337_s14, 64 }
  0x1f   :  { %p4806_p8 = scmp.ne.s32.totalorder %s6337_s14, %s4805_s2  ;;  %p4809_p9 = scmp.lt.u32.totalorder %s4805_s2, %s6337_s14 }
  0x21   :  { %p4811_p10 = pnand %p4809_p9, %p4806_p8 }
  0x23   :  { %4814 = shalt.err (!%p4811_p10)
}
  0x24   :  { %s4815_s5 = scalar_lea.vmem %s91_s0, 64  ;;  %p4820_p12 = scmp.lt.s32.totalorder %s91_s0, %s91_s0 }
  0x25   :  { %p4816_p11 = scmp.ne.s32.totalorder %s91_s0, %s4815_s5  ;;  %p4821_p13 = scmp.lt.s32.totalorder %s4815_s5, %s4815_s5 }
  0x27   :  { %p4822_p0 = por %p4821_p13, %p4820_p12 }
  0x29   :  { %p4823_p1 = pnand %p4822_p0, %p4816_p11 }
  0x2b   :  { %4826 = shalt.err (!%p4823_p1)
}
  0x2c   :  { %93 = dma.hbm_to_vmem [thread:$0]  %s6337_s14, 64, %s91_s0, [#allocation9]  }
  0x2d   :  { %s4827_s28 = scalar_lea.hbm %s6339_s16, 64 }
  0x2e   :  { %p4828_p2 = scmp.ne.s32.totalorder %s6339_s16, %s4827_s28  ;;  %p4831_p3 = scmp.lt.u32.totalorder %s4827_s28, %s6339_s16 }
  0x30   :  { %p4833_p4 = pnand %p4831_p3, %p4828_p2 }
  0x32   :  { %4836 = shalt.err (!%p4833_p4)
}
  0x33   :  { %s4837_s22 = scalar_lea.vmem %s111_s21, 64  ;;  %p4842_p6 = scmp.lt.s32.totalorder %s111_s21, %s111_s21 }
  0x34   :  { %p4838_p5 = scmp.ne.s32.totalorder %s111_s21, %s4837_s22  ;;  %p4843_p7 = scmp.lt.s32.totalorder %s4837_s22, %s4837_s22 }
  0x36   :  { %p4844_p8 = por %p4843_p7, %p4842_p6 }
  0x38   :  { %p4845_p9 = pnand %p4844_p8, %p4838_p5 }
  0x3a   :  { %4848 = shalt.err (!%p4845_p9)
}
  0x3b   :  { %113 = dma.hbm_to_vmem [thread:$0]  %s6339_s16, 64, %s111_s21, [#allocation12]  }
  0x3c   :  { %s4998_s2 = smov [#allocation2]   ;;  %s4999_s24 = smov [#allocation7]  }
  0x3d   :  { %s44_s23 = sshll.u32 %s4998_s2, 4  ;;  %s78_s25 = sshll.u32 %s4999_s24, 4  ;;  %s45_s23 = int_to_ptr.vmem [resolvable:$true] %s44_s23  ;;  %s79_s25 = int_to_ptr.vmem [resolvable:$true] %s78_s25 }
  0x3e   :  { %s4849_s3 = scalar_lea.hbm %s6327_s4, 16 }
  0x3f   :  { %p4850_p10 = scmp.ne.s32.totalorder %s6327_s4, %s4849_s3  ;;  %p4853_p11 = scmp.lt.u32.totalorder %s4849_s3, %s6327_s4 }
  0x41   :  { %p4855_p12 = pnand %p4853_p11, %p4850_p10 }
  0x43   :  { %4858 = shalt.err (!%p4855_p12)
}
  0x44   :  { %s4859_s16 = scalar_lea.vmem %s45_s23, 16  ;;  %s4863_s21 = scalar_lea.vmem %s45_s23, 32 }
  0x45   :  { %p4860_p13 = scmp.ne.s32.totalorder %s45_s23, %s4859_s16  ;;  %p4864_p0 = scmp.lt.s32.totalorder %s45_s23, %s45_s23 }
  0x46   :  { %p4865_p1 = scmp.lt.s32.totalorder %s4863_s21, %s4859_s16 }
  0x48   :  { %p4866_p2 = por %p4865_p1, %p4864_p0 }
  0x4a   :  { %p4867_p3 = pnand %p4866_p2, %p4860_p13 }
  0x4c   :  { %4870 = shalt.err (!%p4867_p3)
}
  0x4d   :  { %47 = dma.hbm_to_vmem [thread:$0]  %s6327_s4, 16, %s45_s23, [#allocation3]  }
  0x4e   :  { %s4871_s14 = scalar_lea.hbm %s6335_s12, 64 }
  0x4f   :  { %p4872_p4 = scmp.ne.s32.totalorder %s6335_s12, %s4871_s14  ;;  %p4875_p5 = scmp.lt.u32.totalorder %s4871_s14, %s6335_s12 }
  0x51   :  { %p4877_p6 = pnand %p4875_p5, %p4872_p4 }
  0x53   :  { %4880 = shalt.err (!%p4877_p6)
}
  0x54   :  { %s4881_s30 = scalar_lea.vmem %s79_s25, 64  ;;  %p4886_p8 = scmp.lt.s32.totalorder %s79_s25, %s79_s25 }
  0x55   :  { %p4882_p7 = scmp.ne.s32.totalorder %s79_s25, %s4881_s30  ;;  %p4887_p9 = scmp.lt.s32.totalorder %s4881_s30, %s4881_s30 }
  0x57   :  { %p4888_p10 = por %p4887_p9, %p4886_p8 }
  0x59   :  { %p4889_p11 = pnand %p4888_p10, %p4882_p7 }
  0x5b   :  { %4892 = shalt.err (!%p4889_p11)
}
  0x5c   :  { %81 = dma.hbm_to_vmem [thread:$0]  %s6335_s12, 64, %s79_s25, [#allocation6]  }
  0x5d   :  { %s5000_s3 = smov [#allocation10]   ;;  %s5001_s27 = smov [#allocation13]  }
  0x5e   :  { %s100_s26 = sshll.u32 %s5000_s3, 4  ;;  %s119_s28 = sshll.u32 %s5001_s27, 4  ;;  %s101_s26 = int_to_ptr.vmem [resolvable:$true] %s100_s26  ;;  %s120_s28 = int_to_ptr.vmem [resolvable:$true] %s119_s28 }
  0x5f   :  { %s4893_s21 = scalar_lea.hbm %s6338_s15, 64 }
  0x60   :  { %p4894_p12 = scmp.ne.s32.totalorder %s6338_s15, %s4893_s21  ;;  %p4897_p13 = scmp.lt.u32.totalorder %s4893_s21, %s6338_s15 }
  0x62   :  { %p4899_p0 = pnand %p4897_p13, %p4894_p12 }
  0x64   :  { %4902 = shalt.err (!%p4899_p0)
}
  0x65   :  { %s4903_s12 = scalar_lea.vmem %s101_s26, 64  ;;  %p4908_p2 = scmp.lt.s32.totalorder %s101_s26, %s101_s26 }
  0x66   :  { %p4904_p1 = scmp.ne.s32.totalorder %s101_s26, %s4903_s12  ;;  %p4909_p3 = scmp.lt.s32.totalorder %s4903_s12, %s4903_s12 }
  0x68   :  { %p4910_p4 = por %p4909_p3, %p4908_p2 }
  0x6a   :  { %p4911_p5 = pnand %p4910_p4, %p4904_p1 }
  0x6c   :  { %4914 = shalt.err (!%p4911_p5)
}
  0x6d   :  { %103 = dma.hbm_to_vmem [thread:$0]  %s6338_s15, 64, %s101_s26, [#allocation9]  }
  0x6e   :  { %s4915_s24 = scalar_lea.hbm %s6340_s17, 8192 }
  0x6f   :  { %p4916_p6 = scmp.ne.s32.totalorder %s6340_s17, %s4915_s24  ;;  %p4919_p7 = scmp.lt.u32.totalorder %s4915_s24, %s6340_s17 }
  0x71   :  { %p4921_p8 = pnand %p4919_p7, %p4916_p6 }
  0x73   :  { %4924 = shalt.err (!%p4921_p8)
}
  0x74   :  { %s4925_s3 = scalar_lea.vmem %s120_s28, 8192  ;;  %p4930_p10 = scmp.lt.s32.totalorder %s120_s28, %s120_s28 }
  0x75   :  { %p4926_p9 = scmp.ne.s32.totalorder %s120_s28, %s4925_s3  ;;  %p4931_p11 = scmp.lt.s32.totalorder %s4925_s3, %s4925_s3 }
  0x77   :  { %p4932_p12 = por %p4931_p11, %p4930_p10 }
  0x79   :  { %p4933_p13 = pnand %p4932_p12, %p4926_p9 }
  0x7b   :  { %4936 = shalt.err (!%p4933_p13)
}
  0x7c   :  { %s5002_s15 = smov 128   ;;  %s5003_s26 = smov 8  }
  0x7d   :  { %125 = dma.hbm_to_vmem [thread:$0]  %s6340_s17, 8192, %s120_s28, [#allocation12], %s5002_s15, %s5002_s15, %s5003_s26  }
  0x7e   :  { %s5004_s16 = smov [#allocation14]   ;;  %s4937_s1 = scalar_lea.hbm %s6341_s18, 16 }
  0x7f   :  { %s132_s21 = sshll.u32 %s5004_s16, 4  ;;  %p4938_p0 = scmp.ne.s32.totalorder %s6341_s18, %s4937_s1  ;;  %s133_s21 = int_to_ptr.vmem [resolvable:$true] %s132_s21 }
  0x80   :  { %p4941_p1 = scmp.lt.u32.totalorder %s4937_s1, %s6341_s18 }
  0x82   :  { %p4943_p2 = pnand %p4941_p1, %p4938_p0 }
  0x84   :  { %4946 = shalt.err (!%p4943_p2)
}
  0x85   :  { %s4947_s0 = scalar_lea.vmem %s133_s21, 16  ;;  %s4951_s17 = scalar_lea.vmem %s133_s21, 32 }
  0x86   :  { %p4948_p3 = scmp.ne.s32.totalorder %s133_s21, %s4947_s0  ;;  %p4952_p4 = scmp.lt.s32.totalorder %s133_s21, %s133_s21 }
  0x87   :  { %p4953_p5 = scmp.lt.s32.totalorder %s4951_s17, %s4947_s0 }
  0x89   :  { %p4954_p6 = por %p4953_p5, %p4952_p4 }
  0x8b   :  { %p4955_p7 = pnand %p4954_p6, %p4948_p3 }
  0x8d   :  { %4958 = shalt.err (!%p4955_p7)
}
  0x8e   :  { %135 = dma.hbm_to_vmem [thread:$0]  %s6341_s18, 16, %s133_s21, [#allocation15]  }
  0x8f   :  { %4981 = dma.done.wait [#allocation3], 16  }
  0x90   :  { %4982 = vsyncadd [#allocation3], 4294967280 }
  0x91   :  { %4983 = dma.done.wait [#allocation6], 6464  }
  0x92   :  { %4984 = vsyncadd [#allocation6], 4294960832 }
  0x93   :  { %4985 = dma.done.wait [#allocation9], 128  }
  0x94   :  { %4986 = vsyncadd [#allocation9], 4294967168 }
  0x95   :  { %4987 = dma.done.wait [#allocation12], 8256  }
  0x96   :  { %4988 = vsyncadd [#allocation12], 4294959040 }
  0x97   :  { %4989 = dma.done.wait [#allocation15], 16  }
  0x98   :  { %4990 = vsyncadd [#allocation15], 4294967280  ;;  %vm185_vm0 = vcmask 64512   ;;  %s6351_s30 = sld [smem:[#allocation24_spill]]  ;;  %s6352_s3 = sld [smem:[#allocation23_spill]]  ;;  %v407_v60 = vlaneseq  ;;  %vm461_vm1 = vcmask 1043456  }
  0x99   :  { %s6353_s1 = sld [smem:[#allocation26_spill]]  ;;  %s6354_s14 = sld [smem:[#allocation25_spill]]  ;;  %vm452_vm3 = vcmask 1041408   ;;  %vm520_vm6 = vcmask 326656   ;;  %vm515_vm7 = vcmask 162816   ;;  %vm525_vm8 = vcmask 490496  }
  0x9a   :  { %s5005_s29 = smov 60   ;;  %s5006_s20 = smov 20   ;;  %vm547_vm9 = vcmask 654336   ;;  %vm665_vm10 = vcmask 408576   ;;  %vm667_vm11 = vcmask 818176   ;;  %vm669_vm12 = vcmask 179200  }
  0x9b   :  { %s5009_s0 = smov 50   ;;  %s5010_s17 = smov 22   ;;  %vm995_vm13 = vcmask 588800  }
  0x9e   :  { %v177_v0 = vld [vmem:[%s6351_s30] sm:$0xff]  ;;  %v162_v2 = vld [vmem:[%s6352_s3 + $0x8] sm:$0xff]  ;;  %v163_v3 = vld [vmem:[%s6352_s3 + $0x10] sm:$0xff] }
  0x9f   :  { %v161_v1 = vld [vmem:[%s6352_s3] sm:$0xff]  ;;  %4120 = vmatprep.subr.mxu0 %v177_v0  ;;  %v164_v4 = vld [vmem:[%s6352_s3 + $0x18] sm:$0xff]  ;;  %v166_v6 = vld [vmem:[%s6352_s3 + $0x28] sm:$0xff] }
  0xa0   :  { %4122 = vmatprep.mubr.msk.f32.mxu0 %vm185_vm0, %v161_v1  ;;  %4121 = vmatpush3.msra.mxu0 %v177_v0  ;;  %v165_v5 = vld [vmem:[%s6352_s3 + $0x20] sm:$0xff]  ;;  %v167_v7 = vld [vmem:[%s6352_s3 + $0x30] sm:$0xff]  ;;  %v168_v8 = vld [vmem:[%s6352_s3 + $0x38] sm:$0xff] }
  0xa1   :  { %4123 = vmatmul.mubr.msk.f32.vlgmr.msra.gmra.mrb[0].mxu0 %vm185_vm0, %v162_v2  ;;  %v169_v9 = vld [vmem:[%s6352_s3 + $0x40] sm:$0xff]  ;;  %v170_v10 = vld [vmem:[%s6352_s3 + $0x48] sm:$0xff]  ;;  %v171_v11 = vld [vmem:[%s6352_s3 + $0x50] sm:$0xff] }
  0xa2   :  { %4125 = vmatprep.mubr.msk.f32.mxu0 %vm185_vm0, %v163_v3  ;;  %v172_v12 = vld [vmem:[%s6352_s3 + $0x58] sm:$0xff]  ;;  %v173_v13 = vld [vmem:[%s6352_s3 + $0x60] sm:$0xff]  ;;  %v174_v14 = vld [vmem:[%s6352_s3 + $0x68] sm:$0xff] }
  0xa3   :  { %v175_v15 = vld [vmem:[%s6352_s3 + $0x70] sm:$0xff]  ;;  %v176_v16 = vld [vmem:[%s6352_s3 + $0x78] sm:$0xff]  ;;  %v530_v17 = vld [vmem:[%s6353_s1] sm:$0xff] }
  0xa4   :  { %v531_v18 = vld [vmem:[%s6353_s1 + $0x8] sm:$0xff]  ;;  %v5284_v26 = vld [vmem:[%s6354_s14] ss:$0 sm:$0xff]  ;;  %v532_v34 = vld [vmem:[%s6353_s1 + $0x10] sm:$0xff]  ;;  %s5008_s14 = smov 100  }
  0xa5   :  { %4126 = vmatmul.mubr.msk.f32.gmra.mrb[2].mxu0 %vm185_vm0, %v164_v4  ;;  %v4172_v19 = vpack.c.bf16 %v531_v18, %v530_v17  ;;  %v533_v35 = vld [vmem:[%s6353_s1 + $0x18] sm:$0xff]  ;;  %v534_v48 = vld [vmem:[%s6353_s1 + $0x20] sm:$0xff]  ;;  %v535_v49 = vld [vmem:[%s6353_s1 + $0x28] sm:$0xff] }
  0xa6   :  { %4128 = vmatprep.mubr.msk.f32.mxu0 %vm185_vm0, %v165_v5  ;;  %v4176_v37 = vpack.c.bf16 %v533_v35, %v532_v34  ;;  %v4180_v52 = vpack.c.bf16 %v535_v49, %v534_v48  ;;  %v536_v0 = vld [vmem:[%s6353_s1 + $0x30] sm:$0xff]  ;;  %v537_v1 = vld [vmem:[%s6353_s1 + $0x38] sm:$0xff]  ;;  %v539_v17 = vld [vmem:[%s6353_s1 + $0x48] sm:$0xff] }
  0xa7   :  { %4173 = vmatprep.subr.bf16.mxu1 %v4172_v19  ;;  %v4184_v4 = vpack.c.bf16 %v537_v1, %v536_v0 }
  0xa8   :  { %4175 = vmatpush3.bf16.msra.mxu1 %v4172_v19 }
  0xa9   :  { %4129 = vmatmul.mubr.msk.f32.gmra.mrb[4].mxu0 %vm185_vm0, %v166_v6  ;;  %4177 = vmatprep.subr.bf16.mxu1 %v4176_v37 }
  0xaa   :  { %4131 = vmatprep.mubr.msk.f32.mxu0 %vm185_vm0, %v167_v7 }
  0xac   :  { %4179 = vmatpush3.bf16.msra.mxu1 %v4176_v37 }
  0xad   :  { %4132 = vmatmul.mubr.msk.f32.gmra.mrb[6].mxu0 %vm185_vm0, %v168_v8  ;;  %4181 = vmatprep.subr.bf16.mxu1 %v4180_v52 }
  0xae   :  { %4134 = vmatprep.mubr.msk.f32.mxu0 %vm185_vm0, %v169_v9 }
  0xb0   :  { %4183 = vmatpush3.bf16.msra.mxu1 %v4180_v52 }
  0xb1   :  { %4135 = vmatmul.mubr.msk.f32.gmra.mrb[8].mxu0 %vm185_vm0, %v170_v10  ;;  %4185 = vmatprep.subr.bf16.mxu1 %v4184_v4 }
  0xb2   :  { %4137 = vmatprep.mubr.msk.f32.mxu0 %vm185_vm0, %v171_v11 }
  0xb4   :  { %4187 = vmatpush3.bf16.msra.mxu1 %v4184_v4 }
  0xb5   :  { %4138 = vmatmul.mubr.msk.f32.gmra.mrb[10].mxu0 %vm185_vm0, %v172_v12  ;;  %v5318_v12 = vshrl.u32 %v407_v60, 7 }
  0xb6   :  { %4140 = vmatprep.mubr.msk.f32.mxu0 %vm185_vm0, %v173_v13 }
  0xb7   :  { %v413_v34 = vand.u32 3, %v5318_v12 }
  0xb9   :  { %4141 = vmatmul.mubr.msk.f32.gmra.mrb[12].mxu0 %vm185_vm0, %v174_v14  ;;  %vm5340_vm5 = vcmp.ge.s32.totalorder %v413_v34, 2  ;;  %v4329_v34 = vld [vmem:[#allocation5 + $0xa0] ss:$16 sps:$4 sm:$0xff]  }
  0xba   :  { %4143 = vmatprep.mubr.msk.f32.mxu0 %vm185_vm0, %v175_v15 }
  0xbd   :  { %4144 = vmatmul.mubr.msk.f32.gmra.mrb[14].mxu0 %vm185_vm0, %v176_v16  ;;  %v538_v16 = vld [vmem:[%s6353_s1 + $0x40] sm:$0xff]  ;;  %s5007_s1 = smov 40  }
 0x174   :  { %v4124_v20 = vpop.f32.mrb[0].mxu0 }
 0x175   :  { %v300_v21 = vpop.f32.mrb[1].mxu0  ;;  %v306_v29 = vadd.f32 %v4124_v20, %v5284_v26  ;;  %v422_v20 = vadd.s32 8, %v5318_v12 }
 0x176   :  { %v301_v30 = vadd.f32 %v5284_v26, %v300_v21  ;;  %v4188_v21 = vpack.c.bf16 %v539_v17, %v538_v16  ;;  %v4307_v16 = vld [vmem:[#allocation5 + $0x24] ss:$16 sps:$4 sm:$0xff]   ;;  %v4310_v17 = vld [vmem:[#allocation5 + $0x2c] ss:$16 sps:$4 sm:$0xff]  }
 0x177   :  { %v380_v38 = vmax.f32 %v306_v29, 0.0 }
 0x178   :  { %v4127_v22 = vpop.f32.mrb[2].mxu0  ;;  %v379_v41 = vmax.f32 %v301_v30, 0.0  ;;  %4189 = vmatprep.subr.bf16.mxu1 %v4188_v21 }
 0x179   :  { %v310_v23 = vpop.f32.mrb[3].mxu0  ;;  %v316_v39 = vadd.f32 %v4127_v22, %v5284_v26  ;;  %4191 = vmatpush3.bf16.msra.mxu1 %v4188_v21  ;;  %v4316_v21 = vld [vmem:[#allocation5 + $0x4c] ss:$16 sps:$4 sm:$0xff]  }
 0x17a   :  { %v311_v42 = vadd.f32 %v5284_v26, %v310_v23 }
 0x17b   :  { %v382_v53 = vmax.f32 %v316_v39, 0.0 }
 0x17c   :  { %v4130_v24 = vpop.f32.mrb[4].mxu0  ;;  %v381_v56 = vmax.f32 %v311_v42, 0.0 }
 0x17d   :  { %v320_v25 = vpop.f32.mrb[5].mxu0  ;;  %v326_v54 = vadd.f32 %v4130_v24, %v5284_v26 }
 0x17e   :  { %v321_v57 = vadd.f32 %v5284_v26, %v320_v25 }
 0x17f   :  { %v384_v5 = vmax.f32 %v326_v54, 0.0 }
 0x180   :  { %v4133_v27 = vpop.f32.mrb[6].mxu0  ;;  %v383_v8 = vmax.f32 %v321_v57, 0.0 }
 0x181   :  { %v330_v28 = vpop.f32.mrb[7].mxu0  ;;  %v336_v6 = vadd.f32 %v4133_v27, %v5284_v26 }
 0x182   :  { %v331_v9 = vadd.f32 %v5284_v26, %v330_v28 }
 0x183   :  { %v386_v22 = vmax.f32 %v336_v6, 0.0 }
 0x184   :  { %v4136_v31 = vpop.f32.mrb[8].mxu0  ;;  %v385_v25 = vmax.f32 %v331_v9, 0.0 }
 0x185   :  { %v346_v32 = vadd.f32 %v4136_v31, %v5284_v26  ;;  %v340_v33 = vpop.f32.mrb[9].mxu0  ;;  %v434_v31 = vand.u32 7, %v422_v20  ;;  %v4313_v20 = vld [vmem:[#allocation5 + $0x44] ss:$16 sps:$4 sm:$0xff]  }
 0x186   :  { %v341_v36 = vadd.f32 %v5284_v26, %v340_v33 }
 0x187   :  { %v388_v40 = vmax.f32 %v346_v32, 0.0  ;;  %vm448_vm4 = vcmp.ge.s32.totalorder %v434_v31, 4  ;;  %v4326_v31 = vld [vmem:[#allocation5 + $0x88] ss:$16 sps:$4 sm:$0xff]  }
 0x188   :  { %v387_v43 = vmax.f32 %v341_v36, 0.0  ;;  %v4139_v44 = vpop.f32.mrb[10].mxu0 }
 0x189   :  { %v396_v45 = vmax.f32 %v380_v38, %v388_v40  ;;  %v356_v46 = vadd.f32 %v4139_v44, %v5284_v26  ;;  %v350_v47 = vpop.f32.mrb[11].mxu0 }
 0x18a   :  { %v395_v50 = vmax.f32 %v379_v41, %v387_v43  ;;  %v351_v51 = vadd.f32 %v5284_v26, %v350_v47  ;;  %v4346_v41 = vld [vmem:[#allocation5 + $0xec] ss:$16 sps:$4 sm:$0xff]  }
 0x18b   :  { %v390_v55 = vmax.f32 %v356_v46, 0.0 }
 0x18c   :  { %v389_v58 = vmax.f32 %v351_v51, 0.0  ;;  %v4142_v59 = vpop.f32.mrb[12].mxu0 }
 0x18d   :  { %v398_v61 = vmax.f32 %v382_v53, %v390_v55  ;;  %v366_v62 = vadd.f32 %v4142_v59, %v5284_v26  ;;  %v360_v63 = vpop.f32.mrb[13].mxu0 }
 0x18e   :  { %v397_v2 = vmax.f32 %v381_v56, %v389_v58  ;;  %v361_v3 = vadd.f32 %v5284_v26, %v360_v63 }
 0x18f   :  { %v392_v7 = vmax.f32 %v366_v62, 0.0 }
 0x190   :  { %v391_v10 = vmax.f32 %v361_v3, 0.0  ;;  %v4145_v11 = vpop.f32.mrb[14].mxu0 }
 0x191   :  { %v400_v13 = vmax.f32 %v384_v5, %v392_v7  ;;  %v376_v14 = vadd.f32 %v4145_v11, %v5284_v26  ;;  %v370_v15 = vpop.f32.mrb[15].mxu0  ;;  %v4299_v11 = vld [vmem:[#allocation5] ss:$16 sps:$4 sm:$0xff]  }
 0x192   :  { %v399_v18 = vmax.f32 %v383_v8, %v391_v10  ;;  %v371_v19 = vadd.f32 %v5284_v26, %v370_v15  ;;  %v427_v26 = vand.u32 7, %v5318_v12  ;;  %v4304_v15 = vld [vmem:[#allocation5 + $0xc] ss:$16 sps:$4 sm:$0xff]  }
 0x193   :  { %v394_v23 = vmax.f32 %v376_v14, 0.0  ;;  %v404_v24 = vmax.f32 %v396_v45, %v400_v13  ;;  %v4301_v13 = vld [vmem:[#allocation5 + $0x4] ss:$16 sps:$4 sm:$0xff]   ;;  %v4302_v14 = vld [vmem:[#allocation5 + $0x8] ss:$16 sps:$4 sm:$0xff]   ;;  %1052 = vmatprep.subr.bf16.mxu1 %v4304_v15 }
 0x194   :  { %v5329_v27 = vmax.f32 %v395_v50, %v399_v18  ;;  %v393_v28 = vmax.f32 %v371_v19, 0.0  ;;  %vm447_vm2 = vcmp.ge.s32.totalorder %v427_v26, 4  ;;  %1011 = vmatprep.subr.bf16.mxu0 %v4301_v13  ;;  %v4305_v18 = vld [vmem:[#allocation5 + $0x20] ss:$16 sps:$4 sm:$0xff]   ;;  %v4308_v19 = vld [vmem:[#allocation5 + $0x28] ss:$16 sps:$4 sm:$0xff]  }
 0x195   :  { %v402_v29 = vmax.f32 %v386_v22, %v394_v23  ;;  %505 = vrot.lane.b32.xlu1 %v404_v24, %s5005_s29  ;;  %v450_v35 = vrot.slane %v404_v24, 6  ;;  %1012 = vmatpush1.bf16.msra.mxu0 %v4299_v11  ;;  %v4311_v22 = vld [vmem:[#allocation5 + $0x40] ss:$16 sps:$4 sm:$0xff]   ;;  %v4314_v23 = vld [vmem:[#allocation5 + $0x48] ss:$16 sps:$4 sm:$0xff]  }
 0x196   :  { %v401_v30 = vmax.f32 %v385_v25, %v393_v28  ;;  %503 = vrot.lane.b32.xlu0 %v5329_v27, %s5005_s29  ;;  %1013 = vmatprep.subr.bf16.mxu0 %v4307_v16  ;;  %v4322_v25 = vld [vmem:[#allocation5 + $0x6c] ss:$16 sps:$4 sm:$0xff]   ;;  %v4320_v28 = vld [vmem:[#allocation5 + $0x68] ss:$16 sps:$4 sm:$0xff]   ;;  %v4323_v26 = vld [vmem:[#allocation5 + $0x80] ss:$16 sps:$4 sm:$0xff]  }
 0x197   :  { %v406_v32 = vmax.f32 %v398_v61, %v402_v29  ;;  %v453_v42 = vsel %vm452_vm3, 0.0, %v450_v35  ;;  %v4325_v29 = vld [vmem:[#allocation5 + $0x84] ss:$16 sps:$4 sm:$0xff]   ;;  %v4332_v35 = vld [vmem:[#allocation5 + $0xa8] ss:$16 sps:$4 sm:$0xff]  }
 0x198   :  { %v405_v33 = vmax.f32 %v397_v2, %v401_v30  ;;  %v454_v46 = vsel %vm5340_vm5, %v453_v42, 0.0  ;;  %v4328_v30 = vld [vmem:[#allocation5 + $0x8c] ss:$16 sps:$4 sm:$0xff]   ;;  %v4341_v42 = vld [vmem:[#allocation5 + $0xe0] ss:$16 sps:$4 sm:$0xff]  }
 0x199   :  { %483 = vrot.lane.b32.xlu1 %v404_v24, %s5006_s20  ;;  %v463_v36 = vrot.slane %v406_v32, 4  ;;  %v456_v45 = vrot.slane %v406_v32, 6  ;;  %1014 = vmatpush1.bf16.msra.mxu0 %v4305_v18  ;;  %v4319_v24 = vld [vmem:[#allocation5 + $0x64] ss:$16 sps:$4 sm:$0xff]  }
 0x19a   :  { %481 = vrot.lane.b32.xlu0 %v5329_v27, %s5006_s20  ;;  %v462_v37 = vrot.slane %v405_v33, 4  ;;  %1015 = vmatprep.subr.bf16.mxu0 %v4313_v20  ;;  %v4377_v20 = vld [vmem:[%s6332_s9 + $0x4] ss:$16 sps:$4 sm:$0xff]  }
 0x19b   :  { %v458_v49 = vsel %vm452_vm3, 0.0, %v456_v45  ;;  %v4352_v45 = vld [vmem:[#allocation5 + $0x10c] ss:$16 sps:$4 sm:$0xff]  }
 0x19c   :  { %v467_v38 = vsel %vm461_vm1, 0.0, %v462_v37  ;;  %v464_v39 = vsel %vm461_vm1, %v462_v37, %v463_v36  ;;  %v459_v50 = vsel %vm5340_vm5, %v458_v49, 0.0  ;;  %v4337_v36 = vld [vmem:[#allocation5 + $0xc4] ss:$16 sps:$4 sm:$0xff]   ;;  %v4340_v37 = vld [vmem:[#allocation5 + $0xcc] ss:$16 sps:$4 sm:$0xff]  }
 0x19d   :  { %493 = vrot.lane.b32.xlu1 %v5329_v27, %s5007_s1  ;;  %v468_v40 = vsel %vm447_vm2, %v467_v38, 0.0  ;;  %v469_v43 = vsel %vm448_vm4, %v464_v39, 0.0  ;;  %1016 = vmatpush1.bf16.msra.mxu0 %v4311_v22  ;;  %v4335_v38 = vld [vmem:[#allocation5 + $0xc0] ss:$16 sps:$4 sm:$0xff]   ;;  %v4338_v39 = vld [vmem:[#allocation5 + $0xc8] ss:$16 sps:$4 sm:$0xff]  }
 0x19e   :  { %477 = vrot.lane.b32.xlu0 %v468_v40, %s5006_s20  ;;  %v471_v44 = vrot.slane %v469_v43, 6  ;;  %1017 = vmatprep.subr.bf16.mxu0 %v4319_v24  ;;  %v4358_v49 = vld [vmem:[#allocation5 + $0x12c] ss:$16 sps:$4 sm:$0xff]  }
 0x19f   :  { %v4380_v22 = vld [vmem:[%s6332_s9 + $0xc] ss:$16 sps:$4 sm:$0xff]  }
 0x1a0   :  { %v473_v47 = vsel %vm452_vm3, 0.0, %v471_v44  ;;  %v4349_v44 = vld [vmem:[#allocation5 + $0x104] ss:$16 sps:$4 sm:$0xff]  }
 0x1a1   :  { %491 = vrot.lane.b32.xlu1 %v454_v46, %s5007_s1  ;;  %v474_v48 = vsel %vm5340_vm5, %v473_v47, 0.0  ;;  %v4350_v47 = vld [vmem:[#allocation5 + $0x108] ss:$16 sps:$4 sm:$0xff]  }
 0x1a2   :  { %479 = vrot.lane.b32.xlu0 %v469_v43, %s5006_s20  ;;  %v4344_v43 = vld [vmem:[#allocation5 + $0xe8] ss:$16 sps:$4 sm:$0xff]  }
 0x1a5   :  { %497 = vrot.lane.b32.xlu1 %v405_v33, %s5007_s1 }
 0x1a6   :  { %495 = vrot.lane.b32.xlu0 %v459_v50, %s5007_s1  ;;  %v4353_v50 = vld [vmem:[#allocation5 + $0x120] ss:$16 sps:$4 sm:$0xff]  }
 0x1a9   :  { %509 = vrot.lane.b32.xlu1 %v406_v32, %s5005_s29  ;;  %v4331_v32 = vld [vmem:[#allocation5 + $0xa4] ss:$16 sps:$4 sm:$0xff]  }
 0x1aa   :  { %507 = vrot.lane.b32.xlu0 %v405_v33, %s5005_s29  ;;  %v4334_v33 = vld [vmem:[#allocation5 + $0xac] ss:$16 sps:$4 sm:$0xff]  }
 0x207   :  { %v506_v51 = vpop.permute.xlu1 %505 }
 0x208   :  { %v504_v52 = vpop.permute.xlu0 %503 }
 0x20b   :  { %v484_v53 = vpop.permute.xlu1 %483 }
 0x20c   :  { %v482_v54 = vpop.permute.xlu0 %481  ;;  %v519_v5 = vsel %vm515_vm7, %v5329_v27, %v484_v53  ;;  %v4317_v27 = vld [vmem:[#allocation5 + $0x60] ss:$16 sps:$4 sm:$0xff]   ;;  %v4364_v53 = vld [vmem:[#allocation5 + $0x14c] ss:$16 sps:$4 sm:$0xff]  }
 0x20d   :  { %v518_v3 = vsel %vm515_vm7, %v454_v46, %v482_v54  ;;  %1018 = vmatpush1.bf16.msra.mxu0 %v4317_v27  ;;  %v4347_v46 = vld [vmem:[#allocation5 + $0x100] ss:$16 sps:$4 sm:$0xff]  }
 0x20e   :  { %1019 = vmatprep.subr.bf16.mxu0 %v4325_v29  ;;  %v4359_v54 = vld [vmem:[#allocation5 + $0x140] ss:$16 sps:$4 sm:$0xff]  }
 0x20f   :  { %v494_v55 = vpop.permute.xlu1 %493 }
 0x210   :  { %v478_v56 = vpop.permute.xlu0 %477 }
 0x211   :  { %v516_v57 = vsel %vm515_vm7, %v474_v48, %v478_v56  ;;  %1020 = vmatpush1.bf16.msra.mxu0 %v4323_v26  ;;  %v4355_v48 = vld [vmem:[#allocation5 + $0x124] ss:$16 sps:$4 sm:$0xff]  }
 0x212   :  { %1021 = vmatprep.subr.bf16.mxu0 %v4331_v32 }
 0x213   :  { %v492_v58 = vpop.permute.xlu1 %491 }
 0x214   :  { %v521_v59 = vsel %vm520_vm6, %v516_v57, %v492_v58  ;;  %v480_v60 = vpop.permute.xlu0 %479  ;;  %v3701_v58 = vld [vmem:[#allocation2] ss:$0 sm:$0xff] }
 0x215   :  { %v517_v61 = vsel %vm515_vm7, %v468_v40, %v480_v60  ;;  %v526_v62 = vsel %vm525_vm8, %v521_v59, %v504_v52  ;;  %1022 = vmatpush1.bf16.msra.mxu0 %v4329_v34  ;;  %v4343_v40 = vld [vmem:[#allocation5 + $0xe4] ss:$16 sps:$4 sm:$0xff]   ;;  %v4370_v60 = vld [vmem:[#allocation5 + $0x16c] ss:$16 sps:$4 sm:$0xff]  }
 0x216   :  { %v522_v63 = vsel %vm520_vm6, %v517_v61, %v494_v55  ;;  %4166 = vmatprep.mubr.msk.f32.mxu1 %vm547_vm9, %v526_v62  ;;  %1023 = vmatprep.subr.bf16.mxu0 %v4337_v36  ;;  %v4361_v52 = vld [vmem:[#allocation5 + $0x144] ss:$16 sps:$4 sm:$0xff]   ;;  %v4362_v55 = vld [vmem:[#allocation5 + $0x148] ss:$16 sps:$4 sm:$0xff]   ;;  %v4365_v61 = vld [vmem:[#allocation5 + $0x160] ss:$16 sps:$4 sm:$0xff]  }
 0x217   :  { %v498_v0 = vpop.permute.xlu1 %497  ;;  %v527_v1 = vsel %vm525_vm8, %v522_v63, %v506_v51  ;;  %v4356_v51 = vld [vmem:[#allocation5 + $0x128] ss:$16 sps:$4 sm:$0xff]   ;;  %v4367_v59 = vld [vmem:[#allocation5 + $0x164] ss:$16 sps:$4 sm:$0xff]  }
 0x218   :  { %v496_v2 = vpop.permute.xlu0 %495  ;;  %4167 = vmatmul.mubr.msk.f32.vlgmr.msra.gmra.mrb[0].mxu1 %vm547_vm9, %v527_v1  ;;  %v524_v8 = vsel %vm520_vm6, %v519_v5, %v498_v0  ;;  %v4368_v62 = vld [vmem:[#allocation5 + $0x168] ss:$16 sps:$4 sm:$0xff]   ;;  %v4383_v36 = vld [vmem:[%s6332_s9 + $0x24] ss:$16 sps:$4 sm:$0xff]  }
 0x219   :  { %v523_v6 = vsel %vm520_vm6, %v518_v3, %v496_v2  ;;  %1053 = vmatpush1.bf16.msra.mxu1 %v4302_v14  ;;  %1024 = vmatpush1.bf16.msra.mxu0 %v4335_v38  ;;  %v721_v2 = vld [vmem:[#allocation5 + $0x180] sm:$0xff]  ;;  %v722_v3 = vld [vmem:[#allocation5 + $0x188] sm:$0xff] }
 0x21a   :  { %1054 = vmatprep.subr.bf16.mxu1 %v4310_v17  ;;  %1025 = vmatprep.subr.bf16.mxu0 %v4343_v40  ;;  %v4378_v34 = vld [vmem:[%s6332_s9 + $0x8] ss:$16 sps:$4 sm:$0xff]   ;;  %v4381_v38 = vld [vmem:[%s6332_s9 + $0x20] ss:$16 sps:$4 sm:$0xff]   ;;  %v4389_v40 = vld [vmem:[%s6332_s9 + $0x44] ss:$16 sps:$4 sm:$0xff]  }
 0x21b   :  { %v510_v4 = vpop.permute.xlu1 %509 }
 0x21c   :  { %v508_v7 = vpop.permute.xlu0 %507  ;;  %v529_v10 = vsel %vm525_vm8, %v524_v8, %v510_v4 }
 0x21d   :  { %v528_v9 = vsel %vm525_vm8, %v523_v6, %v508_v7  ;;  %1055 = vmatpush1.bf16.msra.mxu1 %v4308_v19  ;;  %1026 = vmatpush1.bf16.msra.mxu0 %v4341_v42  ;;  %v3755_v6 = vcombine.high %v721_v2, %v721_v2  ;;  %v3757_v7 = vcombine.high %v722_v3, %v722_v3  ;;  %v4387_v42 = vld [vmem:[%s6332_s9 + $0x40] ss:$16 sps:$4 sm:$0xff]  }
 0x21e   :  { %4169 = vmatprep.mubr.msk.f32.mxu1 %vm547_vm9, %v528_v9  ;;  %1056 = vmatprep.subr.bf16.mxu1 %v4316_v21  ;;  %v3754_v9 = vcombine.low %v721_v2, %v721_v2  ;;  %v4423_v2 = vld [vmem:[%s6332_s9 + $0x100] ss:$16 sps:$4 sm:$0xff]  }
 0x21f   :  { %4170 = vmatmul.mubr.msk.f32.gmra.mrb[2].mxu1 %vm547_vm9, %v529_v10  ;;  %1027 = vmatprep.subr.bf16.mxu0 %v4349_v44  ;;  %v3756_v10 = vcombine.low %v722_v3, %v722_v3  ;;  %v4395_v44 = vld [vmem:[%s6332_s9 + $0x64] ss:$16 sps:$4 sm:$0xff]   ;;  %v4426_v3 = vld [vmem:[%s6332_s9 + $0x108] ss:$16 sps:$4 sm:$0xff]  }
 0x220   :  { %v1000_v16 = vsel %vm461_vm1, %v3754_v9, 0  ;;  %v4440_v9 = vld [vmem:[%s6332_s9 + $0x14c] ss:$16 sps:$4 sm:$0xff]  }
 0x221   :  { %1057 = vmatpush1.bf16.msra.mxu1 %v4314_v23  ;;  %1028 = vmatpush1.bf16.msra.mxu0 %v4347_v46  ;;  %v1006_v17 = vsel %vm461_vm1, %v3756_v10, 0  ;;  %v4393_v46 = vld [vmem:[%s6332_s9 + $0x60] ss:$16 sps:$4 sm:$0xff]  }
 0x222   :  { %1058 = vmatprep.subr.bf16.mxu1 %v4322_v25  ;;  %1029 = vmatprep.subr.bf16.mxu0 %v4355_v48  ;;  %v4401_v48 = vld [vmem:[%s6332_s9 + $0x84] ss:$16 sps:$4 sm:$0xff]   ;;  %v4435_v10 = vld [vmem:[%s6332_s9 + $0x140] ss:$16 sps:$4 sm:$0xff]  }
 0x225   :  { %1059 = vmatpush1.bf16.msra.mxu1 %v4320_v28  ;;  %1030 = vmatpush1.bf16.msra.mxu0 %v4353_v50  ;;  %v4399_v50 = vld [vmem:[%s6332_s9 + $0x80] ss:$16 sps:$4 sm:$0xff]  }
 0x226   :  { %1060 = vmatprep.subr.bf16.mxu1 %v4328_v30  ;;  %1031 = vmatprep.subr.bf16.mxu0 %v4361_v52  ;;  %v4407_v52 = vld [vmem:[%s6332_s9 + $0xa4] ss:$16 sps:$4 sm:$0xff]  }
 0x229   :  { %1061 = vmatpush1.bf16.msra.mxu1 %v4326_v31  ;;  %1032 = vmatpush1.bf16.msra.mxu0 %v4359_v54  ;;  %v4405_v54 = vld [vmem:[%s6332_s9 + $0xa0] ss:$16 sps:$4 sm:$0xff]  }
 0x22a   :  { %1062 = vmatprep.subr.bf16.mxu1 %v4334_v33  ;;  %1033 = vmatprep.subr.bf16.mxu0 %v4367_v59  ;;  %v4375_v33 = vld [vmem:[%s6332_s9] ss:$16 sps:$4 sm:$0xff]   ;;  %v4414_v59 = vld [vmem:[%s6332_s9 + $0xc8] ss:$16 sps:$4 sm:$0xff]  }
 0x22d   :  { %1063 = vmatpush1.bf16.msra.mxu1 %v4332_v35  ;;  %1034 = vmatpush1.bf16.msra.mxu0 %v4365_v61  ;;  %v4422_v61 = vld [vmem:[%s6332_s9 + $0xec] ss:$16 sps:$4 sm:$0xff]  }
 0x22e   :  { %1064 = vmatprep.subr.bf16.mxu1 %v4340_v37  ;;  %3758 = vmatprep.subr.msk.bf16.mxu0 %vm461_vm1, %v3755_v6  ;;  %v4386_v37 = vld [vmem:[%s6332_s9 + $0x2c] ss:$16 sps:$4 sm:$0xff]   ;;  %v4429_v6 = vld [vmem:[%s6332_s9 + $0x120] ss:$16 sps:$4 sm:$0xff]  }
 0x231   :  { %1065 = vmatpush1.bf16.msra.mxu1 %v4338_v39  ;;  %1036 = vmatpush1.bf16.msra.mxu0 %v1000_v16  ;;  %v4384_v39 = vld [vmem:[%s6332_s9 + $0x28] ss:$16 sps:$4 sm:$0xff]  }
 0x232   :  { %1066 = vmatprep.subr.bf16.mxu1 %v4346_v41  ;;  %2035 = vmatprep.subr.bf16.mxu0 %v4377_v20  ;;  %v4392_v41 = vld [vmem:[%s6332_s9 + $0x4c] ss:$16 sps:$4 sm:$0xff]   ;;  %v4444_v16 = vld [vmem:[%s6332_s9 + $0x168] ss:$16 sps:$4 sm:$0xff]  }
 0x233   :  { %v4450_v20 = vld [vmem:[%s6332_s9 + $0x188] ss:$16 sps:$4 sm:$0xff]  }
 0x235   :  { %1067 = vmatpush1.bf16.msra.mxu1 %v4344_v43  ;;  %v4390_v43 = vld [vmem:[%s6332_s9 + $0x48] ss:$16 sps:$4 sm:$0xff]  }
 0x236   :  { %1068 = vmatprep.subr.bf16.mxu1 %v4352_v45  ;;  %v4398_v45 = vld [vmem:[%s6332_s9 + $0x6c] ss:$16 sps:$4 sm:$0xff]  }
 0x239   :  { %1069 = vmatpush1.bf16.msra.mxu1 %v4350_v47  ;;  %v4396_v47 = vld [vmem:[%s6332_s9 + $0x68] ss:$16 sps:$4 sm:$0xff]  }
 0x23a   :  { %1070 = vmatprep.subr.bf16.mxu1 %v4358_v49  ;;  %v4404_v49 = vld [vmem:[%s6332_s9 + $0x8c] ss:$16 sps:$4 sm:$0xff]  }
 0x23d   :  { %1071 = vmatpush1.bf16.msra.mxu1 %v4356_v51  ;;  %v4402_v51 = vld [vmem:[%s6332_s9 + $0x88] ss:$16 sps:$4 sm:$0xff]  }
 0x23e   :  { %1072 = vmatprep.subr.bf16.mxu1 %v4364_v53  ;;  %v4410_v53 = vld [vmem:[%s6332_s9 + $0xac] ss:$16 sps:$4 sm:$0xff]  }
 0x241   :  { %1073 = vmatpush1.bf16.msra.mxu1 %v4362_v55  ;;  %v4408_v55 = vld [vmem:[%s6332_s9 + $0xa8] ss:$16 sps:$4 sm:$0xff]  }
 0x242   :  { %1074 = vmatprep.subr.bf16.mxu1 %v4370_v60  ;;  %v4419_v60 = vld [vmem:[%s6332_s9 + $0xe4] ss:$16 sps:$4 sm:$0xff]  }
 0x245   :  { %1075 = vmatpush1.bf16.msra.mxu1 %v4368_v62  ;;  %v4417_v62 = vld [vmem:[%s6332_s9 + $0xe0] ss:$16 sps:$4 sm:$0xff]  }
 0x246   :  { %3760 = vmatprep.subr.msk.bf16.mxu1 %vm461_vm1, %v3757_v7  ;;  %v4432_v7 = vld [vmem:[%s6332_s9 + $0x128] ss:$16 sps:$4 sm:$0xff]  }
 0x249   :  { %1077 = vmatpush1.bf16.msra.mxu1 %v1006_v17  ;;  %v4449_v17 = vld [vmem:[%s6332_s9 + $0x184] ss:$16 sps:$4 sm:$0xff]  }
 0x24a   :  { %2117 = vmatprep.subr.bf16.mxu1 %v4380_v22  ;;  %v4458_v22 = vld [vmem:[%s6332_s9 + $0x1ac] ss:$16 sps:$4 sm:$0xff]  }
 0x2eb   :  { %v4168_v56 = vpop.f32.mrb[0].mxu1 }
 0x2ec   :  { %v626_v57 = vpop.f32.mrb[1].mxu1  ;;  %v632_v63 = vadd.f32 %v4168_v56, %v3701_v58  ;;  %v4413_v56 = vld [vmem:[%s6332_s9 + $0xc4] ss:$16 sps:$4 sm:$0xff]  }
 0x2ed   :  { %v627_v0 = vadd.f32 %v3701_v58, %v626_v57  ;;  %v4416_v57 = vld [vmem:[%s6332_s9 + $0xcc] ss:$16 sps:$4 sm:$0xff]  }
 0x2ee   :  { %v646_v11 = vmax.f32 %v632_v63, 0.0  ;;  %v4420_v63 = vld [vmem:[%s6332_s9 + $0xe8] ss:$16 sps:$4 sm:$0xff]  }
 0x2ef   :  { %v645_v14 = vmax.f32 %v627_v0, 0.0  ;;  %v4425_v0 = vld [vmem:[%s6332_s9 + $0x104] ss:$16 sps:$4 sm:$0xff]  }
 0x2f2   :  { %v4171_v1 = vpop.f32.mrb[2].mxu1 }
 0x2f3   :  { %v642_v4 = vadd.f32 %v4171_v1, %v3701_v58  ;;  %v636_v5 = vpop.f32.mrb[3].mxu1  ;;  %v4428_v1 = vld [vmem:[%s6332_s9 + $0x10c] ss:$16 sps:$4 sm:$0xff]  }
 0x2f4   :  { %v637_v8 = vadd.f32 %v3701_v58, %v636_v5  ;;  %v4411_v58 = vld [vmem:[%s6332_s9 + $0xc0] ss:$16 sps:$4 sm:$0xff]   ;;  %v4434_v5 = vld [vmem:[%s6332_s9 + $0x12c] ss:$16 sps:$4 sm:$0xff]  }
 0x2f5   :  { %v648_v13 = vmax.f32 %v642_v4, 0.0  ;;  %v4431_v4 = vld [vmem:[%s6332_s9 + $0x124] ss:$16 sps:$4 sm:$0xff]  }
 0x2f6   :  { %v647_v15 = vmax.f32 %v637_v8, 0.0  ;;  %v4437_v8 = vld [vmem:[%s6332_s9 + $0x144] ss:$16 sps:$4 sm:$0xff]  }
 0x2f7   :  { %v650_v18 = vmax.f32 %v646_v11, %v648_v13  ;;  %v4438_v11 = vld [vmem:[%s6332_s9 + $0x148] ss:$16 sps:$4 sm:$0xff]   ;;  %v4443_v13 = vld [vmem:[%s6332_s9 + $0x164] ss:$16 sps:$4 sm:$0xff]  }
 0x2f8   :  { %v649_v19 = vmax.f32 %v645_v14, %v647_v15  ;;  %v4446_v14 = vld [vmem:[%s6332_s9 + $0x16c] ss:$16 sps:$4 sm:$0xff]   ;;  %v4441_v15 = vld [vmem:[%s6332_s9 + $0x160] ss:$16 sps:$4 sm:$0xff]  }
 0x2fa   :  { %v651_v21 = vmax.f32 %v649_v19, %v650_v18  ;;  %v4452_v18 = vld [vmem:[%s6332_s9 + $0x18c] ss:$16 sps:$4 sm:$0xff]   ;;  %v4447_v19 = vld [vmem:[%s6332_s9 + $0x180] ss:$16 sps:$4 sm:$0xff]  }
 0x2fc   :  { %v657_v23 = vrot.slane %v651_v21, 4  ;;  %v653_v24 = vrot.slane %v651_v21, 2  ;;  %v661_v25 = vrot.slane %v651_v21, 6 }
 0x2fe   :  { %658 = vrot.lane.b32.xlu1 %v657_v23, %s5008_s14  ;;  %654 = vrot.lane.b32.xlu0 %v653_v24, %s5009_s0  ;;  %v4453_v23 = vld [vmem:[%s6332_s9 + $0x1a0] ss:$16 sps:$4 sm:$0xff]   ;;  %v4456_v24 = vld [vmem:[%s6332_s9 + $0x1a8] ss:$16 sps:$4 sm:$0xff]  }
 0x302   :  { %662 = vrot.lane.b32.xlu0 %v661_v25, %s5010_s17  ;;  %v4461_v25 = vld [vmem:[%s6332_s9 + $0x1c4] ss:$16 sps:$4 sm:$0xff]  }
 0x370   :  { %v655_v27 = vpop.permute.xlu0 %654  ;;  %v659_v28 = vpop.permute.xlu1 %658 }
 0x371   :  { %v666_v29 = vsel %vm665_vm10, %v651_v21, %v655_v27  ;;  %v4455_v21 = vld [vmem:[%s6332_s9 + $0x1a4] ss:$16 sps:$4 sm:$0xff]   ;;  %v4464_v27 = vld [vmem:[%s6332_s9 + $0x1cc] ss:$16 sps:$4 sm:$0xff]  }
 0x372   :  { %v668_v30 = vsel %vm667_vm11, %v666_v29, %v659_v28  ;;  %v4462_v29 = vld [vmem:[%s6332_s9 + $0x1c8] ss:$16 sps:$4 sm:$0xff]  }
 0x373   :  { %v671_v35 = vpack.c.bf16 %v668_v30, %v668_v30  ;;  %v4467_v30 = vld [vmem:[%s6332_s9 + $0x1e4] ss:$16 sps:$4 sm:$0xff]  }
 0x374   :  { %v663_v26 = vpop.permute.xlu0 %662 }
 0x375   :  { %v670_v31 = vsel %vm669_vm12, %v659_v28, %v663_v26  ;;  %v4459_v28 = vld [vmem:[%s6332_s9 + $0x1c0] ss:$16 sps:$4 sm:$0xff]  }
 0x376   :  { %v672_v32 = vpack.c.bf16 %v670_v31, %v670_v31  ;;  %v4465_v26 = vld [vmem:[%s6332_s9 + $0x1e0] ss:$16 sps:$4 sm:$0xff]   ;;  %v4468_v31 = vld [vmem:[%s6332_s9 + $0x1e8] ss:$16 sps:$4 sm:$0xff]  }
 0x378   :  { %3759 = vmatprep.mubr.msk.bf16.mxu0 %vm995_vm13, %v672_v32  ;;  %3761 = vmatprep.mubr.msk.bf16.mxu1 %vm995_vm13, %v672_v32  ;;  %v4470_v32 = vld [vmem:[%s6332_s9 + $0x1ec] ss:$16 sps:$4 sm:$0xff]  }
 0x379   :  { %1044 = vmatmul.mubr.bf16.vlgmr.msra.gmra.mrb[16].mxu0 %v671_v35  ;;  %1085 = vmatmul.mubr.bf16.vlgmr.msra.gmra.mrb[4].mxu1 %v671_v35  ;;  %v5575_v35 = vsub.s32 0, %v5318_v12 }
 0x37a   :  { %2036 = vmatpush1.bf16.msra.mxu0 %v4375_v33  ;;  %2118 = vmatpush1.bf16.msra.mxu1 %v4378_v34  ;;  %v4473_v33 = vld [vmem:[%s6332_s9 + $0x204] ss:$16 sps:$4 sm:$0xff]   ;;  %v4476_v34 = vld [vmem:[%s6332_s9 + $0x20c] ss:$16 sps:$4 sm:$0xff]  }
 0x37b   :  { %2037 = vmatprep.subr.bf16.mxu0 %v4383_v36  ;;  %2119 = vmatprep.subr.bf16.mxu1 %v4386_v37  ;;  %v5578_v36 = vsub.s32 2, %v5318_v12  ;;  %v723_v37 = vld [vmem:[%s6329_s6] sm:$0xf] }
 0x37e   :  { %2038 = vmatpush1.bf16.msra.mxu0 %v4381_v38  ;;  %2120 = vmatpush1.bf16.msra.mxu1 %v4384_v39  ;;  %v5584_v38 = vsub.s32 1, %v5318_v12  ;;  %v5587_v39 = vsub.s32 3, %v5318_v12 }
 0x37f   :  { %2039 = vmatprep.subr.bf16.mxu0 %v4389_v40  ;;  %2121 = vmatprep.subr.bf16.mxu1 %v4392_v41  ;;  %v728_v40 = vrot.slane %v723_v37, %v5575_v35  ;;  %v736_v41 = vrot.slane %v723_v37, %v5578_v36 }
 0x382   :  { %2040 = vmatpush1.bf16.msra.mxu0 %v4387_v42  ;;  %2122 = vmatpush1.bf16.msra.mxu1 %v4390_v43  ;;  %v732_v42 = vrot.slane %v723_v37, %v5584_v38  ;;  %v740_v43 = vrot.slane %v723_v37, %v5587_v39 }
 0x383   :  { %2041 = vmatprep.subr.bf16.mxu0 %v4395_v44  ;;  %2123 = vmatprep.subr.bf16.mxu1 %v4398_v45 }
 0x386   :  { %2042 = vmatpush1.bf16.msra.mxu0 %v4393_v46  ;;  %2124 = vmatpush1.bf16.msra.mxu1 %v4396_v47 }
 0x387   :  { %2043 = vmatprep.subr.bf16.mxu0 %v4401_v48  ;;  %2125 = vmatprep.subr.bf16.mxu1 %v4404_v49 }
 0x38a   :  { %2044 = vmatpush1.bf16.msra.mxu0 %v4399_v50  ;;  %2126 = vmatpush1.bf16.msra.mxu1 %v4402_v51 }
 0x38b   :  { %2045 = vmatprep.subr.bf16.mxu0 %v4407_v52  ;;  %2127 = vmatprep.subr.bf16.mxu1 %v4410_v53 }
 0x38e   :  { %2046 = vmatpush1.bf16.msra.mxu0 %v4405_v54  ;;  %2128 = vmatpush1.bf16.msra.mxu1 %v4408_v55 }
 0x38f   :  { %2047 = vmatprep.subr.bf16.mxu0 %v4413_v56  ;;  %2129 = vmatprep.subr.bf16.mxu1 %v4416_v57 }
 0x392   :  { %2048 = vmatpush1.bf16.msra.mxu0 %v4411_v58  ;;  %2130 = vmatpush1.bf16.msra.mxu1 %v4414_v59 }
 0x393   :  { %2049 = vmatprep.subr.bf16.mxu0 %v4419_v60  ;;  %2131 = vmatprep.subr.bf16.mxu1 %v4422_v61 }
 0x396   :  { %2050 = vmatpush1.bf16.msra.mxu0 %v4417_v62  ;;  %2132 = vmatpush1.bf16.msra.mxu1 %v4420_v63 }
 0x397   :  { %2051 = vmatprep.subr.bf16.mxu0 %v4425_v0  ;;  %2133 = vmatprep.subr.bf16.mxu1 %v4428_v1 }
 0x39a   :  { %2052 = vmatpush1.bf16.msra.mxu0 %v4423_v2  ;;  %2134 = vmatpush1.bf16.msra.mxu1 %v4426_v3 }
 0x39b   :  { %2053 = vmatprep.subr.bf16.mxu0 %v4431_v4  ;;  %2135 = vmatprep.subr.bf16.mxu1 %v4434_v5 }
 0x39e   :  { %2054 = vmatpush1.bf16.msra.mxu0 %v4429_v6  ;;  %2136 = vmatpush1.bf16.msra.mxu1 %v4432_v7 }
 0x39f   :  { %2055 = vmatprep.subr.bf16.mxu0 %v4437_v8  ;;  %2137 = vmatprep.subr.bf16.mxu1 %v4440_v9 }
 0x3a2   :  { %2056 = vmatpush1.bf16.msra.mxu0 %v4435_v10  ;;  %2138 = vmatpush1.bf16.msra.mxu1 %v4438_v11 }
 0x3a3   :  { %2057 = vmatprep.subr.bf16.mxu0 %v4443_v13  ;;  %2139 = vmatprep.subr.bf16.mxu1 %v4446_v14 }
 0x3a6   :  { %2058 = vmatpush1.bf16.msra.mxu0 %v4441_v15  ;;  %2140 = vmatpush1.bf16.msra.mxu1 %v4444_v16 }
 0x3a7   :  { %2059 = vmatprep.subr.bf16.mxu0 %v4449_v17  ;;  %2141 = vmatprep.subr.bf16.mxu1 %v4452_v18 }
 0x3aa   :  { %2060 = vmatpush1.bf16.msra.mxu0 %v4447_v19  ;;  %2142 = vmatpush1.bf16.msra.mxu1 %v4450_v20 }
 0x3ab   :  { %2061 = vmatprep.subr.bf16.mxu0 %v4455_v21  ;;  %2143 = vmatprep.subr.bf16.mxu1 %v4458_v22 }
 0x3ae   :  { %2062 = vmatpush1.bf16.msra.mxu0 %v4453_v23  ;;  %2144 = vmatpush1.bf16.msra.mxu1 %v4456_v24 }
 0x3af   :  { %2063 = vmatprep.subr.bf16.mxu0 %v4461_v25  ;;  %2145 = vmatprep.subr.bf16.mxu1 %v4464_v27 }
 0x3b2   :  { %2064 = vmatpush1.bf16.msra.mxu0 %v4459_v28  ;;  %2146 = vmatpush1.bf16.msra.mxu1 %v4462_v29 }
 0x3b3   :  { %2065 = vmatprep.subr.bf16.mxu0 %v4467_v30  ;;  %2147 = vmatprep.subr.bf16.mxu1 %v4470_v32 }
 0x3b6   :  { %2066 = vmatpush1.bf16.msra.mxu0 %v4465_v26  ;;  %2148 = vmatpush1.bf16.msra.mxu1 %v4468_v31 }
 0x3b7   :  { %2076 = vmatprep.subr.bf16.mxu0 %v4473_v33  ;;  %2158 = vmatprep.subr.bf16.mxu1 %v4476_v34 }
 0x44c   :  { %v1045_v44 = vpop.f32.mrb[16].mxu0  ;;  %v1086_v45 = vpop.f32.mrb[4].mxu1 }
 0x44d   :  { %v1046_v46 = vadd.f32 %v1045_v44, %v728_v40  ;;  %v1087_v47 = vadd.f32 %v1086_v45, %v736_v41  ;;  %v1047_v48 = vpop.f32.mrb[17].mxu0  ;;  %v1088_v49 = vpop.f32.mrb[5].mxu1 }
 0x44e   :  { %v1048_v50 = vadd.f32 %v1047_v48, %v732_v42  ;;  %v1089_v51 = vadd.f32 %v1088_v49, %v740_v43  ;;  %v1049_v52 = vpop.f32.mrb[18].mxu0  ;;  %v1090_v53 = vpop.f32.mrb[6].mxu1 }
 0x44f   :  { %v5593_v12 = vmax.f32 %v1046_v46, 0.0  ;;  %v5595_v54 = vmax.f32 %v1087_v47, 0.0  ;;  %v1050_v55 = vpop.f32.mrb[19].mxu0  ;;  %v1091_v56 = vpop.f32.mrb[7].mxu1 }
 0x450   :  { %v5597_v57 = vmax.f32 %v1048_v50, 0.0  ;;  %v5599_v58 = vmax.f32 %v1089_v51, 0.0 }
 0x451   :  { %v1099_v59 = vsel %vm452_vm3, %v5593_v12, 0.0  ;;  %v1131_v60 = vmul.f32 %v5593_v12, %v5593_v12  ;;  %v1113_v61 = vsel %vm452_vm3, %v5595_v54, 0.0  ;;  %v1133_v62 = vmul.f32 %v5595_v54, %v5595_v54 }
 0x452   :  { %v1100_v63 = vrot.slane %v1099_v59, 4  ;;  %v1114_v0 = vrot.slane %v1113_v61, 4  ;;  %v1106_v1 = vsel %vm452_vm3, %v5597_v57, 0.0  ;;  %v1132_v2 = vmul.f32 %v5597_v57, %v5597_v57 }
 0x453   :  { %v1135_v3 = vsel %vm452_vm3, %v1131_v60, 0.0  ;;  %v1149_v4 = vsel %vm452_vm3, %v1133_v62, 0.0  ;;  %v1107_v5 = vrot.slane %v1106_v1, 4  ;;  %v1120_v6 = vsel %vm452_vm3, %v5599_v58, 0.0 }
 0x454   :  { %v1101_v7 = vadd.f32 %v1100_v63, %v1099_v59  ;;  %v1136_v8 = vrot.slane %v1135_v3, 4  ;;  %v1115_v9 = vadd.f32 %v1114_v0, %v1113_v61  ;;  %v1150_v10 = vrot.slane %v1149_v4, 4 }
 0x455   :  { %v1108_v11 = vadd.f32 %v1107_v5, %v1106_v1  ;;  %v1142_v13 = vsel %vm452_vm3, %v1132_v2, 0.0  ;;  %v1121_v14 = vrot.slane %v1120_v6, 4  ;;  %v1134_v15 = vmul.f32 %v5599_v58, %v5599_v58 }
 0x456   :  { %v1102_v16 = vrot.slane %v1101_v7, 2  ;;  %v1137_v17 = vadd.f32 %v1136_v8, %v1135_v3  ;;  %v1116_v18 = vrot.slane %v1115_v9, 2  ;;  %v1151_v19 = vadd.f32 %v1150_v10, %v1149_v4 }
 0x457   :  { %v1109_v20 = vrot.slane %v1108_v11, 2  ;;  %v1143_v21 = vrot.slane %v1142_v13, 4  ;;  %v1122_v22 = vadd.f32 %v1121_v14, %v1120_v6  ;;  %v1156_v23 = vsel %vm452_vm3, %v1134_v15, 0.0 }
 0x458   :  { %v1103_v24 = vadd.f32 %v1102_v16, %v1101_v7  ;;  %v1138_v25 = vrot.slane %v1137_v17, 2  ;;  %v1117_v27 = vadd.f32 %v1116_v18, %v1115_v9  ;;  %v1152_v28 = vrot.slane %v1151_v19, 2 }
 0x459   :  { %v1110_v29 = vadd.f32 %v1109_v20, %v1108_v11  ;;  %v1144_v30 = vadd.f32 %v1143_v21, %v1142_v13  ;;  %v1123_v26 = vrot.slane %v1122_v22, 2  ;;  %v1157_v31 = vrot.slane %v1156_v23, 4  ;;  %v1097_v20 = vld [vmem:[%s6330_s7] sm:$0xf] }
 0x45a   :  { %v1104_v32 = vrot.slane %v1103_v24, 1  ;;  %v1139_v33 = vadd.f32 %v1138_v25, %v1137_v17  ;;  %v1118_v34 = vrot.slane %v1117_v27, 1  ;;  %v1153_v37 = vadd.f32 %v1152_v28, %v1151_v19 }
 0x45b   :  { %v1111_v40 = vrot.slane %v1110_v29, 1  ;;  %v1145_v41 = vrot.slane %v1144_v30, 2  ;;  %v1124_v42 = vadd.f32 %v1123_v26, %v1122_v22  ;;  %v1158_v43 = vadd.f32 %v1157_v31, %v1156_v23  ;;  %v1098_v23 = vld [vmem:[%s6331_s8] sm:$0xf] }
 0x45c   :  { %v1105_v44 = vadd.f32 %v1104_v32, %v1103_v24  ;;  %v1140_v45 = vrot.slane %v1139_v33, 1  ;;  %v1119_v46 = vadd.f32 %v1118_v34, %v1117_v27  ;;  %v1154_v47 = vrot.slane %v1153_v37, 1 }
 0x45d   :  { %v1112_v48 = vadd.f32 %v1111_v40, %v1110_v29  ;;  %v1146_v49 = vadd.f32 %v1145_v41, %v1144_v30  ;;  %v1125_v50 = vrot.slane %v1124_v42, 1  ;;  %v1159_v51 = vrot.slane %v1158_v43, 2 }
 0x45e   :  { %v1127_v52 = vmul.f32 0.5, %v1105_v44  ;;  %v1141_v53 = vadd.f32 %v1140_v45, %v1139_v33  ;;  %v1129_v55 = vmul.f32 0.5, %v1119_v46  ;;  %v1155_v56 = vadd.f32 %v1154_v47, %v1153_v37 }
 0x45f   :  { %v1128_v59 = vmul.f32 0.5, %v1112_v48  ;;  %v1147_v60 = vrot.slane %v1146_v49, 1  ;;  %v1126_v61 = vadd.f32 %v1125_v50, %v1124_v42  ;;  %v1160_v62 = vadd.f32 %v1159_v51, %v1158_v43  ;;  %v4471_v51 = vld [vmem:[%s6332_s9 + $0x200] ss:$16 sps:$4 sm:$0xff]  }
 0x460   :  { %v1163_v63 = vmul.f32 0.5, %v1141_v53  ;;  %v1167_v0 = vmul.f32 %v1127_v52, %v1127_v52  ;;  %v1165_v1 = vmul.f32 0.5, %v1155_v56  ;;  %v1169_v2 = vmul.f32 %v1129_v55, %v1129_v55  ;;  %v4482_v56 = vld [vmem:[%s6332_s9 + $0x22c] ss:$16 sps:$4 sm:$0xff]  }
 0x461   :  { %v1148_v3 = vadd.f32 %v1147_v60, %v1146_v49  ;;  %v1168_v4 = vmul.f32 %v1128_v59, %v1128_v59  ;;  %v1130_v6 = vmul.f32 0.5, %v1126_v61  ;;  %v1161_v7 = vrot.slane %v1160_v62, 1  ;;  %v4477_v60 = vld [vmem:[%s6332_s9 + $0x220] ss:$16 sps:$4 sm:$0xff]   ;;  %v4480_v61 = vld [vmem:[%s6332_s9 + $0x228] ss:$16 sps:$4 sm:$0xff]  }
 0x462   :  { %v1171_v5 = vsub.f32 %v1163_v63, %v1167_v0  ;;  %v1173_v8 = vsub.f32 %v1165_v1, %v1169_v2  ;;  %v1175_v21 = vsub.f32 %v5593_v12, %v1127_v52  ;;  %v1195_v22 = vrot.slane %v1097_v20, %v5575_v35  ;;  %v4488_v63 = vld [vmem:[%s6332_s9 + $0x24c] ss:$16 sps:$4 sm:$0xff]   ;;  %v4483_v0 = vld [vmem:[%s6332_s9 + $0x240] ss:$16 sps:$4 sm:$0xff]   ;;  %v4486_v1 = vld [vmem:[%s6332_s9 + $0x248] ss:$16 sps:$4 sm:$0xff]  }
 0x463   :  { %v1164_v9 = vmul.f32 0.5, %v1148_v3  ;;  %v1162_v11 = vadd.f32 %v1161_v7, %v1160_v62  ;;  %v1170_v13 = vmul.f32 %v1130_v6, %v1130_v6  ;;  %v1177_v25 = vsub.f32 %v5595_v54, %v1129_v55  ;;  %v4479_v55 = vld [vmem:[%s6332_s9 + $0x224] ss:$16 sps:$4 sm:$0xff]   ;;  %v4494_v3 = vld [vmem:[%s6332_s9 + $0x26c] ss:$16 sps:$4 sm:$0xff]  }
 0x464   :  { %v1179_v10 = vadd.f32 1e-05, %v1171_v5  ;;  %v1181_v14 = vadd.f32 1e-05, %v1173_v8  ;;  %v1203_v27 = vrot.slane %v1097_v20, %v5578_v36  ;;  %v1176_v26 = vsub.f32 %v5597_v57, %v1128_v59  ;;  %v4485_v62 = vld [vmem:[%s6332_s9 + $0x244] ss:$16 sps:$4 sm:$0xff]  }
 0x465   :  { %v1172_v15 = vsub.f32 %v1164_v9, %v1168_v4  ;;  %v1166_v16 = vmul.f32 0.5, %v1162_v11  ;;  %v1199_v31 = vrot.slane %v1097_v20, %v5584_v38  ;;  %v1228_v12 = vrot.slane %v1098_v23, %v5578_v36  ;;  %v4491_v2 = vld [vmem:[%s6332_s9 + $0x264] ss:$16 sps:$4 sm:$0xff]   ;;  %v4489_v4 = vld [vmem:[%s6332_s9 + $0x260] ss:$16 sps:$4 sm:$0xff]  }
 0x466   :  { %4759 = vrsqrt.f32 %v1179_v10  ;;  %v1220_v34 = vrot.slane %v1098_v23, %v5575_v35  ;;  %v1224_v41 = vrot.slane %v1098_v23, %v5584_v38  ;;  %v1178_v54 = vsub.f32 %v5599_v58, %v1130_v6  ;;  %v4474_v58 = vld [vmem:[%s6332_s9 + $0x208] ss:$16 sps:$4 sm:$0xff]   ;;  %v4497_v6 = vld [vmem:[%s6332_s9 + $0x284] ss:$16 sps:$4 sm:$0xff]   ;;  %v4500_v7 = vld [vmem:[%s6332_s9 + $0x28c] ss:$16 sps:$4 sm:$0xff]  }
 0x467   :  { %4761 = vrsqrt.f32 %v1181_v14  ;;  %v1180_v17 = vadd.f32 1e-05, %v1172_v15  ;;  %v1174_v18 = vsub.f32 %v1166_v16, %v1170_v13  ;;  %v1207_v42 = vrot.slane %v1097_v20, %v5587_v39  ;;  %v4492_v5 = vld [vmem:[%s6332_s9 + $0x268] ss:$16 sps:$4 sm:$0xff]   ;;  %v4495_v8 = vld [vmem:[%s6332_s9 + $0x280] ss:$16 sps:$4 sm:$0xff]  }
 0x468   :  { %v1232_v47 = vrot.slane %v1098_v23, %v5587_v39  ;;  %v4498_v9 = vld [vmem:[%s6332_s9 + $0x288] ss:$16 sps:$4 sm:$0xff]   ;;  %v4503_v10 = vld [vmem:[%s6332_s9 + $0x2a4] ss:$16 sps:$4 sm:$0xff]   ;;  %v4506_v11 = vld [vmem:[%s6332_s9 + $0x2ac] ss:$16 sps:$4 sm:$0xff]  }
 0x469   :  { %4763 = vrsqrt.f32 %v1180_v17  ;;  %v1182_v19 = vadd.f32 1e-05, %v1174_v18  ;;  %v4501_v13 = vld [vmem:[%s6332_s9 + $0x2a0] ss:$16 sps:$4 sm:$0xff]   ;;  %v4504_v14 = vld [vmem:[%s6332_s9 + $0x2a8] ss:$16 sps:$4 sm:$0xff]  }
 0x46a   :  { %v4509_v15 = vld [vmem:[%s6332_s9 + $0x2c4] ss:$16 sps:$4 sm:$0xff]   ;;  %v4512_v16 = vld [vmem:[%s6332_s9 + $0x2cc] ss:$16 sps:$4 sm:$0xff]   ;;  %v4507_v17 = vld [vmem:[%s6332_s9 + $0x2c0] ss:$16 sps:$4 sm:$0xff]  }
 0x46b   :  { %4765 = vrsqrt.f32 %v1182_v19  ;;  %v4510_v18 = vld [vmem:[%s6332_s9 + $0x2c8] ss:$16 sps:$4 sm:$0xff]   ;;  %v4515_v19 = vld [vmem:[%s6332_s9 + $0x2e4] ss:$16 sps:$4 sm:$0xff]   ;;  %v4518_v20 = vld [vmem:[%s6332_s9 + $0x2ec] ss:$16 sps:$4 sm:$0xff]  }
 0x46c   :  { %v4521_v23 = vld [vmem:[%s6332_s9 + $0x304] ss:$16 sps:$4 sm:$0xff]  }
 0x470   :  { %v4760_v24 = vpop.eup %4759 }
 0x471   :  { %v4762_v28 = vpop.eup %4761  ;;  %v1187_v29 = vmul.f32 %v4760_v24, %v1175_v21  ;;  %v4513_v21 = vld [vmem:[%s6332_s9 + $0x2e0] ss:$16 sps:$4 sm:$0xff]   ;;  %v4524_v24 = vld [vmem:[%s6332_s9 + $0x30c] ss:$16 sps:$4 sm:$0xff]  }
 0x472   :  { %v1189_v30 = vmul.f32 %v4762_v28, %v1177_v25  ;;  %v4519_v25 = vld [vmem:[%s6332_s9 + $0x300] ss:$16 sps:$4 sm:$0xff]   ;;  %v4527_v28 = vld [vmem:[%s6332_s9 + $0x324] ss:$16 sps:$4 sm:$0xff]  }
 0x473   :  { %v4764_v32 = vpop.eup %4763  ;;  %v1212_v33 = vmul.f32 %v1195_v22, %v1187_v29  ;;  %v4516_v22 = vld [vmem:[%s6332_s9 + $0x2e8] ss:$16 sps:$4 sm:$0xff]   ;;  %v4530_v29 = vld [vmem:[%s6332_s9 + $0x32c] ss:$16 sps:$4 sm:$0xff]  }
 0x474   :  { %v1214_v37 = vmul.f32 %v1203_v27, %v1189_v30  ;;  %v1188_v40 = vmul.f32 %v4764_v32, %v1176_v26  ;;  %v4522_v27 = vld [vmem:[%s6332_s9 + $0x308] ss:$16 sps:$4 sm:$0xff]   ;;  %v4525_v30 = vld [vmem:[%s6332_s9 + $0x320] ss:$16 sps:$4 sm:$0xff]  }
 0x475   :  { %v4766_v43 = vpop.eup %4765  ;;  %v1237_v46 = vadd.f32 %v1220_v34, %v1212_v33  ;;  %v4528_v26 = vld [vmem:[%s6332_s9 + $0x328] ss:$16 sps:$4 sm:$0xff]   ;;  %v4531_v32 = vld [vmem:[%s6332_s9 + $0x340] ss:$16 sps:$4 sm:$0xff]   ;;  %v4539_v34 = vld [vmem:[%s6332_s9 + $0x364] ss:$16 sps:$4 sm:$0xff]  }
 0x476   :  { %v1213_v44 = vmul.f32 %v1199_v31, %v1188_v40  ;;  %v5638_v45 = vadd.f32 %v1228_v12, %v1214_v37  ;;  %v1190_v57 = vmul.f32 %v4766_v43, %v1178_v54  ;;  %v4533_v31 = vld [vmem:[%s6332_s9 + $0x344] ss:$16 sps:$4 sm:$0xff]   ;;  %v4536_v12 = vld [vmem:[%s6332_s9 + $0x34c] ss:$16 sps:$4 sm:$0xff]   ;;  %v4534_v33 = vld [vmem:[%s6332_s9 + $0x348] ss:$16 sps:$4 sm:$0xff]  }
 0x477   :  { %v1241_v52 = vpack.c.bf16 %v1237_v46, %v1237_v46  ;;  %v4542_v37 = vld [vmem:[%s6332_s9 + $0x36c] ss:$16 sps:$4 sm:$0xff]   ;;  %v4537_v40 = vld [vmem:[%s6332_s9 + $0x360] ss:$16 sps:$4 sm:$0xff]   ;;  %v4545_v54 = vld [vmem:[%s6332_s9 + $0x384] ss:$16 sps:$4 sm:$0xff]  }
 0x478   :  { %v1238_v48 = vadd.f32 %v1224_v41, %v1213_v44  ;;  %v1215_v49 = vmul.f32 %v1207_v42, %v1190_v57  ;;  %v4540_v41 = vld [vmem:[%s6332_s9 + $0x368] ss:$16 sps:$4 sm:$0xff]   ;;  %v4548_v42 = vld [vmem:[%s6332_s9 + $0x38c] ss:$16 sps:$4 sm:$0xff]   ;;  %v4543_v43 = vld [vmem:[%s6332_s9 + $0x380] ss:$16 sps:$4 sm:$0xff]  }
 0x479   :  { %v4546_v44 = vld [vmem:[%s6332_s9 + $0x388] ss:$16 sps:$4 sm:$0xff]   ;;  %v4551_v57 = vld [vmem:[%s6332_s9 + $0x3a4] ss:$16 sps:$4 sm:$0xff]   ;;  %v4554_v46 = vld [vmem:[%s6332_s9 + $0x3ac] ss:$16 sps:$4 sm:$0xff]  }
 0x47a   :  { %v1242_v50 = vpack.c.bf16 %v1238_v48, %v1238_v48  ;;  %v1240_v53 = vadd.f32 %v1232_v47, %v1215_v49  ;;  %v4549_v47 = vld [vmem:[%s6332_s9 + $0x3a0] ss:$16 sps:$4 sm:$0xff]   ;;  %v4552_v48 = vld [vmem:[%s6332_s9 + $0x3a8] ss:$16 sps:$4 sm:$0xff]   ;;  %v4557_v49 = vld [vmem:[%s6332_s9 + $0x3c4] ss:$16 sps:$4 sm:$0xff]  }
 0x47c   :  { %2067 = vmatprep.mubr.bf16.mxu0 %v1242_v50  ;;  %2149 = vmatprep.mubr.bf16.mxu1 %v1242_v50  ;;  %v1244_v59 = vpack.c.bf16 %v1240_v53, %v1240_v53  ;;  %v4560_v50 = vld [vmem:[%s6332_s9 + $0x3cc] ss:$16 sps:$4 sm:$0xff]  }
 0x47d   :  { %2068 = vmatmul.mubr.bf16.vlgmr.msra.gmra.mrb[20].mxu0 %v1241_v52  ;;  %2150 = vmatmul.mubr.bf16.vlgmr.msra.gmra.mrb[8].mxu1 %v1241_v52  ;;  %v4563_v52 = vld [vmem:[%s6332_s9 + $0x3e4] ss:$16 sps:$4 sm:$0xff]   ;;  %v4566_v53 = vld [vmem:[%s6332_s9 + $0x3ec] ss:$16 sps:$4 sm:$0xff]  }
 0x47e   :  { %2077 = vmatpush1.bf16.msra.mxu0 %v4471_v51  ;;  %2159 = vmatpush1.bf16.msra.mxu1 %v4474_v58  ;;  %v4555_v51 = vld [vmem:[%s6332_s9 + $0x3c0] ss:$16 sps:$4 sm:$0xff]   ;;  %v4558_v58 = vld [vmem:[%s6332_s9 + $0x3c8] ss:$16 sps:$4 sm:$0xff]  }
 0x47f   :  { %2108 = vmatprep.mubr.bf16.mxu0 %v1244_v59  ;;  %2190 = vmatprep.mubr.bf16.mxu1 %v1244_v59  ;;  %v4569_v59 = vld [vmem:[%s6336_s13 + $0x4] ss:$16 sps:$4 sm:$0xff]  }
 0x480   :  { %2078 = vmatprep.subr.bf16.mxu0 %v4479_v55  ;;  %2160 = vmatprep.subr.bf16.mxu1 %v4482_v56  ;;  %v4561_v55 = vld [vmem:[%s6332_s9 + $0x3e0] ss:$16 sps:$4 sm:$0xff]   ;;  %v4564_v56 = vld [vmem:[%s6332_s9 + $0x3e8] ss:$16 sps:$4 sm:$0xff]  }
 0x482   :  { %2079 = vmatpush1.bf16.msra.mxu0 %v4477_v60  ;;  %2161 = vmatpush1.bf16.msra.mxu1 %v4480_v61  ;;  %v4572_v60 = vld [vmem:[%s6336_s13 + $0xc] ss:$16 sps:$4 sm:$0xff]   ;;  %v4567_v61 = vld [vmem:[%s6336_s13] ss:$16 sps:$4 sm:$0xff]  }
 0x483   :  { %2080 = vmatprep.subr.bf16.mxu0 %v4485_v62  ;;  %2162 = vmatprep.subr.bf16.mxu1 %v4488_v63  ;;  %v4570_v62 = vld [vmem:[%s6336_s13 + $0x8] ss:$16 sps:$4 sm:$0xff]   ;;  %v1243_v63 = vpack.c.bf16 %v5638_v45, %v5638_v45 }
 0x484   :  { %v4576_v45 = vld [vmem:[%s6336_s13 + $0x28] ss:$16 sps:$4 sm:$0xff]  }
 0x486   :  { %2081 = vmatpush1.bf16.msra.mxu0 %v4483_v0  ;;  %2163 = vmatpush1.bf16.msra.mxu1 %v4486_v1  ;;  %v4575_v0 = vld [vmem:[%s6336_s13 + $0x24] ss:$16 sps:$4 sm:$0xff]   ;;  %v4578_v1 = vld [vmem:[%s6336_s13 + $0x2c] ss:$16 sps:$4 sm:$0xff]  }
 0x487   :  { %2082 = vmatprep.subr.bf16.mxu0 %v4491_v2  ;;  %2164 = vmatprep.subr.bf16.mxu1 %v4494_v3  ;;  %v4573_v2 = vld [vmem:[%s6336_s13 + $0x20] ss:$16 sps:$4 sm:$0xff]   ;;  %v4581_v3 = vld [vmem:[%s6336_s13 + $0x44] ss:$16 sps:$4 sm:$0xff]  }
 0x48a   :  { %2083 = vmatpush1.bf16.msra.mxu0 %v4489_v4  ;;  %2165 = vmatpush1.bf16.msra.mxu1 %v4492_v5  ;;  %v4584_v4 = vld [vmem:[%s6336_s13 + $0x4c] ss:$16 sps:$4 sm:$0xff]   ;;  %v4579_v5 = vld [vmem:[%s6336_s13 + $0x40] ss:$16 sps:$4 sm:$0xff]  }
 0x48b   :  { %2084 = vmatprep.subr.bf16.mxu0 %v4497_v6  ;;  %2166 = vmatprep.subr.bf16.mxu1 %v4500_v7  ;;  %v4582_v6 = vld [vmem:[%s6336_s13 + $0x48] ss:$16 sps:$4 sm:$0xff]   ;;  %v4587_v7 = vld [vmem:[%s6336_s13 + $0x64] ss:$16 sps:$4 sm:$0xff]  }
 0x48e   :  { %2085 = vmatpush1.bf16.msra.mxu0 %v4495_v8  ;;  %2167 = vmatpush1.bf16.msra.mxu1 %v4498_v9  ;;  %v4590_v8 = vld [vmem:[%s6336_s13 + $0x6c] ss:$16 sps:$4 sm:$0xff]   ;;  %v4585_v9 = vld [vmem:[%s6336_s13 + $0x60] ss:$16 sps:$4 sm:$0xff]  }
 0x48f   :  { %2086 = vmatprep.subr.bf16.mxu0 %v4503_v10  ;;  %2168 = vmatprep.subr.bf16.mxu1 %v4506_v11  ;;  %v4588_v10 = vld [vmem:[%s6336_s13 + $0x68] ss:$16 sps:$4 sm:$0xff]   ;;  %v4593_v11 = vld [vmem:[%s6336_s13 + $0x84] ss:$16 sps:$4 sm:$0xff]  }
 0x492   :  { %2087 = vmatpush1.bf16.msra.mxu0 %v4501_v13  ;;  %2169 = vmatpush1.bf16.msra.mxu1 %v4504_v14  ;;  %v4596_v13 = vld [vmem:[%s6336_s13 + $0x8c] ss:$16 sps:$4 sm:$0xff]   ;;  %v4591_v14 = vld [vmem:[%s6336_s13 + $0x80] ss:$16 sps:$4 sm:$0xff]  }
 0x493   :  { %2088 = vmatprep.subr.bf16.mxu0 %v4509_v15  ;;  %2170 = vmatprep.subr.bf16.mxu1 %v4512_v16  ;;  %v4594_v15 = vld [vmem:[%s6336_s13 + $0x88] ss:$16 sps:$4 sm:$0xff]   ;;  %v4599_v16 = vld [vmem:[%s6336_s13 + $0xa4] ss:$16 sps:$4 sm:$0xff]  }
 0x496   :  { %2089 = vmatpush1.bf16.msra.mxu0 %v4507_v17  ;;  %2171 = vmatpush1.bf16.msra.mxu1 %v4510_v18  ;;  %v4602_v17 = vld [vmem:[%s6336_s13 + $0xac] ss:$16 sps:$4 sm:$0xff]   ;;  %v4597_v18 = vld [vmem:[%s6336_s13 + $0xa0] ss:$16 sps:$4 sm:$0xff]  }
 0x497   :  { %2090 = vmatprep.subr.bf16.mxu0 %v4515_v19  ;;  %2172 = vmatprep.subr.bf16.mxu1 %v4518_v20  ;;  %v4600_v19 = vld [vmem:[%s6336_s13 + $0xa8] ss:$16 sps:$4 sm:$0xff]   ;;  %v4605_v20 = vld [vmem:[%s6336_s13 + $0xc4] ss:$16 sps:$4 sm:$0xff]  }
 0x49a   :  { %2091 = vmatpush1.bf16.msra.mxu0 %v4513_v21  ;;  %2173 = vmatpush1.bf16.msra.mxu1 %v4516_v22  ;;  %v4608_v21 = vld [vmem:[%s6336_s13 + $0xcc] ss:$16 sps:$4 sm:$0xff]   ;;  %v4603_v22 = vld [vmem:[%s6336_s13 + $0xc0] ss:$16 sps:$4 sm:$0xff]  }
 0x49b   :  { %2092 = vmatprep.subr.bf16.mxu0 %v4521_v23  ;;  %2174 = vmatprep.subr.bf16.mxu1 %v4524_v24  ;;  %v4606_v23 = vld [vmem:[%s6336_s13 + $0xc8] ss:$16 sps:$4 sm:$0xff]   ;;  %v4611_v24 = vld [vmem:[%s6336_s13 + $0xe4] ss:$16 sps:$4 sm:$0xff]  }
 0x49e   :  { %2093 = vmatpush1.bf16.msra.mxu0 %v4519_v25  ;;  %2175 = vmatpush1.bf16.msra.mxu1 %v4522_v27  ;;  %v4614_v25 = vld [vmem:[%s6336_s13 + $0xec] ss:$16 sps:$4 sm:$0xff]   ;;  %v4609_v27 = vld [vmem:[%s6336_s13 + $0xe0] ss:$16 sps:$4 sm:$0xff]  }
 0x49f   :  { %2094 = vmatprep.subr.bf16.mxu0 %v4527_v28  ;;  %2176 = vmatprep.subr.bf16.mxu1 %v4530_v29  ;;  %v4612_v28 = vld [vmem:[%s6336_s13 + $0xe8] ss:$16 sps:$4 sm:$0xff]   ;;  %v4617_v29 = vld [vmem:[%s6336_s13 + $0x104] ss:$16 sps:$4 sm:$0xff]  }
 0x4a2   :  { %2095 = vmatpush1.bf16.msra.mxu0 %v4525_v30  ;;  %2177 = vmatpush1.bf16.msra.mxu1 %v4528_v26  ;;  %v4620_v30 = vld [vmem:[%s6336_s13 + $0x10c] ss:$16 sps:$4 sm:$0xff]   ;;  %v4615_v26 = vld [vmem:[%s6336_s13 + $0x100] ss:$16 sps:$4 sm:$0xff]  }
 0x4a3   :  { %2096 = vmatprep.subr.bf16.mxu0 %v4533_v31  ;;  %2178 = vmatprep.subr.bf16.mxu1 %v4536_v12  ;;  %v4618_v31 = vld [vmem:[%s6336_s13 + $0x108] ss:$16 sps:$4 sm:$0xff]   ;;  %v4623_v12 = vld [vmem:[%s6336_s13 + $0x124] ss:$16 sps:$4 sm:$0xff]  }
 0x4a6   :  { %2097 = vmatpush1.bf16.msra.mxu0 %v4531_v32  ;;  %2179 = vmatpush1.bf16.msra.mxu1 %v4534_v33  ;;  %v4626_v32 = vld [vmem:[%s6336_s13 + $0x12c] ss:$16 sps:$4 sm:$0xff]   ;;  %v4621_v33 = vld [vmem:[%s6336_s13 + $0x120] ss:$16 sps:$4 sm:$0xff]  }
 0x4a7   :  { %2098 = vmatprep.subr.bf16.mxu0 %v4539_v34  ;;  %2180 = vmatprep.subr.bf16.mxu1 %v4542_v37  ;;  %v4624_v34 = vld [vmem:[%s6336_s13 + $0x128] ss:$16 sps:$4 sm:$0xff]   ;;  %v4629_v37 = vld [vmem:[%s6336_s13 + $0x144] ss:$16 sps:$4 sm:$0xff]  }
 0x4aa   :  { %2099 = vmatpush1.bf16.msra.mxu0 %v4537_v40  ;;  %2181 = vmatpush1.bf16.msra.mxu1 %v4540_v41  ;;  %v4632_v40 = vld [vmem:[%s6336_s13 + $0x14c] ss:$16 sps:$4 sm:$0xff]   ;;  %v4627_v41 = vld [vmem:[%s6336_s13 + $0x140] ss:$16 sps:$4 sm:$0xff]  }
 0x4ab   :  { %2100 = vmatprep.subr.bf16.mxu0 %v4545_v54  ;;  %2182 = vmatprep.subr.bf16.mxu1 %v4548_v42  ;;  %v4630_v54 = vld [vmem:[%s6336_s13 + $0x148] ss:$16 sps:$4 sm:$0xff]   ;;  %v4635_v42 = vld [vmem:[%s6336_s13 + $0x164] ss:$16 sps:$4 sm:$0xff]  }
 0x4ae   :  { %2101 = vmatpush1.bf16.msra.mxu0 %v4543_v43  ;;  %2183 = vmatpush1.bf16.msra.mxu1 %v4546_v44  ;;  %v4638_v43 = vld [vmem:[%s6336_s13 + $0x16c] ss:$16 sps:$4 sm:$0xff]   ;;  %v4633_v44 = vld [vmem:[%s6336_s13 + $0x160] ss:$16 sps:$4 sm:$0xff]  }
 0x4af   :  { %2102 = vmatprep.subr.bf16.mxu0 %v4551_v57  ;;  %2184 = vmatprep.subr.bf16.mxu1 %v4554_v46  ;;  %v4636_v57 = vld [vmem:[%s6336_s13 + $0x168] ss:$16 sps:$4 sm:$0xff]   ;;  %v4641_v46 = vld [vmem:[%s6336_s13 + $0x184] ss:$16 sps:$4 sm:$0xff]  }
 0x4b2   :  { %2103 = vmatpush1.bf16.msra.mxu0 %v4549_v47  ;;  %2185 = vmatpush1.bf16.msra.mxu1 %v4552_v48  ;;  %v4644_v47 = vld [vmem:[%s6336_s13 + $0x18c] ss:$16 sps:$4 sm:$0xff]   ;;  %v4639_v48 = vld [vmem:[%s6336_s13 + $0x180] ss:$16 sps:$4 sm:$0xff]  }
 0x4b3   :  { %2104 = vmatprep.subr.bf16.mxu0 %v4557_v49  ;;  %2186 = vmatprep.subr.bf16.mxu1 %v4560_v50  ;;  %v4642_v49 = vld [vmem:[%s6336_s13 + $0x188] ss:$16 sps:$4 sm:$0xff]   ;;  %v4647_v50 = vld [vmem:[%s6336_s13 + $0x1a4] ss:$16 sps:$4 sm:$0xff]  }
 0x4b6   :  { %2105 = vmatpush1.bf16.msra.mxu0 %v4555_v51  ;;  %2187 = vmatpush1.bf16.msra.mxu1 %v4558_v58  ;;  %v4650_v51 = vld [vmem:[%s6336_s13 + $0x1ac] ss:$16 sps:$4 sm:$0xff]   ;;  %v4645_v58 = vld [vmem:[%s6336_s13 + $0x1a0] ss:$16 sps:$4 sm:$0xff]  }
 0x4b7   :  { %2106 = vmatprep.subr.bf16.mxu0 %v4563_v52  ;;  %2188 = vmatprep.subr.bf16.mxu1 %v4566_v53  ;;  %v4648_v52 = vld [vmem:[%s6336_s13 + $0x1a8] ss:$16 sps:$4 sm:$0xff]   ;;  %v4653_v53 = vld [vmem:[%s6336_s13 + $0x1c4] ss:$16 sps:$4 sm:$0xff]  }
 0x4ba   :  { %2107 = vmatpush1.bf16.msra.mxu0 %v4561_v55  ;;  %2189 = vmatpush1.bf16.msra.mxu1 %v4564_v56  ;;  %v4656_v55 = vld [vmem:[%s6336_s13 + $0x1cc] ss:$16 sps:$4 sm:$0xff]   ;;  %v4651_v56 = vld [vmem:[%s6336_s13 + $0x1c0] ss:$16 sps:$4 sm:$0xff]  }
 0x4bb   :  { %3141 = vmatprep.subr.bf16.mxu0 %v4569_v59  ;;  %3223 = vmatprep.subr.bf16.mxu1 %v4572_v60  ;;  %v4654_v59 = vld [vmem:[%s6336_s13 + $0x1c8] ss:$16 sps:$4 sm:$0xff]   ;;  %v4659_v60 = vld [vmem:[%s6336_s13 + $0x1e4] ss:$16 sps:$4 sm:$0xff]  }
 0x4bd   :  { %2109 = vmatmul.mubr.bf16.vlgmr.msra.gmra.mrb[20].mxu0 %v1243_v63  ;;  %2191 = vmatmul.mubr.bf16.vlgmr.msra.gmra.mrb[8].mxu1 %v1243_v63  ;;  %v4662_v63 = vld [vmem:[%s6336_s13 + $0x1ec] ss:$16 sps:$4 sm:$0xff]  }
 0x4be   :  { %3142 = vmatpush1.bf16.msra.mxu0 %v4567_v61  ;;  %3224 = vmatpush1.bf16.msra.mxu1 %v4570_v62  ;;  %v4657_v61 = vld [vmem:[%s6336_s13 + $0x1e0] ss:$16 sps:$4 sm:$0xff]   ;;  %v4660_v62 = vld [vmem:[%s6336_s13 + $0x1e8] ss:$16 sps:$4 sm:$0xff]  }
 0x4bf   :  { %3143 = vmatprep.subr.bf16.mxu0 %v4575_v0  ;;  %3225 = vmatprep.subr.bf16.mxu1 %v4578_v1  ;;  %v4665_v0 = vld [vmem:[%s6336_s13 + $0x204] ss:$16 sps:$4 sm:$0xff]   ;;  %v4668_v1 = vld [vmem:[%s6336_s13 + $0x20c] ss:$16 sps:$4 sm:$0xff]  }
 0x4c2   :  { %3144 = vmatpush1.bf16.msra.mxu0 %v4573_v2  ;;  %3226 = vmatpush1.bf16.msra.mxu1 %v4576_v45  ;;  %v1373_v2 = vld [vmem:[%s6333_s10] sm:$0xf] }
 0x4c3   :  { %3145 = vmatprep.subr.bf16.mxu0 %v4581_v3  ;;  %3227 = vmatprep.subr.bf16.mxu1 %v4584_v4  ;;  %v1378_v45 = vrot.slane %v1373_v2, %v5575_v35  ;;  %v1386_v3 = vrot.slane %v1373_v2, %v5578_v36  ;;  %v1382_v4 = vrot.slane %v1373_v2, %v5584_v38 }
 0x4c6   :  { %3146 = vmatpush1.bf16.msra.mxu0 %v4579_v5  ;;  %3228 = vmatpush1.bf16.msra.mxu1 %v4582_v6  ;;  %v1390_v5 = vrot.slane %v1373_v2, %v5587_v39 }
 0x4c7   :  { %3147 = vmatprep.subr.bf16.mxu0 %v4587_v7  ;;  %3229 = vmatprep.subr.bf16.mxu1 %v4590_v8 }
 0x4ca   :  { %3148 = vmatpush1.bf16.msra.mxu0 %v4585_v9  ;;  %3230 = vmatpush1.bf16.msra.mxu1 %v4588_v10 }
 0x4cb   :  { %3149 = vmatprep.subr.bf16.mxu0 %v4593_v11  ;;  %3231 = vmatprep.subr.bf16.mxu1 %v4596_v13 }
 0x4ce   :  { %3150 = vmatpush1.bf16.msra.mxu0 %v4591_v14  ;;  %3232 = vmatpush1.bf16.msra.mxu1 %v4594_v15 }
 0x4cf   :  { %3151 = vmatprep.subr.bf16.mxu0 %v4599_v16  ;;  %3233 = vmatprep.subr.bf16.mxu1 %v4602_v17 }
 0x4d2   :  { %3152 = vmatpush1.bf16.msra.mxu0 %v4597_v18  ;;  %3234 = vmatpush1.bf16.msra.mxu1 %v4600_v19 }
 0x4d3   :  { %3153 = vmatprep.subr.bf16.mxu0 %v4605_v20  ;;  %3235 = vmatprep.subr.bf16.mxu1 %v4608_v21 }
 0x4d6   :  { %3154 = vmatpush1.bf16.msra.mxu0 %v4603_v22  ;;  %3236 = vmatpush1.bf16.msra.mxu1 %v4606_v23 }
 0x4d7   :  { %3155 = vmatprep.subr.bf16.mxu0 %v4611_v24  ;;  %3237 = vmatprep.subr.bf16.mxu1 %v4614_v25 }
 0x4da   :  { %3156 = vmatpush1.bf16.msra.mxu0 %v4609_v27  ;;  %3238 = vmatpush1.bf16.msra.mxu1 %v4612_v28 }
 0x4db   :  { %3157 = vmatprep.subr.bf16.mxu0 %v4617_v29  ;;  %3239 = vmatprep.subr.bf16.mxu1 %v4620_v30 }
 0x4de   :  { %3158 = vmatpush1.bf16.msra.mxu0 %v4615_v26  ;;  %3240 = vmatpush1.bf16.msra.mxu1 %v4618_v31 }
 0x4df   :  { %3159 = vmatprep.subr.bf16.mxu0 %v4623_v12  ;;  %3241 = vmatprep.subr.bf16.mxu1 %v4626_v32 }
 0x4e2   :  { %3160 = vmatpush1.bf16.msra.mxu0 %v4621_v33  ;;  %3242 = vmatpush1.bf16.msra.mxu1 %v4624_v34 }
 0x4e3   :  { %3161 = vmatprep.subr.bf16.mxu0 %v4629_v37  ;;  %3243 = vmatprep.subr.bf16.mxu1 %v4632_v40 }
 0x4e6   :  { %3162 = vmatpush1.bf16.msra.mxu0 %v4627_v41  ;;  %3244 = vmatpush1.bf16.msra.mxu1 %v4630_v54 }
 0x4e7   :  { %3163 = vmatprep.subr.bf16.mxu0 %v4635_v42  ;;  %3245 = vmatprep.subr.bf16.mxu1 %v4638_v43 }
 0x4ea   :  { %3164 = vmatpush1.bf16.msra.mxu0 %v4633_v44  ;;  %3246 = vmatpush1.bf16.msra.mxu1 %v4636_v57 }
 0x4eb   :  { %3165 = vmatprep.subr.bf16.mxu0 %v4641_v46  ;;  %3247 = vmatprep.subr.bf16.mxu1 %v4644_v47 }
 0x4ee   :  { %3166 = vmatpush1.bf16.msra.mxu0 %v4639_v48  ;;  %3248 = vmatpush1.bf16.msra.mxu1 %v4642_v49 }
 0x4ef   :  { %3167 = vmatprep.subr.bf16.mxu0 %v4647_v50  ;;  %3249 = vmatprep.subr.bf16.mxu1 %v4650_v51 }
 0x4f2   :  { %3168 = vmatpush1.bf16.msra.mxu0 %v4645_v58  ;;  %3250 = vmatpush1.bf16.msra.mxu1 %v4648_v52 }
 0x4f3   :  { %3169 = vmatprep.subr.bf16.mxu0 %v4653_v53  ;;  %3251 = vmatprep.subr.bf16.mxu1 %v4656_v55 }
 0x4f6   :  { %3170 = vmatpush1.bf16.msra.mxu0 %v4651_v56  ;;  %3252 = vmatpush1.bf16.msra.mxu1 %v4654_v59 }
 0x4f7   :  { %3171 = vmatprep.subr.bf16.mxu0 %v4659_v60  ;;  %3253 = vmatprep.subr.bf16.mxu1 %v4662_v63 }
 0x4fa   :  { %3172 = vmatpush1.bf16.msra.mxu0 %v4657_v61  ;;  %3254 = vmatpush1.bf16.msra.mxu1 %v4660_v62 }
 0x4fb   :  { %3182 = vmatprep.subr.bf16.mxu0 %v4665_v0  ;;  %3264 = vmatprep.subr.bf16.mxu1 %v4668_v1 }
 0x590   :  { %v2110_v6 = vpop.f32.mrb[20].mxu0  ;;  %v2192_v7 = vpop.f32.mrb[8].mxu1 }
 0x591   :  { %v4256_v8 = vadd.f32 %v2110_v6, %v1378_v45  ;;  %v4258_v9 = vadd.f32 %v2192_v7, %v1386_v3  ;;  %v2112_v10 = vpop.f32.mrb[21].mxu0  ;;  %v2194_v11 = vpop.f32.mrb[9].mxu1 }
 0x592   :  { %v4257_v13 = vadd.f32 %v2112_v10, %v1382_v4  ;;  %v4259_v14 = vadd.f32 %v2194_v11, %v1390_v5  ;;  %v2114_v15 = vpop.f32.mrb[22].mxu0  ;;  %v2196_v16 = vpop.f32.mrb[10].mxu1 }
 0x593   :  { %v6034_v17 = vmax.f32 %v4256_v8, 0.0  ;;  %v6036_v18 = vmax.f32 %v4258_v9, 0.0  ;;  %v2115_v19 = vpop.f32.mrb[23].mxu0  ;;  %v2197_v20 = vpop.f32.mrb[11].mxu1 }
 0x594   :  { %v6038_v21 = vmax.f32 %v4257_v13, 0.0  ;;  %v6040_v22 = vmax.f32 %v4259_v14, 0.0 }
 0x595   :  { %v2205_v23 = vsel %vm452_vm3, %v6034_v17, 0.0  ;;  %v2237_v24 = vmul.f32 %v6034_v17, %v6034_v17  ;;  %v2219_v25 = vsel %vm452_vm3, %v6036_v18, 0.0  ;;  %v2239_v27 = vmul.f32 %v6036_v18, %v6036_v18 }
 0x596   :  { %v2206_v28 = vrot.slane %v2205_v23, 4  ;;  %v2220_v29 = vrot.slane %v2219_v25, 4  ;;  %v2212_v30 = vsel %vm452_vm3, %v6038_v21, 0.0  ;;  %v2238_v26 = vmul.f32 %v6038_v21, %v6038_v21 }
 0x597   :  { %v2241_v31 = vsel %vm452_vm3, %v2237_v24, 0.0  ;;  %v2255_v12 = vsel %vm452_vm3, %v2239_v27, 0.0  ;;  %v2213_v32 = vrot.slane %v2212_v30, 4  ;;  %v2226_v33 = vsel %vm452_vm3, %v6040_v22, 0.0 }
 0x598   :  { %v2207_v34 = vadd.f32 %v2206_v28, %v2205_v23  ;;  %v2242_v37 = vrot.slane %v2241_v31, 4  ;;  %v2221_v40 = vadd.f32 %v2220_v29, %v2219_v25  ;;  %v2256_v41 = vrot.slane %v2255_v12, 4 }
 0x599   :  { %v2214_v54 = vadd.f32 %v2213_v32, %v2212_v30  ;;  %v2248_v42 = vsel %vm452_vm3, %v2238_v26, 0.0  ;;  %v2227_v43 = vrot.slane %v2226_v33, 4  ;;  %v2240_v44 = vmul.f32 %v6040_v22, %v6040_v22 }
 0x59a   :  { %v2208_v57 = vrot.slane %v2207_v34, 2  ;;  %v2243_v46 = vadd.f32 %v2242_v37, %v2241_v31  ;;  %v2222_v47 = vrot.slane %v2221_v40, 2  ;;  %v2257_v48 = vadd.f32 %v2256_v41, %v2255_v12 }
 0x59b   :  { %v2215_v49 = vrot.slane %v2214_v54, 2  ;;  %v2249_v50 = vrot.slane %v2248_v42, 4  ;;  %v2228_v51 = vadd.f32 %v2227_v43, %v2226_v33  ;;  %v2262_v58 = vsel %vm452_vm3, %v2240_v44, 0.0 }
 0x59c   :  { %v2209_v52 = vadd.f32 %v2208_v57, %v2207_v34  ;;  %v2244_v53 = vrot.slane %v2243_v46, 2  ;;  %v2223_v55 = vadd.f32 %v2222_v47, %v2221_v40  ;;  %v2258_v56 = vrot.slane %v2257_v48, 2 }
 0x59d   :  { %v2216_v59 = vadd.f32 %v2215_v49, %v2214_v54  ;;  %v2250_v60 = vadd.f32 %v2249_v50, %v2248_v42  ;;  %v2229_v61 = vrot.slane %v2228_v51, 2  ;;  %v2263_v62 = vrot.slane %v2262_v58, 4  ;;  %v2203_v49 = vld [vmem:[%s6334_s11] sm:$0xf] }
 0x59e   :  { %v2210_v63 = vrot.slane %v2209_v52, 1  ;;  %v2245_v0 = vadd.f32 %v2244_v53, %v2243_v46  ;;  %v2224_v1 = vrot.slane %v2223_v55, 1  ;;  %v2259_v2 = vadd.f32 %v2258_v56, %v2257_v48 }
 0x59f   :  { %v2217_v45 = vrot.slane %v2216_v59, 1  ;;  %v2251_v3 = vrot.slane %v2250_v60, 2  ;;  %v2230_v4 = vadd.f32 %v2229_v61, %v2228_v51  ;;  %v2264_v5 = vadd.f32 %v2263_v62, %v2262_v58  ;;  %v2204_v58 = vld [vmem:[#allocation7] sm:$0xf] }
 0x5a0   :  { %v2211_v6 = vadd.f32 %v2210_v63, %v2209_v52  ;;  %v2246_v7 = vrot.slane %v2245_v0, 1  ;;  %v2225_v8 = vadd.f32 %v2224_v1, %v2223_v55  ;;  %v2260_v9 = vrot.slane %v2259_v2, 1 }
 0x5a1   :  { %v2218_v10 = vadd.f32 %v2217_v45, %v2216_v59  ;;  %v2252_v11 = vadd.f32 %v2251_v3, %v2250_v60  ;;  %v2231_v13 = vrot.slane %v2230_v4, 1  ;;  %v2265_v14 = vrot.slane %v2264_v5, 2 }
 0x5a2   :  { %v2233_v15 = vmul.f32 0.5, %v2211_v6  ;;  %v2247_v16 = vadd.f32 %v2246_v7, %v2245_v0  ;;  %v2235_v19 = vmul.f32 0.5, %v2225_v8  ;;  %v2261_v20 = vadd.f32 %v2260_v9, %v2259_v2 }
 0x5a3   :  { %v2234_v23 = vmul.f32 0.5, %v2218_v10  ;;  %v2253_v24 = vrot.slane %v2252_v11, 1  ;;  %v2232_v25 = vadd.f32 %v2231_v13, %v2230_v4  ;;  %v2266_v27 = vadd.f32 %v2265_v14, %v2264_v5  ;;  %v4663_v14 = vld [vmem:[%s6336_s13 + $0x200] ss:$16 sps:$4 sm:$0xff]  }
 0x5a4   :  { %v2269_v28 = vmul.f32 0.5, %v2247_v16  ;;  %v2273_v29 = vmul.f32 %v2233_v15, %v2233_v15  ;;  %v2271_v30 = vmul.f32 0.5, %v2261_v20  ;;  %v2275_v26 = vmul.f32 %v2235_v19, %v2235_v19  ;;  %v4674_v20 = vld [vmem:[%s6336_s13 + $0x22c] ss:$16 sps:$4 sm:$0xff]  }
 0x5a5   :  { %v2254_v31 = vadd.f32 %v2253_v24, %v2252_v11  ;;  %v2274_v12 = vmul.f32 %v2234_v23, %v2234_v23  ;;  %v2236_v33 = vmul.f32 0.5, %v2232_v25  ;;  %v2267_v34 = vrot.slane %v2266_v27, 1  ;;  %v4669_v24 = vld [vmem:[%s6336_s13 + $0x220] ss:$16 sps:$4 sm:$0xff]   ;;  %v4672_v25 = vld [vmem:[%s6336_s13 + $0x228] ss:$16 sps:$4 sm:$0xff]  }
 0x5a6   :  { %v2277_v32 = vsub.f32 %v2269_v28, %v2273_v29  ;;  %v2279_v37 = vsub.f32 %v2271_v30, %v2275_v26  ;;  %v2281_v50 = vsub.f32 %v6034_v17, %v2233_v15  ;;  %v2301_v51 = vrot.slane %v2203_v49, %v5575_v35  ;;  %v4680_v28 = vld [vmem:[%s6336_s13 + $0x24c] ss:$16 sps:$4 sm:$0xff]   ;;  %v4675_v29 = vld [vmem:[%s6336_s13 + $0x240] ss:$16 sps:$4 sm:$0xff]   ;;  %v4678_v30 = vld [vmem:[%s6336_s13 + $0x248] ss:$16 sps:$4 sm:$0xff]  }
 0x5a7   :  { %v2270_v40 = vmul.f32 0.5, %v2254_v31  ;;  %v2268_v54 = vadd.f32 %v2267_v34, %v2266_v27  ;;  %v2276_v42 = vmul.f32 %v2236_v33, %v2236_v33  ;;  %v2283_v53 = vsub.f32 %v6036_v18, %v2235_v19  ;;  %v4671_v19 = vld [vmem:[%s6336_s13 + $0x224] ss:$16 sps:$4 sm:$0xff]   ;;  %v4686_v31 = vld [vmem:[%s6336_s13 + $0x26c] ss:$16 sps:$4 sm:$0xff]  }
 0x5a8   :  { %v2285_v41 = vadd.f32 1e-05, %v2277_v32  ;;  %v2287_v43 = vadd.f32 1e-05, %v2279_v37  ;;  %v2309_v55 = vrot.slane %v2203_v49, %v5578_v36  ;;  %v2282_v61 = vsub.f32 %v6038_v21, %v2234_v23  ;;  %v4677_v27 = vld [vmem:[%s6336_s13 + $0x244] ss:$16 sps:$4 sm:$0xff]  }
 0x5a9   :  { %v2278_v44 = vsub.f32 %v2270_v40, %v2274_v12  ;;  %v2272_v57 = vmul.f32 0.5, %v2268_v54  ;;  %v2305_v62 = vrot.slane %v2203_v49, %v5584_v38  ;;  %v2334_v63 = vrot.slane %v2204_v58, %v5578_v36  ;;  %v4683_v26 = vld [vmem:[%s6336_s13 + $0x264] ss:$16 sps:$4 sm:$0xff]   ;;  %v4681_v12 = vld [vmem:[%s6336_s13 + $0x260] ss:$16 sps:$4 sm:$0xff]  }
 0x5aa   :  { %4767 = vrsqrt.f32 %v2285_v41  ;;  %v2326_v17 = vrot.slane %v2204_v58, %v5575_v35  ;;  %v2330_v3 = vrot.slane %v2204_v58, %v5584_v38  ;;  %v2284_v18 = vsub.f32 %v6040_v22, %v2236_v33  ;;  %v4666_v22 = vld [vmem:[%s6336_s13 + $0x208] ss:$16 sps:$4 sm:$0xff]   ;;  %v4689_v33 = vld [vmem:[%s6336_s13 + $0x284] ss:$16 sps:$4 sm:$0xff]   ;;  %v4692_v34 = vld [vmem:[%s6336_s13 + $0x28c] ss:$16 sps:$4 sm:$0xff]  }
 0x5ab   :  { %4769 = vrsqrt.f32 %v2287_v43  ;;  %v2286_v46 = vadd.f32 1e-05, %v2278_v44  ;;  %v2280_v47 = vsub.f32 %v2272_v57, %v2276_v42  ;;  %v2313_v4 = vrot.slane %v2203_v49, %v5587_v39  ;;  %v4684_v32 = vld [vmem:[%s6336_s13 + $0x268] ss:$16 sps:$4 sm:$0xff]   ;;  %v4687_v37 = vld [vmem:[%s6336_s13 + $0x280] ss:$16 sps:$4 sm:$0xff]  }
 0x5ac   :  { %v2338_v9 = vrot.slane %v2204_v58, %v5587_v39  ;;  %v4690_v40 = vld [vmem:[%s6336_s13 + $0x288] ss:$16 sps:$4 sm:$0xff]   ;;  %v4695_v41 = vld [vmem:[%s6336_s13 + $0x2a4] ss:$16 sps:$4 sm:$0xff]   ;;  %v4698_v54 = vld [vmem:[%s6336_s13 + $0x2ac] ss:$16 sps:$4 sm:$0xff]  }
 0x5ad   :  { %4771 = vrsqrt.f32 %v2286_v46  ;;  %v2288_v48 = vadd.f32 1e-05, %v2280_v47  ;;  %v4693_v42 = vld [vmem:[%s6336_s13 + $0x2a0] ss:$16 sps:$4 sm:$0xff]   ;;  %v4696_v43 = vld [vmem:[%s6336_s13 + $0x2a8] ss:$16 sps:$4 sm:$0xff]  }
 0x5ae   :  { %v4701_v44 = vld [vmem:[%s6336_s13 + $0x2c4] ss:$16 sps:$4 sm:$0xff]   ;;  %v4704_v57 = vld [vmem:[%s6336_s13 + $0x2cc] ss:$16 sps:$4 sm:$0xff]   ;;  %v4699_v46 = vld [vmem:[%s6336_s13 + $0x2c0] ss:$16 sps:$4 sm:$0xff]  }
 0x5af   :  { %4773 = vrsqrt.f32 %v2288_v48  ;;  %v4702_v47 = vld [vmem:[%s6336_s13 + $0x2c8] ss:$16 sps:$4 sm:$0xff]   ;;  %v4707_v48 = vld [vmem:[%s6336_s13 + $0x2e4] ss:$16 sps:$4 sm:$0xff]   ;;  %v4710_v49 = vld [vmem:[%s6336_s13 + $0x2ec] ss:$16 sps:$4 sm:$0xff]  }
 0x5b0   :  { %v4713_v58 = vld [vmem:[%s6336_s13 + $0x304] ss:$16 sps:$4 sm:$0xff]  }
 0x5b4   :  { %v4768_v52 = vpop.eup %4767 }
 0x5b5   :  { %v4770_v56 = vpop.eup %4769  ;;  %v2293_v59 = vmul.f32 %v4768_v52, %v2281_v50  ;;  %v4705_v50 = vld [vmem:[%s6336_s13 + $0x2e0] ss:$16 sps:$4 sm:$0xff]   ;;  %v4716_v52 = vld [vmem:[%s6336_s13 + $0x30c] ss:$16 sps:$4 sm:$0xff]  }
 0x5b6   :  { %v2295_v60 = vmul.f32 %v4770_v56, %v2283_v53  ;;  %v4711_v53 = vld [vmem:[%s6336_s13 + $0x300] ss:$16 sps:$4 sm:$0xff]   ;;  %v4719_v56 = vld [vmem:[%s6336_s13 + $0x324] ss:$16 sps:$4 sm:$0xff]  }
 0x5b7   :  { %v4772_v0 = vpop.eup %4771  ;;  %v2318_v1 = vmul.f32 %v2301_v51, %v2293_v59  ;;  %v4708_v51 = vld [vmem:[%s6336_s13 + $0x2e8] ss:$16 sps:$4 sm:$0xff]   ;;  %v4722_v59 = vld [vmem:[%s6336_s13 + $0x32c] ss:$16 sps:$4 sm:$0xff]  }
 0x5b8   :  { %v2320_v2 = vmul.f32 %v2309_v55, %v2295_v60  ;;  %v2294_v45 = vmul.f32 %v4772_v0, %v2282_v61  ;;  %v4714_v55 = vld [vmem:[%s6336_s13 + $0x308] ss:$16 sps:$4 sm:$0xff]   ;;  %v4717_v60 = vld [vmem:[%s6336_s13 + $0x320] ss:$16 sps:$4 sm:$0xff]  }
 0x5b9   :  { %v4774_v5 = vpop.eup %4773  ;;  %v2343_v8 = vadd.f32 %v2326_v17, %v2318_v1  ;;  %v4720_v61 = vld [vmem:[%s6336_s13 + $0x328] ss:$16 sps:$4 sm:$0xff]   ;;  %v4723_v0 = vld [vmem:[%s6336_s13 + $0x340] ss:$16 sps:$4 sm:$0xff]   ;;  %v4731_v17 = vld [vmem:[%s6336_s13 + $0x364] ss:$16 sps:$4 sm:$0xff]  }
 0x5ba   :  { %v2319_v6 = vmul.f32 %v2305_v62, %v2294_v45  ;;  %v6076_v7 = vadd.f32 %v2334_v63, %v2320_v2  ;;  %v2296_v21 = vmul.f32 %v4774_v5, %v2284_v18  ;;  %v4725_v62 = vld [vmem:[%s6336_s13 + $0x344] ss:$16 sps:$4 sm:$0xff]   ;;  %v4728_v63 = vld [vmem:[%s6336_s13 + $0x34c] ss:$16 sps:$4 sm:$0xff]   ;;  %v4726_v1 = vld [vmem:[%s6336_s13 + $0x348] ss:$16 sps:$4 sm:$0xff]  }
 0x5bb   :  { %v2347_v15 = vpack.c.bf16 %v2343_v8, %v2343_v8  ;;  %v4734_v2 = vld [vmem:[%s6336_s13 + $0x36c] ss:$16 sps:$4 sm:$0xff]   ;;  %v4729_v45 = vld [vmem:[%s6336_s13 + $0x360] ss:$16 sps:$4 sm:$0xff]   ;;  %v4737_v18 = vld [vmem:[%s6336_s13 + $0x384] ss:$16 sps:$4 sm:$0xff]  }
 0x5bc   :  { %v2344_v10 = vadd.f32 %v2330_v3, %v2319_v6  ;;  %v2321_v11 = vmul.f32 %v2313_v4, %v2296_v21  ;;  %v4732_v3 = vld [vmem:[%s6336_s13 + $0x368] ss:$16 sps:$4 sm:$0xff]   ;;  %v4740_v4 = vld [vmem:[%s6336_s13 + $0x38c] ss:$16 sps:$4 sm:$0xff]   ;;  %v4735_v5 = vld [vmem:[%s6336_s13 + $0x380] ss:$16 sps:$4 sm:$0xff]  }
 0x5bd   :  { %v4738_v6 = vld [vmem:[%s6336_s13 + $0x388] ss:$16 sps:$4 sm:$0xff]   ;;  %v4743_v21 = vld [vmem:[%s6336_s13 + $0x3a4] ss:$16 sps:$4 sm:$0xff]   ;;  %v4746_v8 = vld [vmem:[%s6336_s13 + $0x3ac] ss:$16 sps:$4 sm:$0xff]  }
 0x5be   :  { %v2348_v13 = vpack.c.bf16 %v2344_v10, %v2344_v10  ;;  %v2346_v16 = vadd.f32 %v2338_v9, %v2321_v11  ;;  %v4741_v9 = vld [vmem:[%s6336_s13 + $0x3a0] ss:$16 sps:$4 sm:$0xff]   ;;  %v4744_v10 = vld [vmem:[%s6336_s13 + $0x3a8] ss:$16 sps:$4 sm:$0xff]   ;;  %v4749_v11 = vld [vmem:[%s6336_s13 + $0x3c4] ss:$16 sps:$4 sm:$0xff]  }
 0x5c0   :  { %3173 = vmatprep.mubr.bf16.mxu0 %v2348_v13  ;;  %3255 = vmatprep.mubr.bf16.mxu1 %v2348_v13  ;;  %v2350_v23 = vpack.c.bf16 %v2346_v16, %v2346_v16  ;;  %v4752_v13 = vld [vmem:[%s6336_s13 + $0x3cc] ss:$16 sps:$4 sm:$0xff]  }
 0x5c1   :  { %3174 = vmatmul.mubr.bf16.vlgmr.msra.gmra.mrb[24].mxu0 %v2347_v15  ;;  %3256 = vmatmul.mubr.bf16.vlgmr.msra.gmra.mrb[12].mxu1 %v2347_v15  ;;  %v4755_v15 = vld [vmem:[%s6336_s13 + $0x3e4] ss:$16 sps:$4 sm:$0xff]   ;;  %v4758_v16 = vld [vmem:[%s6336_s13 + $0x3ec] ss:$16 sps:$4 sm:$0xff]  }
 0x5c2   :  { %3183 = vmatpush1.bf16.msra.mxu0 %v4663_v14  ;;  %3265 = vmatpush1.bf16.msra.mxu1 %v4666_v22  ;;  %v4747_v14 = vld [vmem:[%s6336_s13 + $0x3c0] ss:$16 sps:$4 sm:$0xff]   ;;  %v4750_v22 = vld [vmem:[%s6336_s13 + $0x3c8] ss:$16 sps:$4 sm:$0xff]  }
 0x5c3   :  { %3214 = vmatprep.mubr.bf16.mxu0 %v2350_v23  ;;  %3296 = vmatprep.mubr.bf16.mxu1 %v2350_v23  ;;  %v2349_v23 = vpack.c.bf16 %v6076_v7, %v6076_v7  ;;  %v3503_v7 = vld [vmem:[#allocation13 + $0x190] sm:$0xff] }
 0x5c4   :  { %3184 = vmatprep.subr.bf16.mxu0 %v4671_v19  ;;  %3266 = vmatprep.subr.bf16.mxu1 %v4674_v20  ;;  %v4753_v19 = vld [vmem:[%s6336_s13 + $0x3e0] ss:$16 sps:$4 sm:$0xff]   ;;  %v4756_v20 = vld [vmem:[%s6336_s13 + $0x3e8] ss:$16 sps:$4 sm:$0xff]   ;;  %s5011_s13 = smov [#allocation16]  }
 0x5c5   :  { %s3671_s2 = sshll.u32 %s5011_s13, 4  ;;  %s3672_s2 = int_to_ptr.vmem [resolvable:$true] %s3671_s2 }
 0x5c6   :  { %3185 = vmatpush1.bf16.msra.mxu0 %v4669_v24  ;;  %3267 = vmatpush1.bf16.msra.mxu1 %v4672_v25  ;;  %v3469_v24 = vld [vmem:[#allocation13 + $0x80] sm:$0xff]  ;;  %v3470_v25 = vld [vmem:[#allocation13 + $0x88] sm:$0xff]  ;;  %s4959_s24 = scalar_lea.vmem %s3672_s2, 32  ;;  %p4964_p9 = scmp.lt.s32.totalorder %s3672_s2, %s3672_s2 }
 0x5c7   :  { %3186 = vmatprep.subr.bf16.mxu0 %v4677_v27  ;;  %3268 = vmatprep.subr.bf16.mxu1 %v4680_v28  ;;  %v3501_v27 = vld [vmem:[#allocation13 + $0x180] sm:$0xff]  ;;  %v4192_v28 = vpack.c.bf16 %v3470_v25, %v3469_v24  ;;  %v3479_v24 = vld [vmem:[#allocation13 + $0xd0] sm:$0xff]  ;;  %v3480_v25 = vld [vmem:[#allocation13 + $0xd8] sm:$0xff]  ;;  %p4960_p8 = scmp.ne.s32.totalorder %s3672_s2, %s4959_s24  ;;  %p4965_p10 = scmp.lt.s32.totalorder %s4959_s24, %s4959_s24 }
 0x5c9   :  { %p4966_p11 = por %p4965_p10, %p4964_p9 }
 0x5ca   :  { %3187 = vmatpush1.bf16.msra.mxu0 %v4675_v29  ;;  %3269 = vmatpush1.bf16.msra.mxu1 %v4678_v30  ;;  %v3502_v29 = vld [vmem:[#allocation13 + $0x188] sm:$0xff]  ;;  %v3453_v30 = vld [vmem:[#allocation13] sm:$0xff] }
 0x5cb   :  { %3188 = vmatprep.subr.bf16.mxu0 %v4683_v26  ;;  %3270 = vmatprep.subr.bf16.mxu1 %v4686_v31  ;;  %v3454_v26 = vld [vmem:[#allocation13 + $0x8] sm:$0xff]  ;;  %v4224_v31 = vpack.c.bf16 %v3502_v29, %v3501_v27  ;;  %v3511_v27 = vld [vmem:[#allocation13 + $0x1d0] sm:$0xff]  ;;  %v3512_v29 = vld [vmem:[#allocation13 + $0x1d8] sm:$0xff]  ;;  %p4967_p12 = pnand %p4966_p11, %p4960_p8 }
 0x5ce   :  { %3189 = vmatpush1.bf16.msra.mxu0 %v4681_v12  ;;  %3271 = vmatpush1.bf16.msra.mxu1 %v4684_v32  ;;  %v4194_v12 = vpack.c.bf16 %v3454_v26, %v3453_v30  ;;  %v3485_v32 = vld [vmem:[#allocation13 + $0x100] sm:$0xff]  ;;  %v3463_v30 = vld [vmem:[#allocation13 + $0x50] sm:$0xff]  ;;  %v3464_v26 = vld [vmem:[#allocation13 + $0x58] sm:$0xff] }
 0x5cf   :  { %3190 = vmatprep.subr.bf16.mxu0 %v4689_v33  ;;  %3272 = vmatprep.subr.bf16.mxu1 %v4692_v34  ;;  %v3486_v33 = vld [vmem:[#allocation13 + $0x108] sm:$0xff] }
 0x5d0   :  { %v4226_v34 = vpack.c.bf16 %v3486_v33, %v3485_v32  ;;  %v3495_v32 = vld [vmem:[#allocation13 + $0x150] sm:$0xff]  ;;  %v3496_v33 = vld [vmem:[#allocation13 + $0x158] sm:$0xff] }
 0x5d2   :  { %3191 = vmatpush1.bf16.msra.mxu0 %v4687_v37  ;;  %3273 = vmatpush1.bf16.msra.mxu1 %v4690_v40  ;;  %v3471_v37 = vld [vmem:[#allocation13 + $0x90] sm:$0xff]  ;;  %v3472_v40 = vld [vmem:[#allocation13 + $0x98] sm:$0xff] }
 0x5d3   :  { %3192 = vmatprep.subr.bf16.mxu0 %v4695_v41  ;;  %3274 = vmatprep.subr.bf16.mxu1 %v4698_v54  ;;  %v4196_v41 = vpack.c.bf16 %v3472_v40, %v3471_v37  ;;  %v3504_v54 = vld [vmem:[#allocation13 + $0x198] sm:$0xff]  ;;  %v3481_v37 = vld [vmem:[#allocation13 + $0xe0] sm:$0xff]  ;;  %v3482_v40 = vld [vmem:[#allocation13 + $0xe8] sm:$0xff] }
 0x5d6   :  { %3193 = vmatpush1.bf16.msra.mxu0 %v4693_v42  ;;  %3275 = vmatpush1.bf16.msra.mxu1 %v4696_v43  ;;  %v3455_v42 = vld [vmem:[#allocation13 + $0x10] sm:$0xff]  ;;  %v3456_v43 = vld [vmem:[#allocation13 + $0x18] sm:$0xff] }
 0x5d7   :  { %3194 = vmatprep.subr.bf16.mxu0 %v4701_v44  ;;  %3276 = vmatprep.subr.bf16.mxu1 %v4704_v57  ;;  %v4228_v44 = vpack.c.bf16 %v3504_v54, %v3503_v7  ;;  %v4198_v57 = vpack.c.bf16 %v3456_v43, %v3455_v42  ;;  %v3513_v7 = vld [vmem:[#allocation13 + $0x1e0] sm:$0xff]  ;;  %v3514_v54 = vld [vmem:[#allocation13 + $0x1e8] sm:$0xff] }
 0x5d8   :  { %v3465_v42 = vld [vmem:[#allocation13 + $0x60] sm:$0xff]  ;;  %v3466_v43 = vld [vmem:[#allocation13 + $0x68] sm:$0xff] }
 0x5da   :  { %3195 = vmatpush1.bf16.msra.mxu0 %v4699_v46  ;;  %3277 = vmatpush1.bf16.msra.mxu1 %v4702_v47  ;;  %v3487_v46 = vld [vmem:[#allocation13 + $0x110] sm:$0xff]  ;;  %v3488_v47 = vld [vmem:[#allocation13 + $0x118] sm:$0xff] }
 0x5db   :  { %3196 = vmatprep.subr.bf16.mxu0 %v4707_v48  ;;  %3278 = vmatprep.subr.bf16.mxu1 %v4710_v49  ;;  %v4230_v48 = vpack.c.bf16 %v3488_v47, %v3487_v46  ;;  %v3473_v49 = vld [vmem:[#allocation13 + $0xa0] sm:$0xff]  ;;  %v3498_v47 = vld [vmem:[#allocation13 + $0x168] sm:$0xff] }
 0x5dc   :  { %v3497_v46 = vld [vmem:[#allocation13 + $0x160] sm:$0xff] }
 0x5de   :  { %3197 = vmatpush1.bf16.msra.mxu0 %v4705_v50  ;;  %3279 = vmatpush1.bf16.msra.mxu1 %v4708_v51  ;;  %v3474_v50 = vld [vmem:[#allocation13 + $0xa8] sm:$0xff]  ;;  %v3505_v51 = vld [vmem:[#allocation13 + $0x1a0] sm:$0xff] }
 0x5df   :  { %3198 = vmatprep.subr.bf16.mxu0 %v4713_v58  ;;  %3280 = vmatprep.subr.bf16.mxu1 %v4716_v52  ;;  %v4200_v58 = vpack.c.bf16 %v3474_v50, %v3473_v49  ;;  %v3506_v52 = vld [vmem:[#allocation13 + $0x1a8] sm:$0xff]  ;;  %v3483_v49 = vld [vmem:[#allocation13 + $0xf0] sm:$0xff]  ;;  %v3484_v50 = vld [vmem:[#allocation13 + $0xf8] sm:$0xff] }
 0x5e2   :  { %3199 = vmatpush1.bf16.msra.mxu0 %v4711_v53  ;;  %3281 = vmatpush1.bf16.msra.mxu1 %v4714_v55  ;;  %v3457_v53 = vld [vmem:[#allocation13 + $0x20] sm:$0xff]  ;;  %v3458_v55 = vld [vmem:[#allocation13 + $0x28] sm:$0xff] }
 0x5e3   :  { %3200 = vmatprep.subr.bf16.mxu0 %v4719_v56  ;;  %3282 = vmatprep.subr.bf16.mxu1 %v4722_v59  ;;  %v4232_v56 = vpack.c.bf16 %v3506_v52, %v3505_v51  ;;  %v4202_v59 = vpack.c.bf16 %v3458_v55, %v3457_v53  ;;  %v3515_v51 = vld [vmem:[#allocation13 + $0x1f0] sm:$0xff]  ;;  %v3516_v52 = vld [vmem:[#allocation13 + $0x1f8] sm:$0xff] }
 0x5e4   :  { %v3467_v53 = vld [vmem:[#allocation13 + $0x70] sm:$0xff]  ;;  %v3468_v55 = vld [vmem:[#allocation13 + $0x78] sm:$0xff] }
 0x5e6   :  { %3201 = vmatpush1.bf16.msra.mxu0 %v4717_v60  ;;  %3283 = vmatpush1.bf16.msra.mxu1 %v4720_v61  ;;  %v3489_v60 = vld [vmem:[#allocation13 + $0x120] sm:$0xff]  ;;  %v3490_v61 = vld [vmem:[#allocation13 + $0x128] sm:$0xff] }
 0x5e7   :  { %3202 = vmatprep.subr.bf16.mxu0 %v4725_v62  ;;  %3284 = vmatprep.subr.bf16.mxu1 %v4728_v63  ;;  %v4234_v62 = vpack.c.bf16 %v3490_v61, %v3489_v60  ;;  %v3475_v63 = vld [vmem:[#allocation13 + $0xb0] sm:$0xff]  ;;  %v3500_v61 = vld [vmem:[#allocation13 + $0x178] sm:$0xff] }
 0x5e8   :  { %v3499_v60 = vld [vmem:[#allocation13 + $0x170] sm:$0xff] }
 0x5ea   :  { %3203 = vmatpush1.bf16.msra.mxu0 %v4723_v0  ;;  %3285 = vmatpush1.bf16.msra.mxu1 %v4726_v1  ;;  %v3476_v0 = vld [vmem:[#allocation13 + $0xb8] sm:$0xff]  ;;  %v3507_v1 = vld [vmem:[#allocation13 + $0x1b0] sm:$0xff] }
 0x5eb   :  { %3204 = vmatprep.subr.bf16.mxu0 %v4731_v17  ;;  %3286 = vmatprep.subr.bf16.mxu1 %v4734_v2  ;;  %v4204_v17 = vpack.c.bf16 %v3476_v0, %v3475_v63  ;;  %v3508_v2 = vld [vmem:[#allocation13 + $0x1b8] sm:$0xff]  ;;  %v2479_v63 = vld [vmem:[#allocation8] sm:$0xf] }
 0x5ec   :  { %v2484_v0 = vrot.slane %v2479_v63, %v5575_v35 }
 0x5ee   :  { %3205 = vmatpush1.bf16.msra.mxu0 %v4729_v45  ;;  %3287 = vmatpush1.bf16.msra.mxu1 %v4732_v3  ;;  %v3459_v45 = vld [vmem:[#allocation13 + $0x30] sm:$0xff]  ;;  %v3460_v3 = vld [vmem:[#allocation13 + $0x38] sm:$0xff] }
 0x5ef   :  { %3206 = vmatprep.subr.bf16.mxu0 %v4737_v18  ;;  %3288 = vmatprep.subr.bf16.mxu1 %v4740_v4  ;;  %v4236_v18 = vpack.c.bf16 %v3508_v2, %v3507_v1  ;;  %v4206_v4 = vpack.c.bf16 %v3460_v3, %v3459_v45  ;;  %v2492_v1 = vrot.slane %v2479_v63, %v5578_v36 }
 0x5f0   :  { %v2496_v2 = vrot.slane %v2479_v63, %v5587_v39 }
 0x5f2   :  { %3207 = vmatpush1.bf16.msra.mxu0 %v4735_v5  ;;  %3289 = vmatpush1.bf16.msra.mxu1 %v4738_v6  ;;  %v3491_v5 = vld [vmem:[#allocation13 + $0x130] sm:$0xff]  ;;  %v3492_v6 = vld [vmem:[#allocation13 + $0x138] sm:$0xff] }
 0x5f3   :  { %3208 = vmatprep.subr.bf16.mxu0 %v4743_v21  ;;  %3290 = vmatprep.subr.bf16.mxu1 %v4746_v8  ;;  %v4238_v21 = vpack.c.bf16 %v3492_v6, %v3491_v5  ;;  %v3477_v8 = vld [vmem:[#allocation13 + $0xc0] sm:$0xff] }
 0x5f6   :  { %3209 = vmatpush1.bf16.msra.mxu0 %v4741_v9  ;;  %3291 = vmatpush1.bf16.msra.mxu1 %v4744_v10  ;;  %v3478_v9 = vld [vmem:[#allocation13 + $0xc8] sm:$0xff]  ;;  %v3509_v10 = vld [vmem:[#allocation13 + $0x1c0] sm:$0xff] }
 0x5f7   :  { %3210 = vmatprep.subr.bf16.mxu0 %v4749_v11  ;;  %3292 = vmatprep.subr.bf16.mxu1 %v4752_v13  ;;  %v4208_v11 = vpack.c.bf16 %v3478_v9, %v3477_v8  ;;  %v3510_v13 = vld [vmem:[#allocation13 + $0x1c8] sm:$0xff] }
 0x5fa   :  { %3211 = vmatpush1.bf16.msra.mxu0 %v4747_v14  ;;  %3293 = vmatpush1.bf16.msra.mxu1 %v4750_v22  ;;  %v3461_v14 = vld [vmem:[#allocation13 + $0x40] sm:$0xff]  ;;  %v3462_v22 = vld [vmem:[#allocation13 + $0x48] sm:$0xff] }
 0x5fb   :  { %3212 = vmatprep.subr.bf16.mxu0 %v4755_v15  ;;  %3294 = vmatprep.subr.bf16.mxu1 %v4758_v16  ;;  %v4240_v15 = vpack.c.bf16 %v3510_v13, %v3509_v10  ;;  %v4210_v16 = vpack.c.bf16 %v3462_v22, %v3461_v14 }
 0x5fe   :  { %3213 = vmatpush1.bf16.msra.mxu0 %v4753_v19  ;;  %3295 = vmatpush1.bf16.msra.mxu1 %v4756_v20  ;;  %v3493_v19 = vld [vmem:[#allocation13 + $0x140] sm:$0xff]  ;;  %v3494_v20 = vld [vmem:[#allocation13 + $0x148] sm:$0xff] }
 0x5ff   :  { %4193 = vmatprep.subr.bf16.mxu0 %v4192_v28  ;;  %4225 = vmatprep.subr.bf16.mxu1 %v4224_v31  ;;  %v4212_v28 = vpack.c.bf16 %v3480_v25, %v3479_v24  ;;  %v4244_v31 = vpack.c.bf16 %v3512_v29, %v3511_v27 }
 0x601   :  { %3215 = vmatmul.mubr.bf16.vlgmr.msra.gmra.mrb[24].mxu0 %v2349_v23  ;;  %3297 = vmatmul.mubr.bf16.vlgmr.msra.gmra.mrb[12].mxu1 %v2349_v23  ;;  %v4242_v23 = vpack.c.bf16 %v3494_v20, %v3493_v19 }
 0x602   :  { %4195 = vmatpush3.bf16.msra.mxu0 %v4194_v12  ;;  %4227 = vmatpush3.bf16.msra.mxu1 %v4226_v34  ;;  %v4214_v12 = vpack.c.bf16 %v3464_v26, %v3463_v30  ;;  %v4246_v34 = vpack.c.bf16 %v3496_v33, %v3495_v32 }
 0x603   :  { %4197 = vmatprep.subr.bf16.mxu0 %v4196_v41  ;;  %4229 = vmatprep.subr.bf16.mxu1 %v4228_v44  ;;  %v4216_v41 = vpack.c.bf16 %v3482_v40, %v3481_v37  ;;  %v4248_v44 = vpack.c.bf16 %v3514_v54, %v3513_v7 }
 0x606   :  { %4199 = vmatpush3.bf16.msra.mxu0 %v4198_v57  ;;  %4231 = vmatpush3.bf16.msra.mxu1 %v4230_v48  ;;  %v4218_v57 = vpack.c.bf16 %v3466_v43, %v3465_v42  ;;  %v4250_v48 = vpack.c.bf16 %v3498_v47, %v3497_v46 }
 0x607   :  { %4201 = vmatprep.subr.bf16.mxu0 %v4200_v58  ;;  %4233 = vmatprep.subr.bf16.mxu1 %v4232_v56  ;;  %v4220_v58 = vpack.c.bf16 %v3484_v50, %v3483_v49  ;;  %v4252_v56 = vpack.c.bf16 %v3516_v52, %v3515_v51 }
 0x60a   :  { %4203 = vmatpush3.bf16.msra.mxu0 %v4202_v59  ;;  %4235 = vmatpush3.bf16.msra.mxu1 %v4234_v62  ;;  %v4222_v59 = vpack.c.bf16 %v3468_v55, %v3467_v53  ;;  %v4254_v62 = vpack.c.bf16 %v3500_v61, %v3499_v60 }
 0x60b   :  { %4205 = vmatprep.subr.bf16.mxu0 %v4204_v17  ;;  %4237 = vmatprep.subr.bf16.mxu1 %v4236_v18  ;;  %v2488_v17 = vrot.slane %v2479_v63, %v5584_v38 }
 0x60e   :  { %4207 = vmatpush3.bf16.msra.mxu0 %v4206_v4  ;;  %4239 = vmatpush3.bf16.msra.mxu1 %v4238_v21 }
 0x60f   :  { %4209 = vmatprep.subr.bf16.mxu0 %v4208_v11  ;;  %4241 = vmatprep.subr.bf16.mxu1 %v4240_v15 }
 0x612   :  { %4211 = vmatpush3.bf16.msra.mxu0 %v4210_v16  ;;  %4243 = vmatpush3.bf16.msra.mxu1 %v4242_v23 }
 0x613   :  { %4213 = vmatprep.subr.bf16.mxu0 %v4212_v28  ;;  %4245 = vmatprep.subr.bf16.mxu1 %v4244_v31 }
 0x616   :  { %4215 = vmatpush3.bf16.msra.mxu0 %v4214_v12  ;;  %4247 = vmatpush3.bf16.msra.mxu1 %v4246_v34 }
 0x617   :  { %4217 = vmatprep.subr.bf16.mxu0 %v4216_v41  ;;  %4249 = vmatprep.subr.bf16.mxu1 %v4248_v44 }
 0x61a   :  { %4219 = vmatpush3.bf16.msra.mxu0 %v4218_v57  ;;  %4251 = vmatpush3.bf16.msra.mxu1 %v4250_v48 }
 0x61b   :  { %4221 = vmatprep.subr.bf16.mxu0 %v4220_v58  ;;  %4253 = vmatprep.subr.bf16.mxu1 %v4252_v56 }
 0x61e   :  { %4223 = vmatpush3.bf16.msra.mxu0 %v4222_v59  ;;  %4255 = vmatpush3.bf16.msra.mxu1 %v4254_v62 }
 0x6d4   :  { %v3216_v45 = vpop.f32.mrb[24].mxu0  ;;  %v3298_v3 = vpop.f32.mrb[12].mxu1 }
 0x6d5   :  { %v4260_v18 = vadd.f32 %v3216_v45, %v2484_v0  ;;  %v4262_v4 = vadd.f32 %v3298_v3, %v2492_v1  ;;  %v3218_v5 = vpop.f32.mrb[25].mxu0  ;;  %v3300_v6 = vpop.f32.mrb[13].mxu1 }
 0x6d6   :  { %v4261_v21 = vadd.f32 %v3218_v5, %v2488_v17  ;;  %v4263_v8 = vadd.f32 %v3300_v6, %v2496_v2  ;;  %v3220_v9 = vpop.f32.mrb[26].mxu0  ;;  %v3302_v10 = vpop.f32.mrb[14].mxu1 }
 0x6d7   :  { %v6271_v11 = vmax.f32 %v4260_v18, 0.0  ;;  %v6273_v13 = vmax.f32 %v4262_v4, 0.0  ;;  %v3221_v14 = vpop.f32.mrb[27].mxu0  ;;  %v3303_v22 = vpop.f32.mrb[15].mxu1 }
 0x6d8   :  { %v6275_v15 = vmax.f32 %v4261_v21, 0.0  ;;  %v6277_v16 = vmax.f32 %v4263_v8, 0.0 }
 0x6d9   :  { %v3311_v19 = vsel %vm452_vm3, %v6271_v11, 0.0  ;;  %v3343_v20 = vmul.f32 %v6271_v11, %v6271_v11  ;;  %v3325_v23 = vsel %vm452_vm3, %v6273_v13, 0.0  ;;  %v3345_v24 = vmul.f32 %v6273_v13, %v6273_v13 }
 0x6da   :  { %v3312_v25 = vrot.slane %v3311_v19, 4  ;;  %v3326_v27 = vrot.slane %v3325_v23, 4  ;;  %v3318_v28 = vsel %vm452_vm3, %v6275_v15, 0.0  ;;  %v3344_v29 = vmul.f32 %v6275_v15, %v6275_v15 }
 0x6db   :  { %v3347_v30 = vsel %vm452_vm3, %v3343_v20, 0.0  ;;  %v3361_v26 = vsel %vm452_vm3, %v3345_v24, 0.0  ;;  %v3319_v31 = vrot.slane %v3318_v28, 4  ;;  %v3332_v12 = vsel %vm452_vm3, %v6277_v16, 0.0 }
 0x6dc   :  { %v3313_v32 = vadd.f32 %v3312_v25, %v3311_v19  ;;  %v3348_v33 = vrot.slane %v3347_v30, 4  ;;  %v3327_v34 = vadd.f32 %v3326_v27, %v3325_v23  ;;  %v3362_v37 = vrot.slane %v3361_v26, 4 }
 0x6dd   :  { %v3320_v40 = vadd.f32 %v3319_v31, %v3318_v28  ;;  %v3354_v7 = vsel %vm452_vm3, %v3344_v29, 0.0  ;;  %v3333_v41 = vrot.slane %v3332_v12, 4  ;;  %v3346_v54 = vmul.f32 %v6277_v16, %v6277_v16 }
 0x6de   :  { %v3314_v42 = vrot.slane %v3313_v32, 2  ;;  %v3349_v43 = vadd.f32 %v3348_v33, %v3347_v30  ;;  %v3328_v44 = vrot.slane %v3327_v34, 2  ;;  %v3363_v57 = vadd.f32 %v3362_v37, %v3361_v26 }
 0x6df   :  { %v3321_v46 = vrot.slane %v3320_v40, 2  ;;  %v3355_v47 = vrot.slane %v3354_v7, 4  ;;  %v3334_v48 = vadd.f32 %v3333_v41, %v3332_v12  ;;  %v3368_v49 = vsel %vm452_vm3, %v3346_v54, 0.0 }
 0x6e0   :  { %v3315_v50 = vadd.f32 %v3314_v42, %v3313_v32  ;;  %v3350_v51 = vrot.slane %v3349_v43, 2  ;;  %v3329_v58 = vadd.f32 %v3328_v44, %v3327_v34  ;;  %v3364_v52 = vrot.slane %v3363_v57, 2 }
 0x6e1   :  { %v3322_v53 = vadd.f32 %v3321_v46, %v3320_v40  ;;  %v3356_v55 = vadd.f32 %v3355_v47, %v3354_v7  ;;  %v3335_v56 = vrot.slane %v3334_v48, 2  ;;  %v3369_v59 = vrot.slane %v3368_v49, 4  ;;  %v3309_v46 = vld [vmem:[#allocation10] sm:$0xf] }
 0x6e2   :  { %v3316_v60 = vrot.slane %v3315_v50, 1  ;;  %v3351_v61 = vadd.f32 %v3350_v51, %v3349_v43  ;;  %v3330_v62 = vrot.slane %v3329_v58, 1  ;;  %v3365_v63 = vadd.f32 %v3364_v52, %v3363_v57  ;;  %v3310_v51 = vld [vmem:[#allocation11] sm:$0xf] }
 0x6e3   :  { %v3323_v0 = vrot.slane %v3322_v53, 1  ;;  %v3357_v1 = vrot.slane %v3356_v55, 2  ;;  %v3336_v17 = vadd.f32 %v3335_v56, %v3334_v48  ;;  %v3370_v2 = vadd.f32 %v3369_v59, %v3368_v49 }
 0x6e4   :  { %v3317_v45 = vadd.f32 %v3316_v60, %v3315_v50  ;;  %v3352_v3 = vrot.slane %v3351_v61, 1  ;;  %v3331_v18 = vadd.f32 %v3330_v62, %v3329_v58  ;;  %v3366_v4 = vrot.slane %v3365_v63, 1 }
 0x6e5   :  { %v3324_v5 = vadd.f32 %v3323_v0, %v3322_v53  ;;  %v3358_v6 = vadd.f32 %v3357_v1, %v3356_v55  ;;  %v3337_v21 = vrot.slane %v3336_v17, 1  ;;  %v3371_v8 = vrot.slane %v3370_v2, 2 }
 0x6e6   :  { %v3339_v9 = vmul.f32 0.5, %v3317_v45  ;;  %v3353_v10 = vadd.f32 %v3352_v3, %v3351_v61  ;;  %v3341_v14 = vmul.f32 0.5, %v3331_v18  ;;  %v3367_v22 = vadd.f32 %v3366_v4, %v3365_v63 }
 0x6e7   :  { %v3340_v19 = vmul.f32 0.5, %v3324_v5  ;;  %v3359_v20 = vrot.slane %v3358_v6, 1  ;;  %v3338_v23 = vadd.f32 %v3337_v21, %v3336_v17  ;;  %v3372_v24 = vadd.f32 %v3371_v8, %v3370_v2  ;;  %v4018_v21 = vld [vmem:[#allocation14] ss:$0 sm:$0xff] }
 0x6e8   :  { %v3375_v25 = vmul.f32 0.5, %v3353_v10  ;;  %v3379_v27 = vmul.f32 %v3339_v9, %v3339_v9  ;;  %v3377_v28 = vmul.f32 0.5, %v3367_v22  ;;  %v3381_v29 = vmul.f32 %v3341_v14, %v3341_v14 }
 0x6e9   :  { %v3360_v30 = vadd.f32 %v3359_v20, %v3358_v6  ;;  %v3380_v26 = vmul.f32 %v3340_v19, %v3340_v19  ;;  %v3342_v12 = vmul.f32 0.5, %v3338_v23  ;;  %v3373_v32 = vrot.slane %v3372_v24, 1 }
 0x6ea   :  { %v3383_v31 = vsub.f32 %v3375_v25, %v3379_v27  ;;  %v3385_v33 = vsub.f32 %v3377_v28, %v3381_v29  ;;  %v3387_v47 = vsub.f32 %v6271_v11, %v3339_v9  ;;  %v3407_v58 = vrot.slane %v3309_v46, %v5575_v35 }
 0x6eb   :  { %v3376_v34 = vmul.f32 0.5, %v3360_v30  ;;  %v3374_v40 = vadd.f32 %v3373_v32, %v3372_v24  ;;  %v3382_v7 = vmul.f32 %v3342_v12, %v3342_v12  ;;  %v3389_v52 = vsub.f32 %v6273_v13, %v3341_v14 }
 0x6ec   :  { %v3391_v37 = vadd.f32 1e-05, %v3383_v31  ;;  %v3393_v41 = vadd.f32 1e-05, %v3385_v33  ;;  %v3388_v53 = vsub.f32 %v6275_v15, %v3340_v19  ;;  %v3411_v55 = vrot.slane %v3309_v46, %v5584_v38 }
 0x6ed   :  { %v3384_v54 = vsub.f32 %v3376_v34, %v3380_v26  ;;  %v3378_v42 = vmul.f32 0.5, %v3374_v40  ;;  %v3436_v61 = vrot.slane %v3310_v51, %v5584_v38  ;;  %v3415_v62 = vrot.slane %v3309_v46, %v5578_v36 }
 0x6ee   :  { %4775 = vrsqrt.f32 %v3391_v37  ;;  %v3390_v11 = vsub.f32 %v6277_v16, %v3342_v12  ;;  %v3419_v63 = vrot.slane %v3309_v46, %v5587_v39  ;;  %v3432_v1 = vrot.slane %v3310_v51, %v5575_v35 }
 0x6ef   :  { %4777 = vrsqrt.f32 %v3393_v41  ;;  %v3392_v43 = vadd.f32 1e-05, %v3384_v54  ;;  %v3386_v44 = vsub.f32 %v3378_v42, %v3382_v7  ;;  %v3444_v15 = vrot.slane %v3310_v51, %v5587_v39 }
 0x6f0   :  { %v3440_v18 = vrot.slane %v3310_v51, %v5578_v36 }
 0x6f1   :  { %4779 = vrsqrt.f32 %v3392_v43  ;;  %v3394_v57 = vadd.f32 1e-05, %v3386_v44 }
 0x6f3   :  { %4781 = vrsqrt.f32 %v3394_v57 }
 0x6f8   :  { %v4776_v48 = vpop.eup %4775 }
 0x6f9   :  { %v4778_v49 = vpop.eup %4777  ;;  %v3399_v50 = vmul.f32 %v4776_v48, %v3387_v47 }
 0x6fa   :  { %v3401_v59 = vmul.f32 %v4778_v49, %v3389_v52 }
 0x6fb   :  { %v4780_v56 = vpop.eup %4779  ;;  %v3424_v0 = vmul.f32 %v3407_v58, %v3399_v50 }
 0x6fc   :  { %v3400_v60 = vmul.f32 %v4780_v56, %v3388_v53  ;;  %v3426_v3 = vmul.f32 %v3415_v62, %v3401_v59 }
 0x6fd   :  { %v4782_v17 = vpop.eup %4781  ;;  %v3449_v38 = vadd.f32 %v3432_v1, %v3424_v0 }
 0x6fe   :  { %v3425_v13 = vmul.f32 %v3411_v55, %v3400_v60  ;;  %v3402_v2 = vmul.f32 %v4782_v17, %v3390_v11  ;;  %v3451_v16 = vadd.f32 %v3440_v18, %v3426_v3 }
 0x700   :  { %v3450_v45 = vadd.f32 %v3436_v61, %v3425_v13  ;;  %v3427_v4 = vmul.f32 %v3419_v63, %v3402_v2 }
 0x702   :  { %3588 = vmatprep.mubr.f32.mxu0 %v3450_v45  ;;  %v3452_v5 = vadd.f32 %v3444_v15, %v3427_v4 }
 0x703   :  { %3589 = vmatmul.mubr.f32.vlgmr.msra.gmra.mrb[28].mxu0 %v3449_v38 }
 0x704   :  { %3658 = vmatprep.mubr.f32.mxu1 %v3452_v5 }
 0x705   :  { %3659 = vmatmul.mubr.f32.vlgmr.msra.gmra.mrb[16].mxu1 %v3451_v16 }
 0x7d6   :  { %v4082_v6 = vpop.f32.mrb[28].mxu0 }
 0x7d7   :  { %v4083_v35 = vpop.f32.mrb[29].mxu0 }
 0x7d8   :  { %v4084_v8 = vadd.f32 %v4083_v35, %v4082_v6  ;;  %v4117_v9 = vpop.f32.mrb[16].mxu1 }
 0x7d9   :  { %v4118_v14 = vpop.f32.mrb[17].mxu1 }
 0x7da   :  { %v3591_v10 = vadd.f32 %v4084_v8, %v4018_v21  ;;  %v4119_v39 = vadd.f32 %v4118_v14, %v4117_v9 }
 0x7dc   :  { %v3661_v22 = vadd.f32 %v4119_v39, %v3591_v10 }
 0x7de   :  { %3664 = vst [vmem:[#allocation16] sm:$0x3] %v3661_v22 }
 0x7df   :  { %4970 = shalt.err (!%p4967_p12)
}
 0x7e0   :  { %s6357_s4 = sld [smem:[#allocation27_spill]] }
 0x7e6   :  { %s4971_s23 = scalar_lea.hbm %s6357_s4, 32 }
 0x7e7   :  { %p4972_p13 = scmp.ne.s32.totalorder %s6357_s4, %s4971_s23  ;;  %p4975_p0 = scmp.lt.u32.totalorder %s4971_s23, %s6357_s4 }
 0x7e9   :  { %p4977_p1 = pnand %p4975_p0, %p4972_p13 }
 0x7eb   :  { %4980 = shalt.err (!%p4977_p1)
}
 0x7ec   :  { %3674 = dma.vmem_to_hbm [thread:$0]  %s3672_s2, 32, %s6357_s4, [#allocation4]  }
 0x7ed   :  { %4991 = dma.done.wait [#allocation4], 32  }
 0x7ee   :  { %4992 = vsyncadd [#allocation4], 4294967264 }
 0x7ef   :  { %3678 = vsyncpa [#allocation3], 1 }
 0x7f0   :  { %3679 = vsyncpa [#allocation6], 1 }
 0x7f1   :  { %3680 = vsyncpa [#allocation9], 1 }
 0x7f2   :  { %3681 = vsyncpa [#allocation12], 1 }
 0x7f3   :  { %3682 = vsyncpa [#allocation15], 1 }
 0x7f4   :  { %3683 = vsyncpa [#allocation4], 1 }

</bundles_post_ra>
